<compile_context>
chip_gen: v6e
topology: v6e:2x2x1
jax: 0.10.0
libtpu: 0.0.40
codegen_flags: <defaults>
</compile_context>

<pallas_src>
import jax
import jax.numpy as jnp
from jax import lax
from jax.experimental import pallas as pl
from jax.experimental.pallas import tpu as pltpu

EPS = 1e-5
G = 6                   # conv groups
C = 720                 # total channels
CG = C // G             # 120 real channels per group
CP = 128                # padded channels per group (lane-dense, full MXU tile)
H = W = 14
HW = H * W              # 196 real spatial positions
KH = KW = 3
RS = W + 2              # 16: width-padded row stride (1 | 14 | 1)
HPW = H * RS            # 224 flattened (width-padded) positions
NPAD = HPW - HW         # 28 width-pad positions per plane
HALO = 24               # zeroed halo rows above/below (>= RS+1, multiple of 8)
TOT = HPW + 2 * HALO    # 272 rows in the haloed scratch

_TAPS = [(dy, dx) for dy in (-1, 0, 1) for dx in (-1, 0, 1)]


def _fused_kernel(x_ref, w_ref, g1_ref, b1_ref, g2_ref, b2_ref, o_ref, ypad_ref):
    # Column mask (built in-kernel, no DMA'd mask input): 0 at the two
    # width-pad columns of every 16-wide row, 1 elsewhere.  (HPW, 1) f32.
    col = jnp.bitwise_and(lax.broadcasted_iota(jnp.int32, (HPW, 1), 0), RS - 1)
    cmask = jnp.logical_and(col != 0, col != RS - 1).astype(jnp.float32)

    x = x_ref[0]                                         # (HPW, CP) f32, pads are 0

    # ---- BN #1 (training-mode batch stats) + ReLU ---------------------------
    # Width-pad columns / padded lanes of x are exactly zero, so only the
    # variance needs a count correction (pads contribute mean^2 each to d^2).
    mean1 = jnp.sum(x, axis=0, keepdims=True) * (1.0 / HW)
    d1 = x - mean1
    var1 = (jnp.sum(d1 * d1, axis=0, keepdims=True)
            - NPAD * mean1 * mean1) * (1.0 / HW)
    y = d1 * (lax.rsqrt(var1 + EPS) * g1_ref[0]) + b1_ref[0]
    y = jnp.maximum(y, 0.0) * cmask                      # re-zero width-pad columns

    # ---- haloed, width-padded conv-input slab -------------------------------
    # Only the halo rows are zeroed; the interior is fully rewritten each step
    # (unconditional -> megacore-safe).
    ypad_ref[pl.ds(0, HALO), :] = jnp.zeros((HALO, CP), jnp.float32)
    ypad_ref[pl.ds(HALO + HPW, HALO), :] = jnp.zeros((HALO, CP), jnp.float32)
    ypad_ref[pl.ds(HALO, HPW), :] = y

    # ---- 3x3 grouped conv: 9 shifted (HPW,CP)x(CP,CP) bf16 MXU matmuls ------
    # No wrap masks needed: width-pad columns and halo rows are zero.
    acc = jnp.zeros((HPW, CP), jnp.float32)
    for t, (dy, dx) in enumerate(_TAPS):
        off = dy * RS + dx
        sh = ypad_ref[pl.ds(HALO + off, HPW), :]         # shifted slab (static offset)
        acc = acc + jnp.dot(sh.astype(jnp.bfloat16), w_ref[0, t],
                            preferred_element_type=jnp.float32)

    # ---- BN #2 (training-mode batch stats over the 196 real positions) ------
    accm = acc * cmask                                   # single mask multiply
    mean2 = jnp.sum(accm, axis=0, keepdims=True) * (1.0 / HW)
    d2 = accm - mean2
    var2 = (jnp.sum(d2 * d2, axis=0, keepdims=True)
            - NPAD * mean2 * mean2) * (1.0 / HW)
    out = d2 * (lax.rsqrt(var2 + EPS) * g2_ref[0]) + b2_ref[0]
    o_ref[0] = out.astype(o_ref.dtype)                   # pad positions sliced off later


def _pallas_forward(x_g, w_g, g1, b1, g2, b2):
    grid_spec = pltpu.PrefetchScalarGridSpec(
        num_scalar_prefetch=0,
        grid=(G,),                                       # 1 group / step -> pipelining
        in_specs=[
            pl.BlockSpec((1, HPW, CP), lambda g: (g, 0, 0)),
            pl.BlockSpec((1, KH * KW, CP, CP), lambda g: (g, 0, 0, 0)),
            pl.BlockSpec((1, 1, CP), lambda g: (g, 0, 0)),
            pl.BlockSpec((1, 1, CP), lambda g: (g, 0, 0)),
            pl.BlockSpec((1, 1, CP), lambda g: (g, 0, 0)),
            pl.BlockSpec((1, 1, CP), lambda g: (g, 0, 0)),
        ],
        out_specs=pl.BlockSpec((1, HPW, CP), lambda g: (g, 0, 0)),
        scratch_shapes=[pltpu.VMEM((TOT, CP), jnp.float32)],
    )
    return pl.pallas_call(
        _fused_kernel,
        out_shape=jax.ShapeDtypeStruct((G, HPW, CP), jnp.float32),
        grid_spec=grid_spec,
        compiler_params=pltpu.CompilerParams(
            dimension_semantics=("parallel",)),
    )(x_g, w_g, g1, b1, g2, b2)


def prepare_params(w_oihw, gamma1, beta1, gamma2, beta2):
    """One-time (init) layout transform, channel padding and bf16 weight cast."""
    w = w_oihw.reshape(G, CG, CG, KH, KW)            # (G, Cout, Cin, kh, kw)
    w = jnp.transpose(w, (0, 3, 4, 2, 1))            # (G, kh, kw, Cin, Cout)
    w = w.reshape(G, KH * KW, CG, CG)                # (G, 9, Cin, Cout)
    w = jnp.pad(w, ((0, 0), (0, 0), (0, CP - CG), (0, CP - CG)))
    w = w.astype(jnp.bfloat16)                       # halves the dominant HBM stream

    def pad_vec(p, fill):
        p = p.reshape(G, CG)
        p = jnp.pad(p, ((0, 0), (0, CP - CG)), constant_values=fill)
        return p.reshape(G, 1, CP)

    g1 = pad_vec(gamma1, 1.0)
    b1 = pad_vec(beta1, 0.0)
    g2 = pad_vec(gamma2, 1.0)
    b2 = pad_vec(beta2, 0.0)
    return w, g1, b1, g2, b2


@jax.jit
def fused_forward(x_nchw, w, g1, b1, g2, b2):
    """Hot path: activation layout transform + the fused kernel."""
    x = x_nchw.reshape(G, CG, H, W)
    x = jnp.transpose(x, (0, 2, 3, 1))                       # (G, H, W, CG)
    x = jnp.pad(x, ((0, 0), (0, 0), (1, 1), (0, CP - CG)))   # (G, H, 16, CP), zero pads
    x = x.reshape(G, HPW, CP)
    out = _pallas_forward(x, w, g1, b1, g2, b2)              # (G, HPW, CP)
    out = out.reshape(G, H, RS, CP)[:, :, 1:1 + W, :CG]      # (G, H, W, CG)
    out = jnp.transpose(out, (0, 3, 1, 2)).reshape(1, C, H, W)
    return out


def _reference(x, w, g1, b1, g2, b2, conv_dtype=jnp.float32):
    # Pure-JAX reference mirroring PyTorch training-mode BN semantics.
    def bn(t, gamma, beta):
        mean = t.mean(axis=(0, 2, 3), keepdims=True)
        var = ((t - mean) ** 2).mean(axis=(0, 2, 3), keepdims=True)  # biased
        return ((t - mean) * lax.rsqrt(var + EPS)
                * gamma.reshape(1, -1, 1, 1) + beta.reshape(1, -1, 1, 1))

    y = jnp.maximum(bn(x, g1, b1), 0.0)
    z = lax.conv_general_dilated(
        y.astype(conv_dtype), w.astype(conv_dtype),
        window_strides=(1, 1), padding=((1, 1), (1, 1)),
        feature_group_count=G,
        dimension_numbers=("NCHW", "OIHW", "NCHW"),
        preferred_element_type=jnp.float32)
    return bn(z, g2, b2)


if __name__ == "__main__":
    key = jax.random.PRNGKey(0)
    kx, kw, k1, k2, k3, k4 = jax.random.split(key, 6)

    x = jax.random.normal(kx, (1, C, H, W), dtype=jnp.float32)
    wconv = 0.05 * jax.random.normal(kw, (C, CG, KH, KW), dtype=jnp.float32)
    gamma1 = 1.0 + 0.1 * jax.random.normal(k1, (C,), dtype=jnp.float32)
    beta1 = 0.1 * jax.random.normal(k2, (C,), dtype=jnp.float32)
    gamma2 = 1.0 + 0.1 * jax.random.normal(k3, (C,), dtype=jnp.float32)
    beta2 = 0.1 * jax.random.normal(k4, (C,), dtype=jnp.float32)

    # one-time init-path work (layout transform / padding / bf16 cast)
    params = prepare_params(wconv, gamma1, beta1, gamma2, beta2)
    params = jax.tree_util.tree_map(jax.block_until_ready, params)

    out = jax.block_until_ready(fused_forward(x, *params))
    assert out.shape == (1, C, H, W)

    # Tight check vs a reference with the same mixed precision (bf16 conv
    # operands, f32 accumulation) and a loose sanity check vs full f32.
    ref_mixed = _reference(x, wconv, gamma1, beta1, gamma2, beta2,
                           conv_dtype=jnp.bfloat16)
    ref_f32 = _reference(x, wconv, gamma1, beta1, gamma2, beta2,
                         conv_dtype=jnp.float32)
    err_mixed = float(jnp.max(jnp.abs(out - ref_mixed)))
    err_f32 = float(jnp.max(jnp.abs(out - ref_f32)))
    assert jnp.allclose(out, ref_mixed, atol=2e-3, rtol=2e-3), err_mixed
    assert jnp.allclose(out, ref_f32, atol=5e-2, rtol=5e-2), err_f32

    print("KERNEL_OK")
</pallas_src>

<mosaic_0001>
module attributes {stable_mosaic.version = 11 : i64} {
  func.func @_fused_kernel(%arg0: i32, %arg1: memref<1x224x128xf32, #tpu.memory_space<vmem>>, %arg2: memref<1x9x128x128xbf16, #tpu.memory_space<vmem>>, %arg3: memref<1x1x128xf32, #tpu.memory_space<vmem>>, %arg4: memref<1x1x128xf32, #tpu.memory_space<vmem>>, %arg5: memref<1x1x128xf32, #tpu.memory_space<vmem>>, %arg6: memref<1x1x128xf32, #tpu.memory_space<vmem>>, %arg7: memref<1x224x128xf32, #tpu.memory_space<vmem>>, %arg8: memref<272x128xf32, #tpu.memory_space<vmem>>) attributes {dimension_semantics = [#tpu.dimension_semantics<parallel>], iteration_bounds = array<i64: 6>, scalar_prefetch = 0 : i64, scratch_operands = 1 : i64, tpu.core_type = #tpu.core_type<tc>, window_params = [{transform_indices = @transform_0, window_bounds = array<i64: 1, 224, 128>}, {transform_indices = @transform_1, window_bounds = array<i64: 1, 9, 128, 128>}, {transform_indices = @transform_2, window_bounds = array<i64: 1, 1, 128>}, {transform_indices = @transform_3, window_bounds = array<i64: 1, 1, 128>}, {transform_indices = @transform_4, window_bounds = array<i64: 1, 1, 128>}, {transform_indices = @transform_5, window_bounds = array<i64: 1, 1, 128>}, {transform_indices = @transform_6, window_bounds = array<i64: 1, 224, 128>}]} {
    %0 = tpu.iota {dimensions = array<i32: 0>} : vector<224x1xi32>
    %c15_i32 = arith.constant 15 : i32
    %1 = vector.broadcast %c15_i32 : i32 to vector<224x1xi32>
    %2 = arith.andi %0, %1 : vector<224x1xi32>
    %c0_i32 = arith.constant 0 : i32
    %3 = vector.broadcast %c0_i32 : i32 to vector<224x1xi32>
    %4 = arith.cmpi ne, %2, %3 : vector<224x1xi32>
    %c15_i32_0 = arith.constant 15 : i32
    %5 = vector.broadcast %c15_i32_0 : i32 to vector<224x1xi32>
    %6 = arith.cmpi ne, %2, %5 : vector<224x1xi32>
    %7 = arith.andi %4, %6 : vector<224x1xi1>
    %8 = arith.extui %7 : vector<224x1xi1> to vector<224x1xi32>
    %9 = arith.sitofp %8 : vector<224x1xi32> to vector<224x1xf32>
    %c0 = arith.constant 0 : index
    %c0_1 = arith.constant 0 : index
    %c0_2 = arith.constant 0 : index
    %10 = vector.load %arg1[%c0, %c0_1, %c0_2] : memref<1x224x128xf32, #tpu.memory_space<vmem>>, vector<1x224x128xf32>
    %11 = vector.shape_cast %10 : vector<1x224x128xf32> to vector<224x128xf32>
    %cst = arith.constant dense<0.000000e+00> : vector<128xf32>
    %12 = vector.multi_reduction <add>, %11, %cst [0] : vector<224x128xf32> to vector<128xf32>
    %13 = vector.shape_cast %12 : vector<128xf32> to vector<1x128xf32>
    %cst_3 = arith.constant 0.00510204071 : f32
    %14 = vector.broadcast %cst_3 : f32 to vector<1x128xf32>
    %15 = arith.mulf %13, %14 : vector<1x128xf32>
    %16 = vector.broadcast %15 : vector<1x128xf32> to vector<224x128xf32>
    %17 = arith.subf %11, %16 : vector<224x128xf32>
    %18 = arith.mulf %17, %17 : vector<224x128xf32>
    %cst_4 = arith.constant dense<0.000000e+00> : vector<128xf32>
    %19 = vector.multi_reduction <add>, %18, %cst_4 [0] : vector<224x128xf32> to vector<128xf32>
    %20 = vector.shape_cast %19 : vector<128xf32> to vector<1x128xf32>
    %cst_5 = arith.constant 2.800000e+01 : f32
    %21 = vector.broadcast %cst_5 : f32 to vector<1x128xf32>
    %22 = arith.mulf %21, %15 : vector<1x128xf32>
    %23 = arith.mulf %22, %15 : vector<1x128xf32>
    %24 = arith.subf %20, %23 : vector<1x128xf32>
    %cst_6 = arith.constant 0.00510204071 : f32
    %25 = vector.broadcast %cst_6 : f32 to vector<1x128xf32>
    %26 = arith.mulf %24, %25 : vector<1x128xf32>
    %cst_7 = arith.constant 9.99999974E-6 : f32
    %27 = vector.broadcast %cst_7 : f32 to vector<1x128xf32>
    %28 = arith.addf %26, %27 : vector<1x128xf32>
    %29 = math.rsqrt %28 : vector<1x128xf32>
    %c0_8 = arith.constant 0 : index
    %c0_9 = arith.constant 0 : index
    %c0_10 = arith.constant 0 : index
    %30 = vector.load %arg3[%c0_8, %c0_9, %c0_10] : memref<1x1x128xf32, #tpu.memory_space<vmem>>, vector<1x1x128xf32>
    %31 = vector.shape_cast %30 : vector<1x1x128xf32> to vector<1x128xf32>
    %32 = arith.mulf %29, %31 : vector<1x128xf32>
    %33 = vector.broadcast %32 : vector<1x128xf32> to vector<224x128xf32>
    %34 = arith.mulf %17, %33 : vector<224x128xf32>
    %c0_11 = arith.constant 0 : index
    %c0_12 = arith.constant 0 : index
    %c0_13 = arith.constant 0 : index
    %35 = vector.load %arg4[%c0_11, %c0_12, %c0_13] : memref<1x1x128xf32, #tpu.memory_space<vmem>>, vector<1x1x128xf32>
    %36 = vector.shape_cast %35 : vector<1x1x128xf32> to vector<1x128xf32>
    %37 = vector.broadcast %36 : vector<1x128xf32> to vector<224x128xf32>
    %38 = arith.addf %34, %37 : vector<224x128xf32>
    %cst_14 = arith.constant 0.000000e+00 : f32
    %39 = vector.broadcast %cst_14 : f32 to vector<224x128xf32>
    %40 = arith.maximumf %38, %39 : vector<224x128xf32>
    %41 = vector.broadcast %9 : vector<224x1xf32> to vector<224x128xf32>
    %42 = arith.mulf %40, %41 : vector<224x128xf32>
    %cst_15 = arith.constant 0.000000e+00 : f32
    %43 = vector.broadcast %cst_15 : f32 to vector<24x128xf32>
    %c0_16 = arith.constant 0 : index
    %c0_17 = arith.constant 0 : index
    %44 = vector.load %arg8[%c0_16, %c0_17] : memref<272x128xf32, #tpu.memory_space<vmem>>, vector<24x128xf32>
    tpu.vector_store %arg8[%c0_16, %c0_17], %43 {strides = array<i32>} : memref<272x128xf32, #tpu.memory_space<vmem>>, vector<24x128xf32>,
    %cst_18 = arith.constant 0.000000e+00 : f32
    %45 = vector.broadcast %cst_18 : f32 to vector<24x128xf32>
    %c248 = arith.constant 248 : index
    %c0_19 = arith.constant 0 : index
    %46 = vector.load %arg8[%c248, %c0_19] : memref<272x128xf32, #tpu.memory_space<vmem>>, vector<24x128xf32>
    tpu.vector_store %arg8[%c248, %c0_19], %45 {strides = array<i32>} : memref<272x128xf32, #tpu.memory_space<vmem>>, vector<24x128xf32>,
    %c24 = arith.constant 24 : index
    %c0_20 = arith.constant 0 : index
    %47 = vector.load %arg8[%c24, %c0_20] : memref<272x128xf32, #tpu.memory_space<vmem>>, vector<224x128xf32>
    tpu.vector_store %arg8[%c24, %c0_20], %42 {strides = array<i32>} : memref<272x128xf32, #tpu.memory_space<vmem>>, vector<224x128xf32>,
    %cst_21 = arith.constant 0.000000e+00 : f32
    %48 = vector.broadcast %cst_21 : f32 to vector<224x128xf32>
    %c7 = arith.constant 7 : index
    %c0_22 = arith.constant 0 : index
    %49 = vector.load %arg8[%c7, %c0_22] : memref<272x128xf32, #tpu.memory_space<vmem>>, vector<224x128xf32>
    %50 = arith.truncf %49 : vector<224x128xf32> to vector<224x128xbf16>
    %c0_23 = arith.constant 0 : index
    %c0_24 = arith.constant 0 : index
    %c0_25 = arith.constant 0 : index
    %c0_26 = arith.constant 0 : index
    %51 = vector.load %arg2[%c0_23, %c0_24, %c0_25, %c0_26] : memref<1x9x128x128xbf16, #tpu.memory_space<vmem>>, vector<1x1x128x128xbf16>
    %52 = vector.shape_cast %51 : vector<1x1x128x128xbf16> to vector<128x128xbf16>
    %cst_27 = arith.constant dense<0.000000e+00> : vector<224x128xf32>
    %53 = tpu.matmul %50, %52, %cst_27 {dimension_numbers = #tpu.dot_dimension_numbers<[1], [0], [0], [1], [0, 0, 1, 1], [], []>} : vector<224x128xbf16>, vector<128x128xbf16>, vector<224x128xf32> -> vector<224x128xf32>
    %54 = arith.addf %48, %53 : vector<224x128xf32>
    %c8 = arith.constant 8 : index
    %c0_28 = arith.constant 0 : index
    %55 = vector.load %arg8[%c8, %c0_28] : memref<272x128xf32, #tpu.memory_space<vmem>>, vector<224x128xf32>
    %56 = arith.truncf %55 : vector<224x128xf32> to vector<224x128xbf16>
    %c0_29 = arith.constant 0 : index
    %c1 = arith.constant 1 : index
    %c0_30 = arith.constant 0 : index
    %c0_31 = arith.constant 0 : index
    %57 = vector.load %arg2[%c0_29, %c1, %c0_30, %c0_31] : memref<1x9x128x128xbf16, #tpu.memory_space<vmem>>, vector<1x1x128x128xbf16>
    %58 = vector.shape_cast %57 : vector<1x1x128x128xbf16> to vector<128x128xbf16>
    %cst_32 = arith.constant dense<0.000000e+00> : vector<224x128xf32>
    %59 = tpu.matmul %56, %58, %cst_32 {dimension_numbers = #tpu.dot_dimension_numbers<[1], [0], [0], [1], [0, 0, 1, 1], [], []>} : vector<224x128xbf16>, vector<128x128xbf16>, vector<224x128xf32> -> vector<224x128xf32>
    %60 = arith.addf %54, %59 : vector<224x128xf32>
    %c9 = arith.constant 9 : index
    %c0_33 = arith.constant 0 : index
    %61 = vector.load %arg8[%c9, %c0_33] : memref<272x128xf32, #tpu.memory_space<vmem>>, vector<224x128xf32>
    %62 = arith.truncf %61 : vector<224x128xf32> to vector<224x128xbf16>
    %c0_34 = arith.constant 0 : index
    %c2 = arith.constant 2 : index
    %c0_35 = arith.constant 0 : index
    %c0_36 = arith.constant 0 : index
    %63 = vector.load %arg2[%c0_34, %c2, %c0_35, %c0_36] : memref<1x9x128x128xbf16, #tpu.memory_space<vmem>>, vector<1x1x128x128xbf16>
    %64 = vector.shape_cast %63 : vector<1x1x128x128xbf16> to vector<128x128xbf16>
    %cst_37 = arith.constant dense<0.000000e+00> : vector<224x128xf32>
    %65 = tpu.matmul %62, %64, %cst_37 {dimension_numbers = #tpu.dot_dimension_numbers<[1], [0], [0], [1], [0, 0, 1, 1], [], []>} : vector<224x128xbf16>, vector<128x128xbf16>, vector<224x128xf32> -> vector<224x128xf32>
    %66 = arith.addf %60, %65 : vector<224x128xf32>
    %c23 = arith.constant 23 : index
    %c0_38 = arith.constant 0 : index
    %67 = vector.load %arg8[%c23, %c0_38] : memref<272x128xf32, #tpu.memory_space<vmem>>, vector<224x128xf32>
    %68 = arith.truncf %67 : vector<224x128xf32> to vector<224x128xbf16>
    %c0_39 = arith.constant 0 : index
    %c3 = arith.constant 3 : index
    %c0_40 = arith.constant 0 : index
    %c0_41 = arith.constant 0 : index
    %69 = vector.load %arg2[%c0_39, %c3, %c0_40, %c0_41] : memref<1x9x128x128xbf16, #tpu.memory_space<vmem>>, vector<1x1x128x128xbf16>
    %70 = vector.shape_cast %69 : vector<1x1x128x128xbf16> to vector<128x128xbf16>
    %cst_42 = arith.constant dense<0.000000e+00> : vector<224x128xf32>
    %71 = tpu.matmul %68, %70, %cst_42 {dimension_numbers = #tpu.dot_dimension_numbers<[1], [0], [0], [1], [0, 0, 1, 1], [], []>} : vector<224x128xbf16>, vector<128x128xbf16>, vector<224x128xf32> -> vector<224x128xf32>
    %72 = arith.addf %66, %71 : vector<224x128xf32>
    %c24_43 = arith.constant 24 : index
    %c0_44 = arith.constant 0 : index
    %73 = vector.load %arg8[%c24_43, %c0_44] : memref<272x128xf32, #tpu.memory_space<vmem>>, vector<224x128xf32>
    %74 = arith.truncf %73 : vector<224x128xf32> to vector<224x128xbf16>
    %c0_45 = arith.constant 0 : index
    %c4 = arith.constant 4 : index
    %c0_46 = arith.constant 0 : index
    %c0_47 = arith.constant 0 : index
    %75 = vector.load %arg2[%c0_45, %c4, %c0_46, %c0_47] : memref<1x9x128x128xbf16, #tpu.memory_space<vmem>>, vector<1x1x128x128xbf16>
    %76 = vector.shape_cast %75 : vector<1x1x128x128xbf16> to vector<128x128xbf16>
    %cst_48 = arith.constant dense<0.000000e+00> : vector<224x128xf32>
    %77 = tpu.matmul %74, %76, %cst_48 {dimension_numbers = #tpu.dot_dimension_numbers<[1], [0], [0], [1], [0, 0, 1, 1], [], []>} : vector<224x128xbf16>, vector<128x128xbf16>, vector<224x128xf32> -> vector<224x128xf32>
    %78 = arith.addf %72, %77 : vector<224x128xf32>
    %c25 = arith.constant 25 : index
    %c0_49 = arith.constant 0 : index
    %79 = vector.load %arg8[%c25, %c0_49] : memref<272x128xf32, #tpu.memory_space<vmem>>, vector<224x128xf32>
    %80 = arith.truncf %79 : vector<224x128xf32> to vector<224x128xbf16>
    %c0_50 = arith.constant 0 : index
    %c5 = arith.constant 5 : index
    %c0_51 = arith.constant 0 : index
    %c0_52 = arith.constant 0 : index
    %81 = vector.load %arg2[%c0_50, %c5, %c0_51, %c0_52] : memref<1x9x128x128xbf16, #tpu.memory_space<vmem>>, vector<1x1x128x128xbf16>
    %82 = vector.shape_cast %81 : vector<1x1x128x128xbf16> to vector<128x128xbf16>
    %cst_53 = arith.constant dense<0.000000e+00> : vector<224x128xf32>
    %83 = tpu.matmul %80, %82, %cst_53 {dimension_numbers = #tpu.dot_dimension_numbers<[1], [0], [0], [1], [0, 0, 1, 1], [], []>} : vector<224x128xbf16>, vector<128x128xbf16>, vector<224x128xf32> -> vector<224x128xf32>
    %84 = arith.addf %78, %83 : vector<224x128xf32>
    %c39 = arith.constant 39 : index
    %c0_54 = arith.constant 0 : index
    %85 = vector.load %arg8[%c39, %c0_54] : memref<272x128xf32, #tpu.memory_space<vmem>>, vector<224x128xf32>
    %86 = arith.truncf %85 : vector<224x128xf32> to vector<224x128xbf16>
    %c0_55 = arith.constant 0 : index
    %c6 = arith.constant 6 : index
    %c0_56 = arith.constant 0 : index
    %c0_57 = arith.constant 0 : index
    %87 = vector.load %arg2[%c0_55, %c6, %c0_56, %c0_57] : memref<1x9x128x128xbf16, #tpu.memory_space<vmem>>, vector<1x1x128x128xbf16>
    %88 = vector.shape_cast %87 : vector<1x1x128x128xbf16> to vector<128x128xbf16>
    %cst_58 = arith.constant dense<0.000000e+00> : vector<224x128xf32>
    %89 = tpu.matmul %86, %88, %cst_58 {dimension_numbers = #tpu.dot_dimension_numbers<[1], [0], [0], [1], [0, 0, 1, 1], [], []>} : vector<224x128xbf16>, vector<128x128xbf16>, vector<224x128xf32> -> vector<224x128xf32>
    %90 = arith.addf %84, %89 : vector<224x128xf32>
    %c40 = arith.constant 40 : index
    %c0_59 = arith.constant 0 : index
    %91 = vector.load %arg8[%c40, %c0_59] : memref<272x128xf32, #tpu.memory_space<vmem>>, vector<224x128xf32>
    %92 = arith.truncf %91 : vector<224x128xf32> to vector<224x128xbf16>
    %c0_60 = arith.constant 0 : index
    %c7_61 = arith.constant 7 : index
    %c0_62 = arith.constant 0 : index
    %c0_63 = arith.constant 0 : index
    %93 = vector.load %arg2[%c0_60, %c7_61, %c0_62, %c0_63] : memref<1x9x128x128xbf16, #tpu.memory_space<vmem>>, vector<1x1x128x128xbf16>
    %94 = vector.shape_cast %93 : vector<1x1x128x128xbf16> to vector<128x128xbf16>
    %cst_64 = arith.constant dense<0.000000e+00> : vector<224x128xf32>
    %95 = tpu.matmul %92, %94, %cst_64 {dimension_numbers = #tpu.dot_dimension_numbers<[1], [0], [0], [1], [0, 0, 1, 1], [], []>} : vector<224x128xbf16>, vector<128x128xbf16>, vector<224x128xf32> -> vector<224x128xf32>
    %96 = arith.addf %90, %95 : vector<224x128xf32>
    %c41 = arith.constant 41 : index
    %c0_65 = arith.constant 0 : index
    %97 = vector.load %arg8[%c41, %c0_65] : memref<272x128xf32, #tpu.memory_space<vmem>>, vector<224x128xf32>
    %98 = arith.truncf %97 : vector<224x128xf32> to vector<224x128xbf16>
    %c0_66 = arith.constant 0 : index
    %c8_67 = arith.constant 8 : index
    %c0_68 = arith.constant 0 : index
    %c0_69 = arith.constant 0 : index
    %99 = vector.load %arg2[%c0_66, %c8_67, %c0_68, %c0_69] : memref<1x9x128x128xbf16, #tpu.memory_space<vmem>>, vector<1x1x128x128xbf16>
    %100 = vector.shape_cast %99 : vector<1x1x128x128xbf16> to vector<128x128xbf16>
    %cst_70 = arith.constant dense<0.000000e+00> : vector<224x128xf32>
    %101 = tpu.matmul %98, %100, %cst_70 {dimension_numbers = #tpu.dot_dimension_numbers<[1], [0], [0], [1], [0, 0, 1, 1], [], []>} : vector<224x128xbf16>, vector<128x128xbf16>, vector<224x128xf32> -> vector<224x128xf32>
    %102 = arith.addf %96, %101 : vector<224x128xf32>
    %103 = vector.broadcast %9 : vector<224x1xf32> to vector<224x128xf32>
    %104 = arith.mulf %102, %103 : vector<224x128xf32>
    %cst_71 = arith.constant dense<0.000000e+00> : vector<128xf32>
    %105 = vector.multi_reduction <add>, %104, %cst_71 [0] : vector<224x128xf32> to vector<128xf32>
    %106 = vector.shape_cast %105 : vector<128xf32> to vector<1x128xf32>
    %cst_72 = arith.constant 0.00510204071 : f32
    %107 = vector.broadcast %cst_72 : f32 to vector<1x128xf32>
    %108 = arith.mulf %106, %107 : vector<1x128xf32>
    %109 = vector.broadcast %108 : vector<1x128xf32> to vector<224x128xf32>
    %110 = arith.subf %104, %109 : vector<224x128xf32>
    %111 = arith.mulf %110, %110 : vector<224x128xf32>
    %cst_73 = arith.constant dense<0.000000e+00> : vector<128xf32>
    %112 = vector.multi_reduction <add>, %111, %cst_73 [0] : vector<224x128xf32> to vector<128xf32>
    %113 = vector.shape_cast %112 : vector<128xf32> to vector<1x128xf32>
    %cst_74 = arith.constant 2.800000e+01 : f32
    %114 = vector.broadcast %cst_74 : f32 to vector<1x128xf32>
    %115 = arith.mulf %114, %108 : vector<1x128xf32>
    %116 = arith.mulf %115, %108 : vector<1x128xf32>
    %117 = arith.subf %113, %116 : vector<1x128xf32>
    %cst_75 = arith.constant 0.00510204071 : f32
    %118 = vector.broadcast %cst_75 : f32 to vector<1x128xf32>
    %119 = arith.mulf %117, %118 : vector<1x128xf32>
    %cst_76 = arith.constant 9.99999974E-6 : f32
    %120 = vector.broadcast %cst_76 : f32 to vector<1x128xf32>
    %121 = arith.addf %119, %120 : vector<1x128xf32>
    %122 = math.rsqrt %121 : vector<1x128xf32>
    %c0_77 = arith.constant 0 : index
    %c0_78 = arith.constant 0 : index
    %c0_79 = arith.constant 0 : index
    %123 = vector.load %arg5[%c0_77, %c0_78, %c0_79] : memref<1x1x128xf32, #tpu.memory_space<vmem>>, vector<1x1x128xf32>
    %124 = vector.shape_cast %123 : vector<1x1x128xf32> to vector<1x128xf32>
    %125 = arith.mulf %122, %124 : vector<1x128xf32>
    %126 = vector.broadcast %125 : vector<1x128xf32> to vector<224x128xf32>
    %127 = arith.mulf %110, %126 : vector<224x128xf32>
    %c0_80 = arith.constant 0 : index
    %c0_81 = arith.constant 0 : index
    %c0_82 = arith.constant 0 : index
    %128 = vector.load %arg6[%c0_80, %c0_81, %c0_82] : memref<1x1x128xf32, #tpu.memory_space<vmem>>, vector<1x1x128xf32>
    %129 = vector.shape_cast %128 : vector<1x1x128xf32> to vector<1x128xf32>
    %130 = vector.broadcast %129 : vector<1x128xf32> to vector<224x128xf32>
    %131 = arith.addf %127, %130 : vector<224x128xf32>
    %c0_83 = arith.constant 0 : index
    %c0_84 = arith.constant 0 : index
    %c0_85 = arith.constant 0 : index
    %132 = vector.load %arg7[%c0_83, %c0_84, %c0_85] : memref<1x224x128xf32, #tpu.memory_space<vmem>>, vector<1x224x128xf32>
    %133 = vector.shape_cast %132 : vector<1x224x128xf32> to vector<224x128xf32>
    %134 = vector.shape_cast %131 : vector<224x128xf32> to vector<1x224x128xf32>
    tpu.vector_store %arg7[%c0_83, %c0_84, %c0_85], %134 {strides = array<i32>} : memref<1x224x128xf32, #tpu.memory_space<vmem>>, vector<1x224x128xf32>,
    return
  }
  func.func @transform_0(%arg0: i32) -> (i32, i32, i32) {
    %c0_i32 = arith.constant 0 : i32
    %c0_i32_0 = arith.constant 0 : i32
    %c0_i32_1 = arith.constant 0 : i32
    return %arg0, %c0_i32, %c0_i32_0 : i32, i32, i32
  }
  func.func @transform_1(%arg0: i32) -> (i32, i32, i32, i32) {
    %c0_i32 = arith.constant 0 : i32
    %c0_i32_0 = arith.constant 0 : i32
    %c0_i32_1 = arith.constant 0 : i32
    %c0_i32_2 = arith.constant 0 : i32
    return %arg0, %c0_i32, %c0_i32_0, %c0_i32_1 : i32, i32, i32, i32
  }
  func.func @transform_2(%arg0: i32) -> (i32, i32, i32) {
    %c0_i32 = arith.constant 0 : i32
    %c0_i32_0 = arith.constant 0 : i32
    %c0_i32_1 = arith.constant 0 : i32
    return %arg0, %c0_i32, %c0_i32_0 : i32, i32, i32
  }
  func.func @transform_3(%arg0: i32) -> (i32, i32, i32) {
    %c0_i32 = arith.constant 0 : i32
    %c0_i32_0 = arith.constant 0 : i32
    %c0_i32_1 = arith.constant 0 : i32
    return %arg0, %c0_i32, %c0_i32_0 : i32, i32, i32
  }
  func.func @transform_4(%arg0: i32) -> (i32, i32, i32) {
    %c0_i32 = arith.constant 0 : i32
    %c0_i32_0 = arith.constant 0 : i32
    %c0_i32_1 = arith.constant 0 : i32
    return %arg0, %c0_i32, %c0_i32_0 : i32, i32, i32
  }
  func.func @transform_5(%arg0: i32) -> (i32, i32, i32) {
    %c0_i32 = arith.constant 0 : i32
    %c0_i32_0 = arith.constant 0 : i32
    %c0_i32_1 = arith.constant 0 : i32
    return %arg0, %c0_i32, %c0_i32_0 : i32, i32, i32
  }
  func.func @transform_6(%arg0: i32) -> (i32, i32, i32) {
    %c0_i32 = arith.constant 0 : i32
    %c0_i32_0 = arith.constant 0 : i32
    %c0_i32_1 = arith.constant 0 : i32
    return %arg0, %c0_i32, %c0_i32_0 : i32, i32, i32
  }
}

</mosaic_0001>

<bundles_post_ra>
// kernel: fused_forward.1
= control target key start
LH: loop header
LB: loop body
LE: loop exit
PB: predicated region body
PF: predicated region fallthrough
CT: control target
= control target key end

     0   :  { %s4646_s21 = smov 0   ;;  %s6334_s0 = inlined_call_operand.vmem [shape: f32[6,224,128], index: 0, kind: input, shape index: {}]   ;;  %s6335_s1 = inlined_call_operand.vmem [shape: bf16[6,9,128,128], index: 1, kind: input, shape index: {}]   ;;  %s6336_s2 = inlined_call_operand.vmem [shape: f32[6,1,128], index: 2, kind: input, shape index: {}]   ;;  %s6337_s3 = inlined_call_operand.vmem [shape: f32[6,1,128], index: 3, kind: input, shape index: {}]   ;;  %s6338_s4 = inlined_call_operand.vmem [shape: f32[6,1,128], index: 4, kind: input, shape index: {}]   ;;  %s6339_s5 = inlined_call_operand.vmem [shape: f32[6,1,128], index: 5, kind: input, shape index: {}]   ;;  %s6340_s6 = inlined_call_operand.vmem [shape: f32[6,224,128], index: 6, kind: output, shape index: {}]  }
   0x1 LB: > { %s3662_s22 = sadd.s32 4294967295, %s4607_s21   ;;  %p3666_p0 = scmp.ge.s32.totalorder %s4607_s21, 1  ;;  %s4607_s21 = sphi %s4646_s21, %s16_s21  }
   0x2   : > { %p254_p1 = scmp.lt.s32.totalorder %s4607_s21, 7 }
   0x4   : > { %p255_p2 = pnand %p3666_p0, %p254_p1 }
   0x6   : > { %258 = sbr.rel (%p255_p2) target bundleno = 791 (0x317), region = 44 }
   0xb   : > { %p301_p3 = scmp.lt.s32.totalorder %s3662_s22, 5  ;;  %v4609_v0 = vmov 0.0   ;;  %v4610_v1 = vmov 0.0|0.0  }
   0xc   : > { %809 = vst [vmem:[#allocation2 + $0x8] sm:$0xff] %v4609_v0  ;;  %810 = vst [vmem:[#allocation2 + $0x10] sm:$0xff] %v4609_v0  ;;  %4116 = vmatprep.mubr.bf16.mxu0 %v4610_v1 }
   0xd   : > { %808 = vst [vmem:[#allocation2] sm:$0xff] %v4609_v0  ;;  %811 = vst [vmem:[#allocation2 + $0xf8] sm:$0xff] %v4609_v0  ;;  %s6552_s22 = smov (!%p301_p3, %s3662_s22), 5 }
   0xe   : > { %812 = vst [vmem:[#allocation2 + $0x100] sm:$0xff] %v4609_v0  ;;  %813 = vst [vmem:[#allocation2 + $0x108] sm:$0xff] %v4609_v0  ;;  %s4513_s23 = smul.u32 576, %s6552_s22  ;;  %s313_s9 = scalar_lea.vmem %s6336_s2, %s6552_s22 }
   0xf   : > { %s4512_s27 = smul.u32 224, %s6552_s22  ;;  %s316_s12 = scalar_lea.vmem %s6337_s3, %s6552_s22 }
  0x10   : > { %s4666_s26 = scalar_lea.vmem %s6335_s1, %s4513_s23  ;;  %s319_s15 = scalar_lea.vmem %s6338_s4, %s6552_s22 }
  0x11   : > { %v4523_v2 = vld [vmem:[%s4666_s26 + $0x78] sm:$0xff]   ;;  %v4524_v3 = vld [vmem:[%s4666_s26 + $0x70] sm:$0xff]   ;;  %v4525_v4 = vld [vmem:[%s4666_s26 + $0x68] sm:$0xff]   ;;  %s4677_s30 = scalar_lea.vmem %s6334_s0, %s4512_s27  ;;  %s322_s18 = scalar_lea.vmem %s6339_s5, %s6552_s22 }
  0x12   : > { %4100 = vmatprep.subr.bf16.mxu0 %v4523_v2  ;;  %4496 = vmatprep.subr.bf16.mxu1 %v4523_v2  ;;  %v4526_v5 = vld [vmem:[%s4666_s26 + $0x60] sm:$0xff]   ;;  %v4684_v7 = vld [vmem:[%s4677_s30 + $0x8] sm:$0xff]  ;;  %v4687_v8 = vld [vmem:[%s4677_s30 + $0x10] sm:$0xff]  ;;  %s6297_s23 = scalar_lea.vmem %s6340_s6, %s4512_s27 }
  0x13   : > { %4101 = vmatpush3.bf16.msra.mxu0 %v4523_v2  ;;  %4504 = vmatpush3.bf16.msra.mxu1 %v4523_v2  ;;  %v4681_v6 = vld [vmem:[%s4677_s30] sm:$0xff]  ;;  %v4692_v10 = vld [vmem:[%s4677_s30 + $0x18] sm:$0xff]  ;;  %v4701_v15 = vld [vmem:[%s4677_s30 + $0x28] sm:$0xff] }
  0x14   : > { %4102 = vmatprep.subr.bf16.mxu0 %v4524_v3  ;;  %4497 = vmatprep.subr.bf16.mxu1 %v4524_v3  ;;  %v554_v9 = vadd.f32 %v4684_v7, %v4681_v6  ;;  %v4527_v12 = vld [vmem:[%s4666_s26 + $0x58] sm:$0xff]   ;;  %v4697_v13 = vld [vmem:[%s4677_s30 + $0x20] sm:$0xff]  ;;  %v4528_v17 = vld [vmem:[%s4666_s26 + $0x50] sm:$0xff]  }
  0x15   : > { %v4706_v18 = vld [vmem:[%s4677_s30 + $0x30] sm:$0xff]  ;;  %v4709_v19 = vld [vmem:[%s4677_s30 + $0x38] sm:$0xff]  ;;  %v4529_v21 = vld [vmem:[%s4666_s26 + $0x48] sm:$0xff]  }
  0x16   : > { %v555_v11 = vadd.f32 %v554_v9, %v4687_v8  ;;  %v4714_v22 = vld [vmem:[%s4677_s30 + $0x40] sm:$0xff]  ;;  %v4718_v24 = vld [vmem:[%s4677_s30 + $0x48] sm:$0xff]  ;;  %v4723_v27 = vld [vmem:[%s4677_s30 + $0x50] sm:$0xff] }
  0x17   : > { %4103 = vmatpush3.bf16.msra.mxu0 %v4524_v3  ;;  %4505 = vmatpush3.bf16.msra.mxu1 %v4524_v3  ;;  %v4530_v26 = vld [vmem:[%s4666_s26 + $0x40] sm:$0xff]   ;;  %v4727_v29 = vld [vmem:[%s4677_s30 + $0x58] sm:$0xff]  ;;  %v4735_v33 = vld [vmem:[%s4677_s30 + $0x68] sm:$0xff] }
  0x18   : > { %4104 = vmatprep.subr.bf16.mxu0 %v4525_v4  ;;  %4498 = vmatprep.subr.bf16.mxu1 %v4525_v4  ;;  %v556_v14 = vadd.f32 %v555_v11, %v4692_v10  ;;  %v4731_v31 = vld [vmem:[%s4677_s30 + $0x60] sm:$0xff]  ;;  %v4739_v35 = vld [vmem:[%s4677_s30 + $0x70] sm:$0xff]  ;;  %v4743_v37 = vld [vmem:[%s4677_s30 + $0x78] sm:$0xff] }
  0x19   : > { %v4747_v39 = vld [vmem:[%s4677_s30 + $0x80] sm:$0xff]  ;;  %v4751_v41 = vld [vmem:[%s4677_s30 + $0x88] sm:$0xff]  ;;  %v4755_v43 = vld [vmem:[%s4677_s30 + $0x90] sm:$0xff] }
  0x1a   : > { %v557_v16 = vadd.f32 %v556_v14, %v4697_v13  ;;  %v4759_v45 = vld [vmem:[%s4677_s30 + $0x98] sm:$0xff]  ;;  %v4763_v47 = vld [vmem:[%s4677_s30 + $0xa0] sm:$0xff]  ;;  %v4767_v49 = vld [vmem:[%s4677_s30 + $0xa8] sm:$0xff] }
  0x1b   : > { %4105 = vmatpush3.bf16.msra.mxu0 %v4525_v4  ;;  %4506 = vmatpush3.bf16.msra.mxu1 %v4525_v4  ;;  %v4771_v51 = vld [vmem:[%s4677_s30 + $0xb0] sm:$0xff]  ;;  %v4775_v53 = vld [vmem:[%s4677_s30 + $0xb8] sm:$0xff]  ;;  %v4779_v55 = vld [vmem:[%s4677_s30 + $0xc0] sm:$0xff] }
  0x1c   : > { %4106 = vmatprep.subr.bf16.mxu0 %v4526_v5  ;;  %4499 = vmatprep.subr.bf16.mxu1 %v4526_v5  ;;  %v558_v20 = vadd.f32 %v557_v16, %v4701_v15  ;;  %v4784_v58 = vld [vmem:[%s4677_s30 + $0xc8] sm:$0xff]  ;;  %v4788_v60 = vld [vmem:[%s4677_s30 + $0xd0] sm:$0xff]  ;;  %v4792_v62 = vld [vmem:[%s4677_s30 + $0xd8] sm:$0xff] }
  0x1d   : > { %v4797_v2 = vld [vmem:[%s4666_s26 + $0x38] sm:$0xff]  }
  0x1e   : > { %v559_v23 = vadd.f32 %v558_v20, %v4706_v18  ;;  %v4800_v3 = vld [vmem:[%s4666_s26 + $0xb8] sm:$0xff]  }
  0x1f   : > { %4107 = vmatpush3.bf16.msra.mxu0 %v4526_v5  ;;  %4507 = vmatpush3.bf16.msra.mxu1 %v4526_v5 }
  0x20   : > { %4108 = vmatprep.subr.bf16.mxu0 %v4527_v12  ;;  %4500 = vmatprep.subr.bf16.mxu1 %v4527_v12  ;;  %v560_v25 = vadd.f32 %v559_v23, %v4709_v19 }
  0x22   : > { %v561_v28 = vadd.f32 %v560_v25, %v4714_v22 }
  0x23   : > { %4109 = vmatpush3.bf16.msra.mxu0 %v4527_v12  ;;  %4508 = vmatpush3.bf16.msra.mxu1 %v4527_v12 }
  0x24   : > { %4110 = vmatprep.subr.bf16.mxu0 %v4528_v17  ;;  %4501 = vmatprep.subr.bf16.mxu1 %v4528_v17  ;;  %v562_v30 = vadd.f32 %v561_v28, %v4718_v24 }
  0x26   : > { %v563_v32 = vadd.f32 %v562_v30, %v4723_v27 }
  0x27   : > { %4111 = vmatpush3.bf16.msra.mxu0 %v4528_v17  ;;  %4509 = vmatpush3.bf16.msra.mxu1 %v4528_v17 }
  0x28   : > { %4112 = vmatprep.subr.bf16.mxu0 %v4529_v21  ;;  %4502 = vmatprep.subr.bf16.mxu1 %v4529_v21  ;;  %v564_v34 = vadd.f32 %v563_v32, %v4727_v29 }
  0x2a   : > { %v565_v36 = vadd.f32 %v564_v34, %v4731_v31 }
  0x2b   : > { %4113 = vmatpush3.bf16.msra.mxu0 %v4529_v21  ;;  %4510 = vmatpush3.bf16.msra.mxu1 %v4529_v21 }
  0x2c   : > { %4114 = vmatprep.subr.bf16.mxu0 %v4530_v26  ;;  %4503 = vmatprep.subr.bf16.mxu1 %v4530_v26  ;;  %v566_v38 = vadd.f32 %v565_v36, %v4735_v33 }
  0x2e   : > { %v567_v40 = vadd.f32 %v566_v38, %v4739_v35 }
  0x2f   : > { %4115 = vmatpush3.bf16.msra.mxu0 %v4530_v26  ;;  %4511 = vmatpush3.bf16.msra.mxu1 %v4530_v26 }
  0x30   : > { %v568_v42 = vadd.f32 %v567_v40, %v4743_v37  ;;  %4144 = vmatprep.subr.bf16.mxu1 %v4797_v2  ;;  %4188 = vmatprep.subr.bf16.mxu0 %v4800_v3 }
  0x32   : > { %v569_v44 = vadd.f32 %v568_v42, %v4747_v39 }
  0x34   : > { %v570_v46 = vadd.f32 %v569_v44, %v4751_v41 }
  0x36   : > { %v571_v48 = vadd.f32 %v570_v46, %v4755_v43 }
  0x38   : > { %v572_v50 = vadd.f32 %v571_v48, %v4759_v45 }
  0x3a   : > { %v573_v52 = vadd.f32 %v572_v50, %v4763_v47 }
  0x3c   : > { %v574_v54 = vadd.f32 %v573_v52, %v4767_v49 }
  0x3e   : > { %v575_v56 = vadd.f32 %v574_v54, %v4771_v51 }
  0x40   : > { %v576_v57 = vadd.f32 %v575_v56, %v4775_v53 }
  0x42   : > { %v577_v59 = vadd.f32 %v576_v57, %v4779_v55 }
  0x44   : > { %v578_v61 = vadd.f32 %v577_v59, %v4784_v58 }
  0x46   : > { %v579_v63 = vadd.f32 %v578_v61, %v4788_v60 }
  0x48   : > { %v580_v1 = vadd.f32 %v579_v63, %v4792_v62 }
  0x4a   : > { %v581_v4 = vrot.slane %v580_v1, 4 }
  0x4c   : > { %v582_v5 = vadd.f32 %v581_v4, %v580_v1 }
  0x4e   : > { %v583_v9 = vrot.slane %v582_v5, 2 }
  0x50   : > { %v584_v11 = vadd.f32 %v583_v9, %v582_v5 }
  0x52   : > { %v585_v12 = vrot.slane %v584_v11, 1 }
  0x54   : > { %v586_v14 = vadd.f32 %v585_v12, %v584_v11 }
  0x56   : > { %v4804_v16 = vmul.f32 0.0051020407, %v586_v14 }
  0x58   : > { %v4808_v17 = vsub.f32 %v4681_v6, %v4804_v16  ;;  %v4812_v20 = vsub.f32 %v4684_v7, %v4804_v16  ;;  %v4816_v21 = vsub.f32 %v4687_v8, %v4804_v16  ;;  %v4820_v23 = vsub.f32 %v4692_v10, %v4804_v16 }
  0x59   : > { %v4828_v6 = vsub.f32 %v4697_v13, %v4804_v16  ;;  %v4834_v8 = vsub.f32 %v4701_v15, %v4804_v16  ;;  %v4840_v30 = vsub.f32 %v4706_v18, %v4804_v16  ;;  %v4846_v34 = vsub.f32 %v4709_v19, %v4804_v16 }
  0x5a   : > { %v616_v25 = vmul.f32 %v4808_v17, %v4808_v17  ;;  %v617_v26 = vmul.f32 %v4812_v20, %v4812_v20  ;;  %v618_v7 = vmul.f32 %v4816_v21, %v4816_v21  ;;  %v619_v10 = vmul.f32 %v4820_v23, %v4820_v23 }
  0x5b   : > { %v620_v32 = vmul.f32 %v4828_v6, %v4828_v6  ;;  %v621_v15 = vmul.f32 %v4834_v8, %v4834_v8  ;;  %v4852_v38 = vsub.f32 %v4714_v22, %v4804_v16  ;;  %v622_v18 = vmul.f32 %v4840_v30, %v4840_v30 }
  0x5c   : > { %v644_v28 = vadd.f32 %v617_v26, %v616_v25  ;;  %v4858_v42 = vsub.f32 %v4718_v24, %v4804_v16  ;;  %v623_v19 = vmul.f32 %v4846_v34, %v4846_v34  ;;  %v4864_v46 = vsub.f32 %v4723_v27, %v4804_v16 }
  0x5d   : > { %v624_v22 = vmul.f32 %v4852_v38, %v4852_v38  ;;  %v4870_v50 = vsub.f32 %v4727_v29, %v4804_v16  ;;  %v4876_v54 = vsub.f32 %v4731_v31, %v4804_v16  ;;  %v4882_v57 = vsub.f32 %v4735_v33, %v4804_v16 }
  0x5e   : > { %v645_v13 = vadd.f32 %v644_v28, %v618_v7  ;;  %v625_v24 = vmul.f32 %v4858_v42, %v4858_v42  ;;  %v626_v27 = vmul.f32 %v4864_v46, %v4864_v46  ;;  %v4888_v61 = vsub.f32 %v4739_v35, %v4804_v16 }
  0x5f   : > { %6368 = vst [vmem:[#allocation3_spill] sm:$0xff] %v4876_v54  ;;  %6369 = vst [vmem:[#allocation4_spill] sm:$0xff] %v4882_v57  ;;  %v627_v29 = vmul.f32 %v4870_v50, %v4870_v50  ;;  %v628_v31 = vmul.f32 %v4876_v54, %v4876_v54  ;;  %v4894_v1 = vsub.f32 %v4743_v37, %v4804_v16 }
  0x60   : > { %v646_v36 = vadd.f32 %v645_v13, %v619_v10  ;;  %v629_v33 = vmul.f32 %v4882_v57, %v4882_v57  ;;  %v4900_v5 = vsub.f32 %v4747_v39, %v4804_v16  ;;  %v630_v35 = vmul.f32 %v4888_v61, %v4888_v61 }
  0x61   : > { %v4906_v11 = vsub.f32 %v4751_v41, %v4804_v16  ;;  %v631_v37 = vmul.f32 %v4894_v1, %v4894_v1  ;;  %v4912_v14 = vsub.f32 %v4755_v43, %v4804_v16  ;;  %v4918_v26 = vsub.f32 %v4759_v45, %v4804_v16 }
  0x62   : > { %v647_v40 = vadd.f32 %v646_v36, %v620_v32  ;;  %v632_v39 = vmul.f32 %v4900_v5, %v4900_v5  ;;  %v4924_v10 = vsub.f32 %v4763_v47, %v4804_v16  ;;  %v4930_v32 = vsub.f32 %v4767_v49, %v4804_v16 }
  0x63   : > { %v633_v41 = vmul.f32 %v4906_v11, %v4906_v11  ;;  %v634_v43 = vmul.f32 %v4912_v14, %v4912_v14  ;;  %v635_v45 = vmul.f32 %v4918_v26, %v4918_v26 }
  0x64   : > { %v648_v44 = vadd.f32 %v647_v40, %v621_v15  ;;  %v4936_v15 = vsub.f32 %v4771_v51, %v4804_v16  ;;  %v636_v47 = vmul.f32 %v4924_v10, %v4924_v10  ;;  %v637_v49 = vmul.f32 %v4930_v32, %v4930_v32 }
  0x66   : > { %v649_v48 = vadd.f32 %v648_v44, %v622_v18  ;;  %v4942_v18 = vsub.f32 %v4775_v53, %v4804_v16  ;;  %v638_v51 = vmul.f32 %v4936_v15, %v4936_v15 }
  0x68   : > { %v650_v52 = vadd.f32 %v649_v48, %v623_v19  ;;  %v4948_v19 = vsub.f32 %v4779_v55, %v4804_v16  ;;  %v639_v53 = vmul.f32 %v4942_v18, %v4942_v18 }
  0x6a   : > { %v651_v56 = vadd.f32 %v650_v52, %v624_v22  ;;  %v4954_v22 = vsub.f32 %v4784_v58, %v4804_v16  ;;  %v640_v55 = vmul.f32 %v4948_v19, %v4948_v19 }
  0x6c   : > { %v652_v59 = vadd.f32 %v651_v56, %v625_v24  ;;  %v4960_v24 = vsub.f32 %v4788_v60, %v4804_v16  ;;  %v641_v58 = vmul.f32 %v4954_v22, %v4954_v22 }
  0x6e   : > { %v653_v63 = vadd.f32 %v652_v59, %v626_v27  ;;  %6370 = vst [vmem:[#allocation5_spill] sm:$0xff] %v4960_v24  ;;  %v4966_v27 = vsub.f32 %v4792_v62, %v4804_v16 }
  0x70   : > { %v654_v4 = vadd.f32 %v653_v63, %v627_v29  ;;  %6371 = vst [vmem:[#allocation6_spill] sm:$0xff] %v4966_v27  ;;  %v642_v29 = vmul.f32 %v4960_v24, %v4960_v24  ;;  %v643_v60 = vmul.f32 %v4966_v27, %v4966_v27 }
  0x72   : > { %v655_v9 = vadd.f32 %v654_v4, %v628_v31  ;;  %v329_v4 = vlaneseq }
  0x74   : > { %v656_v12 = vadd.f32 %v655_v9, %v629_v33 }
  0x76   : > { %v657_v25 = vadd.f32 %v656_v12, %v630_v35  ;;  %v677_v12 = vmul.f32 28.0, %v4804_v16 }
  0x78   : > { %v658_v7 = vadd.f32 %v657_v25, %v631_v37  ;;  %v4974_v37 = vshrl.u32 %v329_v4, 7 }
  0x7a   : > { %v659_v28 = vadd.f32 %v658_v7, %v632_v39  ;;  %6372 = vst [vmem:[#allocation7_spill] sm:$0xff] %v4974_v37  ;;  %v331_v39 = vadd.s32 8, %v4974_v37  ;;  %v345_v7 = vadd.s32 120, %v4974_v37  ;;  %v348_v4 = vadd.s32 144, %v4974_v37 }
  0x7c   : > { %v660_v13 = vadd.f32 %v659_v28, %v633_v41  ;;  %v344_v41 = vadd.s32 112, %v4974_v37  ;;  %v347_v28 = vadd.s32 136, %v4974_v37 }
  0x7e   : > { %v661_v36 = vadd.f32 %v660_v13, %v634_v43  ;;  %v346_v43 = vadd.s32 128, %v4974_v37  ;;  %v678_v13 = vmul.f32 %v677_v12, %v4804_v16  ;;  %v350_v12 = vadd.s32 160, %v4974_v37 }
  0x80   : > { %v662_v40 = vadd.f32 %v661_v36, %v635_v45  ;;  %v359_v36 = vand.u32 15, %v331_v39 }
  0x82   : > { %v663_v44 = vadd.f32 %v662_v40, %v636_v47  ;;  %v358_v47 = vand.u32 15, %v4974_v37  ;;  %v372_v40 = vand.u32 15, %v344_v41  ;;  %vm415_vm1 = vcmp.ne.s32.totalorder %v359_v36, 15 }
  0x84   : > { %v664_v48 = vadd.f32 %v663_v44, %v637_v49  ;;  %v374_v44 = vand.u32 15, %v346_v43  ;;  %vm386_vm0 = vcmp.ne.s32.totalorder %v358_v47, 0  ;;  %vm4985_vm2 = vcmp.ne.s32.totalorder %v372_v40, 0 }
  0x85   : > { %v376_v47 = vand.u32 15, %v348_v4  ;;  %v378_v40 = vand.u32 15, %v350_v12 }
  0x86   : > { %v665_v52 = vadd.f32 %v664_v48, %v638_v51  ;;  %v373_v51 = vand.u32 15, %v345_v7  ;;  %vm4993_vm4 = vcmp.ne.s32.totalorder %v374_v44, 0  ;;  %v337_v44 = vadd.s32 56, %v4974_v37 }
  0x87   : > { %v5027_v7 = vsel %vm4993_vm4, 1.0, %v4609_v0  ;;  %vm5053_vm10 = vcmp.ne.s32.totalorder %v376_v47, 0  ;;  %vm5062_vm12 = vcmp.ne.s32.totalorder %v378_v40, 0 }
  0x88   : > { %v666_v56 = vadd.f32 %v665_v52, %v639_v53  ;;  %v375_v53 = vand.u32 15, %v347_v28  ;;  %vm4989_vm3 = vcmp.ne.s32.totalorder %v373_v51, 15  ;;  %6383 = vst [vmem:[#allocation10_spill] sm:$0xff] %v5027_v7  ;;  %v336_v51 = vadd.s32 48, %v4974_v37 }
  0x89   : > { %v5022_v41 = vsel %vm4989_vm3, 1.0, %v4609_v0 }
  0x8a   : > { %v667_v59 = vadd.f32 %v666_v56, %v640_v55  ;;  %v332_v55 = vadd.s32 16, %v4974_v37  ;;  %vm4997_vm5 = vcmp.ne.s32.totalorder %v375_v53, 15  ;;  %6382 = vst [vmem:[#allocation9_spill] sm:$0xff] %v5022_v41  ;;  %v338_v53 = vadd.s32 64, %v4974_v37 }
  0x8b   : > { %v5032_v43 = vsel %vm4997_vm5, 1.0, %v4609_v0  ;;  %v364_v4 = vand.u32 15, %v336_v51  ;;  %v5086_v51 = vsel %vm5053_vm10, 1.0, %v4609_v0 }
  0x8c   : > { %v668_v31 = vadd.f32 %v667_v59, %v641_v58  ;;  %v333_v59 = vadd.s32 24, %v4974_v37  ;;  %6384 = vst [vmem:[#allocation11_spill] sm:$0xff] %v5032_v43  ;;  %v366_v12 = vand.u32 15, %v338_v53  ;;  %6395 = vst [vmem:[#allocation12_spill] sm:$0xff] %v5086_v51 }
  0x8d   : > { %vm5099_vm14 = vcmp.ne.s32.totalorder %v364_v4, 0  ;;  %v5128_v4 = vadd.s32 88, %v4974_v37 }
  0x8e   : > { %v669_v63 = vadd.f32 %v668_v31, %v642_v29  ;;  %v335_v31 = vadd.s32 40, %v4974_v37  ;;  %v361_v28 = vand.u32 15, %v333_v59  ;;  %v354_v29 = vadd.s32 192, %v4974_v37  ;;  %v5182_v59 = vld [vmem:[%s316_s12] ss:$0 sm:$0xff] }
  0x90   : > { %v670_v33 = vadd.f32 %v669_v63, %v643_v60  ;;  %v334_v60 = vadd.s32 32, %v4974_v37  ;;  %vm5041_vm7 = vcmp.ne.s32.totalorder %v361_v28, 15  ;;  %v382_v40 = vand.u32 15, %v354_v29 }
  0x91   : > { %v5073_v47 = vsel %vm5041_vm7, 1.0, %v4609_v0 }
  0x92   : > { %v671_v35 = vrot.slane %v670_v33, 4  ;;  %vm5123_vm4 = vcmp.ne.s32.totalorder %v382_v40, 0  ;;  %v5146_v40 = vsel %vm5099_vm14, 1.0, %v4609_v0 }
  0x93   : > { %v5180_v29 = vsel %vm5123_vm4, 1.0, %v4609_v0 }
  0x94   : > { %v672_v9 = vadd.f32 %v671_v35, %v670_v33  ;;  %v360_v33 = vand.u32 15, %v332_v55  ;;  %v349_v35 = vadd.s32 152, %v4974_v37  ;;  %v352_v55 = vadd.s32 176, %v4974_v37  ;;  %6418 = vst [vmem:[#allocation20_spill] sm:$0xff] %v5180_v29 }
  0x96   : > { %v673_v62 = vrot.slane %v672_v9, 2  ;;  %vm388_vm6 = vcmp.ne.s32.totalorder %v360_v33, 0  ;;  %v377_v36 = vand.u32 15, %v349_v35  ;;  %v365_v35 = vand.u32 15, %v337_v44 }
  0x97   : > { %v5046_v16 = vsel %vm388_vm6, 1.0, %v4609_v0 }
  0x98   : > { %v674_v25 = vadd.f32 %v673_v62, %v672_v9  ;;  %v5007_v9 = vsel %vm386_vm0, 1.0, %v4609_v0  ;;  %v5010_v62 = vsel %vm415_vm1, 1.0, %v4609_v0  ;;  %vm5057_vm11 = vcmp.ne.s32.totalorder %v377_v36, 15 }
  0x99   : > { %v5091_v44 = vsel %vm5057_vm11, 1.0, %v4609_v0  ;;  %vm5103_vm15 = vcmp.ne.s32.totalorder %v365_v35, 15  ;;  %vm5107_vm0 = vcmp.ne.s32.totalorder %v366_v12, 0  ;;  %v5131_v35 = vadd.s32 96, %v4974_v37 }
  0x9a   : > { %v675_v45 = vrot.slane %v674_v25, 1  ;;  %6396 = vst [vmem:[#allocation13_spill] sm:$0xff] %v5091_v44  ;;  %v5134_v12 = vadd.s32 104, %v4974_v37  ;;  %v5151_v39 = vsel %vm5103_vm15, 1.0, %v4609_v0  ;;  %v5156_v27 = vsel %vm5107_vm0, 1.0, %v4609_v0 }
  0x9b   : > { %6413 = vst [vmem:[#allocation16_spill] sm:$0xff] %v5156_v27 }
  0x9c   : > { %v676_v49 = vadd.f32 %v675_v45, %v674_v25  ;;  %v5017_v25 = vsel %vm4985_vm2, 1.0, %v4609_v0  ;;  %v362_v45 = vand.u32 15, %v334_v60 }
  0x9d   : > { %6381 = vst [vmem:[#allocation8_spill] sm:$0xff] %v5017_v25 }
  0x9e   : > { %v679_v48 = vsub.f32 %v676_v49, %v678_v13  ;;  %v363_v13 = vand.u32 15, %v335_v31  ;;  %v351_v49 = vadd.s32 168, %v4974_v37  ;;  %vm5048_vm8 = vcmp.ne.s32.totalorder %v362_v45, 0 }
  0x9f   : > { %v355_v31 = vadd.s32 200, %v4974_v37  ;;  %v380_v45 = vand.u32 15, %v352_v55  ;;  %v5078_v36 = vsel %vm5048_vm8, 1.0, %v4609_v0  ;;  %v683_v55 = vld [vmem:[%s313_s9] sm:$0x1] }
  0xa0   : > { %v680_v52 = vmul.f32 0.0051020407, %v679_v48  ;;  %v339_v48 = vadd.s32 72, %v4974_v37  ;;  %vm419_vm9 = vcmp.ne.s32.totalorder %v363_v13, 15 }
  0xa1   : > { %v383_v53 = vand.u32 15, %v355_v31  ;;  %vm5115_vm2 = vcmp.ne.s32.totalorder %v380_v45, 0 }
  0xa2   : > { %v681_v63 = vadd.f32 1e-05, %v680_v52  ;;  %v353_v52 = vadd.s32 184, %v4974_v37  ;;  %v367_v28 = vand.u32 15, %v339_v48  ;;  %v340_v48 = vadd.s32 80, %v4974_v37 }
  0xa3   : > { %vm439_vm5 = vcmp.ne.s32.totalorder %v383_v53, 15  ;;  %v5170_v58 = vsel %vm5115_vm2, 1.0, %v4609_v0 }
  0xa4   : > { %4595 = vrsqrt.f32 %v681_v63  ;;  %v379_v63 = vand.u32 15, %v351_v49  ;;  %v381_v13 = vand.u32 15, %v353_v52  ;;  %v5081_v49 = vsel %vm419_vm9, 1.0, %v4609_v0  ;;  %6416 = vst [vmem:[#allocation18_spill] sm:$0xff] %v5170_v58 }
  0xa5   : > { %v5097_v52 = vsel %vm5062_vm12, 1.0, %v4609_v0  ;;  %vm5111_vm1 = vcmp.ne.s32.totalorder %v367_v28, 15 }
  0xa6   : > { %vm435_vm13 = vcmp.ne.s32.totalorder %v379_v63, 15  ;;  %6397 = vst [vmem:[#allocation14_spill] sm:$0xff] %v5097_v52  ;;  %vm5119_vm3 = vcmp.ne.s32.totalorder %v381_v13, 15  ;;  %v368_v13 = vand.u32 15, %v340_v48  ;;  %v5161_v53 = vsel %vm5111_vm1, 1.0, %v4609_v0 }
  0xa7   : > { %v5141_v45 = vsel %vm435_vm13, 1.0, %v4609_v0  ;;  %6414 = vst [vmem:[#allocation17_spill] sm:$0xff] %v5161_v53  ;;  %v6415_v48 = vsub.s32 0, %v4974_v37  ;;  %v5175_v56 = vsel %vm5119_vm3, 1.0, %v4609_v0 }
  0xa8   : > { %6412 = vst [vmem:[#allocation15_spill] sm:$0xff] %v5141_v45  ;;  %6417 = vst [vmem:[#allocation19_spill] sm:$0xff] %v5175_v56  ;;  %vm5198_vm6 = vcmp.ne.s32.totalorder %v368_v13, 0 }
  0xb1   : > { %v4596_v63 = vpop.eup %4595 }
  0xb2   : > { %v684_v28 = vmul.f32 %v4596_v63, %v683_v55  ;;  %v5185_v63 = vsel %vm439_vm5, 1.0, %v4609_v0 }
  0xb3   : > { %6419 = vst [vmem:[#allocation21_spill] sm:$0xff] %v5185_v63 }
  0xb4   : > { %v5165_v55 = vrot.slane %v684_v28, %v6415_v48  ;;  %v369_v28 = vand.u32 15, %v5128_v4 }
  0xb6   : > { %v689_v31 = vmul.f32 %v5165_v55, %v4808_v17  ;;  %v690_v24 = vmul.f32 %v5165_v55, %v4812_v20  ;;  %v703_v33 = vmul.f32 %v5165_v55, %v4888_v61  ;;  %v704_v37 = vmul.f32 %v5165_v55, %v4894_v1 }
  0xb7   : > { %v705_v4 = vmul.f32 %v5165_v55, %v4900_v5  ;;  %v706_v48 = vmul.f32 %v5165_v55, %v4906_v11  ;;  %v691_v17 = vmul.f32 %v5165_v55, %v4816_v21  ;;  %v692_v20 = vmul.f32 %v5165_v55, %v4820_v23 }
  0xb8   : > { %v724_v61 = vadd.f32 %v5182_v59, %v689_v31  ;;  %v725_v1 = vadd.f32 %v5182_v59, %v690_v24  ;;  %v738_v13 = vadd.f32 %v5182_v59, %v703_v33  ;;  %v739_v60 = vadd.f32 %v5182_v59, %v704_v37 }
  0xb9   : > { %v740_v63 = vadd.f32 %v5182_v59, %v705_v4  ;;  %v741_v5 = vadd.f32 %v5182_v59, %v706_v48  ;;  %v726_v11 = vadd.f32 %v5182_v59, %v691_v17  ;;  %v727_v57 = vadd.f32 %v5182_v59, %v692_v20 }
  0xba   : > { %v752_v21 = vmax.f32 %v724_v61, 0.0  ;;  %v753_v29 = vmax.f32 %v725_v1, 0.0  ;;  %v766_v54 = vmax.f32 %v738_v13, 0.0  ;;  %v767_v23 = vmax.f32 %v739_v60, 0.0  ;;  %v4533_v13 = vld [vmem:[%s4666_s26 + $0x30] sm:$0xff]  }
  0xbb   : > { %v768_v56 = vmax.f32 %v740_v63, 0.0  ;;  %v769_v31 = vmax.f32 %v741_v5, 0.0  ;;  %v754_v58 = vmax.f32 %v726_v11, 0.0  ;;  %v755_v24 = vmax.f32 %v727_v57, 0.0 }
  0xbc   : > { %v780_v33 = vmul.f32 %v5007_v9, %v752_v21  ;;  %v781_v37 = vmul.f32 %v5010_v62, %v753_v29  ;;  %v794_v4 = vmul.f32 %v5017_v25, %v766_v54  ;;  %v795_v48 = vmul.f32 %v5022_v41, %v767_v23  ;;  %v4534_v29 = vld [vmem:[%s4666_s26 + $0xb0] sm:$0xff]  }
  0xbd   : > { %v796_v17 = vmul.f32 %v5027_v7, %v768_v56  ;;  %v797_v20 = vmul.f32 %v5032_v43, %v769_v31  ;;  %v782_v60 = vmul.f32 %v5046_v16, %v754_v58  ;;  %v783_v63 = vmul.f32 %v5073_v47, %v755_v24  ;;  %v5251_v24 = vld [vmem:[#allocation2 + $0x8] sm:$0xff]  ;;  %v4566_v43 = vld [vmem:[%s4666_s26 + $0x1b0] sm:$0xff]  }
  0xbe   : > { %814 = vst [vmem:[#allocation2 + $0x18] sm:$0xff] %v780_v33  ;;  %815 = vst [vmem:[#allocation2 + $0x20] sm:$0xff] %v781_v37  ;;  %v929_v57 = vpack.c.bf16 %v781_v37, %v780_v33  ;;  %v936_v61 = vpack.c.bf16 %v795_v48, %v794_v4  ;;  %v693_v54 = vmul.f32 %v5165_v55, %v4828_v6  ;;  %vm5242_vm7 = vcmp.ne.s32.totalorder %v369_v28, 15 }
  0xbf   : > { %828 = vst [vmem:[#allocation2 + $0x88] sm:$0xff] %v794_v4  ;;  %829 = vst [vmem:[#allocation2 + $0x90] sm:$0xff] %v795_v48  ;;  %v694_v56 = vmul.f32 %v5165_v55, %v4834_v8  ;;  %v937_v1 = vpack.c.bf16 %v797_v20, %v796_v17  ;;  %v5232_v58 = vpack.c.bf16 %v783_v63, %v782_v60 }
  0xc0   : > { %830 = vst [vmem:[#allocation2 + $0x98] sm:$0xff] %v796_v17  ;;  %831 = vst [vmem:[#allocation2 + $0xa0] sm:$0xff] %v797_v20  ;;  %v707_v5 = vmul.f32 %v5165_v55, %v4912_v14  ;;  %v708_v11 = vmul.f32 %v5165_v55, %v4918_v26  ;;  %4117 = vmatmul.mubr.bf16.vlgmr.msra.gmra.mxu0 %v929_v57  ;;  %4132 = vmatprep.mubr.bf16.mxu1 %v936_v61 }
  0xc1   : > { %816 = vst [vmem:[#allocation2 + $0x28] sm:$0xff] %v782_v60  ;;  %817 = vst [vmem:[#allocation2 + $0x30] sm:$0xff] %v783_v63  ;;  %v728_v6 = vadd.f32 %v5182_v59, %v693_v54  ;;  %v729_v8 = vadd.f32 %v5182_v59, %v694_v56  ;;  %v709_v21 = vmul.f32 %v5165_v55, %v4924_v10  ;;  %4133 = vmatmul.mubr.bf16.vlgmr.msra.gmra.mxu1 %v937_v1 }
  0xc2   : > { %4189 = vmatpush3.bf16.msra.mxu0 %v4800_v3  ;;  %v742_v14 = vadd.f32 %v5182_v59, %v707_v5  ;;  %v743_v26 = vadd.f32 %v5182_v59, %v708_v11  ;;  %v710_v31 = vmul.f32 %v5165_v55, %v4930_v32  ;;  %v5256_v10 = vsel %vm5198_vm6, 1.0, %v5251_v24  ;;  %4145 = vmatpush3.bf16.msra.mxu1 %v4797_v2  ;;  %v4536_v3 = vld [vmem:[%s4666_s26 + $0xa8] sm:$0xff]   ;;  %v4538_v5 = vld [vmem:[%s4666_s26 + $0xa0] sm:$0xff]  }
  0xc3   : > { %6424 = vst [vmem:[#allocation22_spill] sm:$0xff] %v5256_v10  ;;  %4190 = vmatprep.subr.bf16.mxu0 %v4534_v29  ;;  %v756_v28 = vmax.f32 %v728_v6, 0.0  ;;  %v757_v33 = vmax.f32 %v729_v8, 0.0  ;;  %v744_v37 = vadd.f32 %v5182_v59, %v709_v21  ;;  %v695_v4 = vmul.f32 %v5165_v55, %v4840_v30  ;;  %4146 = vmatprep.subr.bf16.mxu1 %v4533_v13  ;;  %v4535_v32 = vld [vmem:[%s4666_s26 + $0x28] sm:$0xff]   ;;  %v4537_v21 = vld [vmem:[%s4666_s26 + $0x20] sm:$0xff]  }
  0xc4   : > { %4120 = vmatprep.mubr.bf16.mxu0 %v5232_v58  ;;  %v770_v48 = vmax.f32 %v742_v14, 0.0  ;;  %v771_v17 = vmax.f32 %v743_v26, 0.0  ;;  %v745_v0 = vadd.f32 %v5182_v59, %v710_v31  ;;  %v696_v2 = vmul.f32 %v5165_v55, %v4846_v34 }
  0xc5   : > { %v784_v20 = vmul.f32 %v5078_v36, %v756_v28  ;;  %v785_v60 = vmul.f32 %v5081_v49, %v757_v33  ;;  %v772_v63 = vmax.f32 %v744_v37, 0.0  ;;  %v730_v57 = vadd.f32 %v5182_v59, %v695_v4 }
  0xc6   : > { %4191 = vmatpush3.bf16.msra.mxu0 %v4534_v29  ;;  %v798_v30 = vmul.f32 %v5086_v51, %v770_v48  ;;  %v799_v61 = vmul.f32 %v5091_v44, %v771_v17  ;;  %v773_v54 = vmax.f32 %v745_v0, 0.0  ;;  %v731_v56 = vadd.f32 %v5182_v59, %v696_v2  ;;  %4147 = vmatpush3.bf16.msra.mxu1 %v4533_v13  ;;  %v4540_v17 = vld [vmem:[%s4666_s26 + $0x98] sm:$0xff]  }
  0xc7   : > { %818 = vst [vmem:[#allocation2 + $0x38] sm:$0xff] %v784_v20  ;;  %819 = vst [vmem:[#allocation2 + $0x40] sm:$0xff] %v785_v60  ;;  %v5274_v34 = vpack.c.bf16 %v785_v60, %v784_v20  ;;  %4192 = vmatprep.subr.bf16.mxu0 %v4536_v3  ;;  %v800_v1 = vmul.f32 %v5097_v52, %v772_v63  ;;  %v758_v11 = vmax.f32 %v730_v57, 0.0  ;;  %4148 = vmatprep.subr.bf16.mxu1 %v4535_v32  ;;  %v4539_v20 = vld [vmem:[%s4666_s26 + $0x18] sm:$0xff]  }
  0xc8   : > { %v697_v29 = vmul.f32 %v5165_v55, %v4852_v38  ;;  %832 = vst [vmem:[#allocation2 + $0xa8] sm:$0xff] %v798_v30  ;;  %833 = vst [vmem:[#allocation2 + $0xb0] sm:$0xff] %v799_v61  ;;  %v938_v6 = vpack.c.bf16 %v799_v61, %v798_v30  ;;  %v801_v8 = vmul.f32 %v5141_v45, %v773_v54  ;;  %v759_v13 = vmax.f32 %v731_v56, 0.0 }
  0xc9   : > { %v698_v14 = vmul.f32 %v5165_v55, %v4858_v42  ;;  %v6425_v26 = vand.u32 15, %v5131_v35  ;;  %4121 = vmatmul.mubr.bf16.gmra.mxu0 %v5274_v34  ;;  %834 = vst [vmem:[#allocation2 + $0xb8] sm:$0xff] %v800_v1  ;;  %v786_v38 = vmul.f32 %v5146_v40, %v758_v11  ;;  %v711_v33 = vmul.f32 %v5165_v55, %v4936_v15  ;;  %v6433_v11 = vld [vmem:[#allocation19_spill] sm:$0xff] }
  0xca   : > { %v732_v28 = vadd.f32 %v5182_v59, %v697_v29  ;;  %v712_v42 = vmul.f32 %v5165_v55, %v4942_v18  ;;  %4193 = vmatpush3.bf16.msra.mxu0 %v4536_v3  ;;  %4136 = vmatprep.mubr.bf16.mxu1 %v938_v6  ;;  %835 = vst [vmem:[#allocation2 + $0xc0] sm:$0xff] %v801_v8  ;;  %v5302_v48 = vsel %vm5242_vm7, 1.0, %v5251_v24  ;;  %v6429_v56 = vand.u32 15, %v5134_v12  ;;  %v4541_v12 = vld [vmem:[%s4666_s26 + $0x10] sm:$0xff]  }
  0xcb   : > { %vm5286_vm8 = vcmp.ne.s32.totalorder %v6425_v26, 0  ;;  %v939_v35 = vpack.c.bf16 %v801_v8, %v800_v1  ;;  %v787_v37 = vmul.f32 %v5151_v39, %v759_v13  ;;  %v733_v4 = vadd.f32 %v5182_v59, %v698_v14  ;;  %6428 = vst [vmem:[#allocation23_spill] sm:$0xff] %v5302_v48  ;;  %4149 = vmatpush3.bf16.msra.mxu1 %v4535_v32  ;;  %v6432_v1 = vld [vmem:[#allocation18_spill] sm:$0xff]  ;;  %v6434_v26 = vld [vmem:[#allocation3_spill] sm:$0xff] }
  0xcc   : > { %4194 = vmatprep.subr.bf16.mxu0 %v4538_v5  ;;  %820 = vst [vmem:[#allocation2 + $0x48] sm:$0xff] %v786_v38  ;;  %v760_v15 = vmax.f32 %v732_v28, 0.0  ;;  %v746_v18 = vadd.f32 %v5182_v59, %v711_v33  ;;  %v747_v3 = vadd.f32 %v5182_v59, %v712_v42  ;;  %v713_v0 = vmul.f32 %v5165_v55, %v4948_v19  ;;  %v6435_v28 = vld [vmem:[#allocation20_spill] sm:$0xff]  ;;  %v4542_v42 = vld [vmem:[%s4666_s26 + $0x90] sm:$0xff]  }
  0xcd   : > { %4137 = vmatmul.mubr.bf16.gmra.mxu1 %v939_v35  ;;  %4150 = vmatprep.subr.bf16.mxu1 %v4537_v21  ;;  %821 = vst [vmem:[#allocation2 + $0x50] sm:$0xff] %v787_v37  ;;  %v5309_v2 = vpack.c.bf16 %v787_v37, %v786_v38  ;;  %v761_v23 = vmax.f32 %v733_v4, 0.0  ;;  %v714_v32 = vmul.f32 %v5165_v55, %v4954_v22  ;;  %vm5325_vm9 = vcmp.ne.s32.totalorder %v6429_v56, 15  ;;  %v6436_v37 = vld [vmem:[#allocation4_spill] sm:$0xff]  ;;  %v4544_v56 = vld [vmem:[%s4666_s26 + $0x88] sm:$0xff]  }
  0xce   : > { %v699_v60 = vmul.f32 %v5165_v55, %v4864_v46  ;;  %v788_v63 = vmul.f32 %v5156_v27, %v760_v15  ;;  %v774_v57 = vmax.f32 %v746_v18, 0.0  ;;  %v775_v30 = vmax.f32 %v747_v3, 0.0  ;;  %4195 = vmatpush3.bf16.msra.mxu0 %v4538_v5  ;;  %v6437_v15 = vld [vmem:[#allocation21_spill] sm:$0xff]  ;;  %v1346_v46 = vld [vmem:[#allocation2 + $0x11] sm:$0xff] }
  0xcf   : > { %v748_v61 = vadd.f32 %v5182_v59, %v713_v0  ;;  %4124 = vmatprep.mubr.bf16.mxu0 %v5309_v2  ;;  %v789_v19 = vmul.f32 %v5161_v53, %v761_v23  ;;  %v749_v54 = vadd.f32 %v5182_v59, %v714_v32  ;;  %v700_v22 = vmul.f32 %v5165_v55, %v4870_v50  ;;  %v842_v23 = vld [vmem:[#allocation2 + $0x7] sm:$0xff]  ;;  %v843_v32 = vld [vmem:[#allocation2 + $0xf] sm:$0xff] }
  0xd0   : > { %4151 = vmatpush3.bf16.msra.mxu1 %v4537_v21  ;;  %822 = vst [vmem:[#allocation2 + $0x58] sm:$0xff] %v788_v63  ;;  %4196 = vmatprep.subr.bf16.mxu0 %v4540_v17  ;;  %v802_v5 = vmul.f32 %v6432_v1, %v774_v57  ;;  %v803_v29 = vmul.f32 %v6433_v11, %v775_v30  ;;  %v5352_v30 = vsel %vm5286_vm8, 1.0, %v5251_v24  ;;  %v4564_v11 = vld [vmem:[%s4666_s26 + $0x1b8] sm:$0xff]  }
  0xd1   : > { %v776_v6 = vmax.f32 %v748_v61, 0.0  ;;  %v734_v8 = vadd.f32 %v5182_v59, %v699_v60  ;;  %823 = vst [vmem:[#allocation2 + $0x60] sm:$0xff] %v789_v19  ;;  %v5332_v13 = vpack.c.bf16 %v789_v19, %v788_v63  ;;  %4152 = vmatprep.subr.bf16.mxu1 %v4539_v20  ;;  %v777_v50 = vmax.f32 %v749_v54, 0.0  ;;  %v6438_v60 = vld [vmem:[#allocation7_spill] sm:$0xff]  ;;  %6439 = vst [vmem:[#allocation3_spill] sm:$0xff] %v5352_v30 }
  0xd2   : > { %v735_v14 = vadd.f32 %v5182_v59, %v700_v22  ;;  %v701_v21 = vmul.f32 %v5165_v55, %v6434_v26  ;;  %836 = vst [vmem:[#allocation2 + $0xc8] sm:$0xff] %v802_v5  ;;  %837 = vst [vmem:[#allocation2 + $0xd0] sm:$0xff] %v803_v29  ;;  %v5338_v38 = vpack.c.bf16 %v803_v29, %v802_v5  ;;  %v356_v63 = vadd.s32 208, %v6438_v60  ;;  %v4543_v22 = vld [vmem:[%s4666_s26 + $0x8] sm:$0xff]  }
  0xd3   : > { %v804_v33 = vmul.f32 %v6435_v28, %v776_v6  ;;  %v762_v35 = vmax.f32 %v734_v8, 0.0  ;;  %v702_v4 = vmul.f32 %v5165_v55, %v6436_v37  ;;  %4125 = vmatmul.mubr.bf16.gmra.mxu0 %v5332_v13  ;;  %v805_v18 = vmul.f32 %v6437_v15, %v777_v50  ;;  %v1345_v8 = vld [vmem:[#allocation2 + $0x9] sm:$0xff] }
  0xd4   : > { %v763_v3 = vmax.f32 %v735_v14, 0.0  ;;  %v736_v0 = vadd.f32 %v5182_v59, %v701_v21  ;;  %4153 = vmatpush3.bf16.msra.mxu1 %v4539_v20  ;;  %4197 = vmatpush3.bf16.msra.mxu0 %v4540_v17  ;;  %v5362_v17 = vsel %vm5325_vm9, 1.0, %v5251_v24  ;;  %v870_v5 = vpack.c.bf16 %v843_v32, %v842_v23  ;;  %v4545_v21 = vld [vmem:[%s4666_s26] sm:$0xff]  }
  0xd5   : > { %838 = vst [vmem:[#allocation2 + $0xd8] sm:$0xff] %v804_v33  ;;  %v790_v57 = vmul.f32 %v5256_v10, %v762_v35  ;;  %v737_v61 = vadd.f32 %v5182_v59, %v702_v4  ;;  %4140 = vmatprep.mubr.bf16.mxu1 %v5338_v38  ;;  %839 = vst [vmem:[#allocation2 + $0xe0] sm:$0xff] %v805_v18  ;;  %v5356_v19 = vpack.c.bf16 %v805_v18, %v804_v33  ;;  %v4546_v35 = vld [vmem:[%s4666_s26 + $0x80] sm:$0xff]  }
  0xd6   : > { %4154 = vmatprep.subr.bf16.mxu1 %v4541_v12  ;;  %v791_v20 = vmul.f32 %v5302_v48, %v763_v3  ;;  %6440 = vst [vmem:[#allocation4_spill] sm:$0xff] %v5362_v17  ;;  %v764_v54 = vmax.f32 %v736_v0, 0.0  ;;  %4198 = vmatprep.subr.bf16.mxu0 %v4542_v42  ;;  %v384_v50 = vand.u32 15, %v356_v63  ;;  %v357_v14 = vadd.s32 216, %v6438_v60  ;;  %v844_v3 = vld [vmem:[#allocation2 + $0x17] sm:$0xff]  ;;  %v845_v0 = vld [vmem:[#allocation2 + $0x1f] sm:$0xff] }
  0xd7   : > { %824 = vst [vmem:[#allocation2 + $0x68] sm:$0xff] %v790_v57  ;;  %v765_v31 = vmax.f32 %v737_v61, 0.0  ;;  %4141 = vmatmul.mubr.bf16.gmra.mxu1 %v5356_v19  ;;  %v1373_v37 = vpack.c.bf16 %v1346_v46, %v1345_v8  ;;  %v1347_v23 = vld [vmem:[#allocation2 + $0x19] sm:$0xff]  ;;  %v1348_v32 = vld [vmem:[#allocation2 + $0x21] sm:$0xff]  ;;  %v4557_v60 = vld [vmem:[%s4666_s26 + $0xd0] sm:$0xff]  }
  0xd8   : > { %825 = vst [vmem:[#allocation2 + $0x70] sm:$0xff] %v791_v20  ;;  %v5367_v29 = vpack.c.bf16 %v791_v20, %v790_v57  ;;  %v792_v6 = vmul.f32 %v5352_v30, %v764_v54  ;;  %4155 = vmatpush3.bf16.msra.mxu1 %v4541_v12  ;;  %4199 = vmatpush3.bf16.msra.mxu0 %v4542_v42  ;;  %vm5377_vm10 = vcmp.ne.s32.totalorder %v384_v50, 0  ;;  %v6443_v12 = vld [vmem:[#allocation5_spill] sm:$0xff]  ;;  %v385_v18 = vand.u32 15, %v357_v14  ;;  %v4547_v63 = vld [vmem:[%s4666_s26 + $0xf8] sm:$0xff]   ;;  %v847_v54 = vld [vmem:[#allocation2 + $0x2f] sm:$0xff] }
  0xd9   : > { %v793_v26 = vmul.f32 %v5362_v17, %v765_v31  ;;  %4156 = vmatprep.subr.bf16.mxu1 %v4543_v22  ;;  %4200 = vmatprep.subr.bf16.mxu0 %v4544_v56  ;;  %v715_v42 = vmul.f32 %v5165_v55, %v6443_v12  ;;  %v4548_v61 = vld [vmem:[%s4666_s26 + $0x138] sm:$0xff]   ;;  %v846_v20 = vld [vmem:[#allocation2 + $0x27] sm:$0xff]  ;;  %v5390_v31 = vsel %vm5377_vm10, 1.0, %v5251_v24  ;;  %v5396_v50 = vpack.c.bf16 %v1348_v32, %v1347_v23  ;;  %v4549_v12 = vld [vmem:[%s4666_s26 + $0xf0] sm:$0xff]  }
  0xda   : > { %4128 = vmatprep.mubr.bf16.mxu0 %v5367_v29  ;;  %826 = vst [vmem:[#allocation2 + $0x78] sm:$0xff] %v792_v6  ;;  %4160 = vmatprep.mubr.bf16.mxu1 %v870_v5  ;;  %6444 = vst [vmem:[#allocation5_spill] sm:$0xff] %v5390_v31  ;;  %v1350_v5 = vld [vmem:[#allocation2 + $0x31] sm:$0xff]  ;;  %vm441_vm11 = vcmp.ne.s32.totalorder %v385_v18, 15  ;;  %v6445_v8 = vld [vmem:[#allocation6_spill] sm:$0xff]  ;;  %v5398_v14 = vpack.c.bf16 %v847_v54, %v846_v20 }
  0xdb   : > { %827 = vst [vmem:[#allocation2 + $0x80] sm:$0xff] %v793_v26  ;;  %v5374_v33 = vpack.c.bf16 %v793_v26, %v792_v6  ;;  %v750_v57 = vadd.f32 %v5182_v59, %v715_v42  ;;  %v716_v46 = vmul.f32 %v5165_v55, %v6445_v8  ;;  %v5408_v42 = vsel %vm441_vm11, 1.0, %v5251_v24  ;;  %v4550_v55 = vld [vmem:[%s4666_s26 + $0x130] sm:$0xff]   ;;  %v850_v24 = vld [vmem:[#allocation2 + $0x47] sm:$0xff] }
  0xdc   : > { %4157 = vmatpush3.bf16.msra.mxu1 %v4543_v22  ;;  %4201 = vmatpush3.bf16.msra.mxu0 %v4544_v56  ;;  %v5392_v22 = vpack.c.bf16 %v845_v0, %v844_v3  ;;  %v1349_v56 = vld [vmem:[#allocation2 + $0x29] sm:$0xff]  ;;  %6446 = vst [vmem:[#allocation6_spill] sm:$0xff] %v5408_v42  ;;  %v848_v18 = vld [vmem:[#allocation2 + $0x37] sm:$0xff]  ;;  %v1352_v0 = vld [vmem:[#allocation2 + $0x41] sm:$0xff] }
  0xdd   : > { %4129 = vmatmul.mubr.bf16.gmra.mxu0 %v5374_v33  ;;  %4158 = vmatprep.subr.bf16.mxu1 %v4545_v21  ;;  %v778_v6 = vmax.f32 %v750_v57, 0.0  ;;  %v5404_v4 = vpack.c.bf16 %v1350_v5, %v1349_v56  ;;  %v1351_v3 = vld [vmem:[#allocation2 + $0x39] sm:$0xff]  ;;  %v851_v23 = vld [vmem:[#allocation2 + $0x4f] sm:$0xff] }
  0xde   : > { %4202 = vmatprep.subr.bf16.mxu0 %v4546_v35  ;;  %4204 = vmatprep.mubr.bf16.mxu0 %v1373_v37  ;;  %v751_v37 = vadd.f32 %v5182_v59, %v716_v46  ;;  %v849_v59 = vld [vmem:[#allocation2 + $0x3f] sm:$0xff]  ;;  %v1353_v57 = vld [vmem:[#allocation2 + $0x49] sm:$0xff]  ;;  %v1354_v20 = vld [vmem:[#allocation2 + $0x51] sm:$0xff]  ;;  %v5426_v56 = vpack.c.bf16 %v851_v23, %v850_v24 }
  0xdf   : > { %v5401_v26 = vmul.f32 %v5390_v31, %v778_v6  ;;  %v5421_v54 = vpack.c.bf16 %v849_v59, %v848_v18  ;;  %v5428_v5 = vpack.c.bf16 %v1354_v20, %v1353_v57  ;;  %v4553_v6 = vld [vmem:[%s4666_s26 + $0xe0] sm:$0xff]   ;;  %v852_v46 = vld [vmem:[#allocation2 + $0x57] sm:$0xff]  ;;  %v855_v18 = vld [vmem:[#allocation2 + $0x6f] sm:$0xff] }
  0xe0   : > { %4159 = vmatpush3.bf16.msra.mxu1 %v4545_v21  ;;  %4203 = vmatpush3.bf16.msra.mxu0 %v4546_v35  ;;  %v4551_v21 = vld [vmem:[%s4666_s26 + $0xe8] sm:$0xff]   ;;  %v779_v35 = vmax.f32 %v751_v37, 0.0  ;;  %v4554_v8 = vld [vmem:[%s4666_s26 + $0x120] sm:$0xff]   ;;  %v4556_v23 = vld [vmem:[%s4666_s26 + $0x118] sm:$0xff]  }
  0xe1   : > { %4232 = vmatprep.subr.bf16.mxu1 %v4547_v63  ;;  %4276 = vmatprep.subr.bf16.mxu0 %v4548_v61  ;;  %840 = vst [vmem:[#allocation2 + $0xe8] sm:$0xff] %v5401_v26  ;;  %v853_v37 = vld [vmem:[#allocation2 + $0x5f] sm:$0xff]  ;;  %v1357_v59 = vld [vmem:[#allocation2 + $0x69] sm:$0xff]  ;;  %v868_v44 = vld [vmem:[#allocation2 + $0xd7] sm:$0xff] }
  0xe2   : > { %v5417_v32 = vmul.f32 %v5408_v42, %v779_v35  ;;  %v854_v35 = vld [vmem:[#allocation2 + $0x67] sm:$0xff]  ;;  %v5437_v24 = vpack.c.bf16 %v853_v37, %v852_v46  ;;  %v856_v46 = vld [vmem:[#allocation2 + $0x77] sm:$0xff]  ;;  %v857_v37 = vld [vmem:[#allocation2 + $0x7f] sm:$0xff] }
  0xe3   : > { %4161 = vmatmul.mubr.bf16.vlgmr.msra.gmra.mxu1 %v5392_v22  ;;  %v5442_v20 = vpack.c.bf16 %v855_v18, %v854_v35  ;;  %v1361_v35 = vld [vmem:[#allocation2 + $0x89] sm:$0xff]  ;;  %v1362_v18 = vld [vmem:[#allocation2 + $0x91] sm:$0xff]  ;;  %v869_v51 = vld [vmem:[#allocation2 + $0xdf] sm:$0xff] }
  0xe4   : > { %4233 = vmatpush3.bf16.msra.mxu1 %v4547_v63  ;;  %4164 = vmatprep.mubr.bf16.mxu1 %v5398_v14  ;;  %v4552_v63 = vld [vmem:[%s4666_s26 + $0x128] sm:$0xff]   ;;  %841 = vst [vmem:[#allocation2 + $0xf0] sm:$0xff] %v5417_v32  ;;  %v5460_v28 = vpack.c.bf16 %v1362_v18, %v1361_v35  ;;  %v4563_v35 = vld [vmem:[%s4666_s26 + $0x178] sm:$0xff]  }
  0xe5   : > { %4205 = vmatmul.mubr.bf16.vlgmr.msra.gmra.mxu0 %v5396_v50  ;;  %4234 = vmatprep.subr.bf16.mxu1 %v4549_v12  ;;  %v4560_v42 = vld [vmem:[%s4666_s26 + $0x108] sm:$0xff]   ;;  %v3046_v7 = vld [vmem:[#allocation2 + $0xd1] sm:$0xff] }
  0xe6   : > { %4277 = vmatpush3.bf16.msra.mxu0 %v4548_v61  ;;  %4208 = vmatprep.mubr.bf16.mxu0 %v5404_v4  ;;  %v5424_v61 = vpack.c.bf16 %v1352_v0, %v1351_v3  ;;  %v1358_v3 = vld [vmem:[#allocation2 + $0x71] sm:$0xff] }
  0xe7   : > { %4278 = vmatprep.subr.bf16.mxu0 %v4550_v55  ;;  %v4555_v0 = vld [vmem:[%s4666_s26 + $0xd8] sm:$0xff]  }
  0xe8   : > { %4235 = vmatpush3.bf16.msra.mxu1 %v4549_v12  ;;  %v1355_v12 = vld [vmem:[#allocation2 + $0x59] sm:$0xff] }
  0xe9   : > { %4236 = vmatprep.subr.bf16.mxu1 %v4551_v21 }
  0xea   : > { %4279 = vmatpush3.bf16.msra.mxu0 %v4550_v55  ;;  %v1356_v55 = vld [vmem:[#allocation2 + $0x61] sm:$0xff] }
  0xeb   : > { %4280 = vmatprep.subr.bf16.mxu0 %v4552_v63  ;;  %4165 = vmatmul.mubr.bf16.gmra.mxu1 %v5421_v54  ;;  %v5440_v57 = vpack.c.bf16 %v1356_v55, %v1355_v12  ;;  %v859_v12 = vld [vmem:[#allocation2 + $0x8f] sm:$0xff]  ;;  %v1360_v55 = vld [vmem:[#allocation2 + $0x81] sm:$0xff] }
  0xec   : > { %4168 = vmatprep.mubr.bf16.mxu1 %v5426_v56  ;;  %4237 = vmatpush3.bf16.msra.mxu1 %v4551_v21  ;;  %v5444_v21 = vpack.c.bf16 %v1358_v3, %v1357_v59  ;;  %v4559_v59 = vld [vmem:[%s4666_s26 + $0xc8] sm:$0xff]   ;;  %v5453_v3 = vpack.c.bf16 %v857_v37, %v856_v46  ;;  %v860_v46 = vld [vmem:[#allocation2 + $0x97] sm:$0xff]  ;;  %v861_v37 = vld [vmem:[#allocation2 + $0x9f] sm:$0xff] }
  0xed   : > { %4209 = vmatmul.mubr.bf16.gmra.mxu0 %v5424_v61  ;;  %4238 = vmatprep.subr.bf16.mxu1 %v4553_v6  ;;  %v5469_v18 = vpack.c.bf16 %v861_v37, %v860_v46  ;;  %v1367_v46 = vld [vmem:[#allocation2 + $0xb9] sm:$0xff]  ;;  %v1368_v37 = vld [vmem:[#allocation2 + $0xc1] sm:$0xff] }
  0xee   : > { %4212 = vmatprep.mubr.bf16.mxu0 %v5428_v5  ;;  %4281 = vmatpush3.bf16.msra.mxu0 %v4552_v63  ;;  %v4558_v63 = vld [vmem:[%s4666_s26 + $0x110] sm:$0xff]  }
  0xef   : > { %4282 = vmatprep.subr.bf16.mxu0 %v4554_v8 }
  0xf0   : > { %4239 = vmatpush3.bf16.msra.mxu1 %v4553_v6  ;;  %v1359_v6 = vld [vmem:[#allocation2 + $0x79] sm:$0xff] }
  0xf1   : > { %4240 = vmatprep.subr.bf16.mxu1 %v4555_v0  ;;  %v5456_v31 = vpack.c.bf16 %v1360_v55, %v1359_v6  ;;  %v1364_v6 = vld [vmem:[#allocation2 + $0xa1] sm:$0xff]  ;;  %v1365_v55 = vld [vmem:[#allocation2 + $0xa9] sm:$0xff] }
  0xf2   : > { %4283 = vmatpush3.bf16.msra.mxu0 %v4554_v8  ;;  %v858_v8 = vld [vmem:[#allocation2 + $0x87] sm:$0xff] }
  0xf3   : > { %4169 = vmatmul.mubr.bf16.gmra.mxu1 %v5437_v24  ;;  %4284 = vmatprep.subr.bf16.mxu0 %v4556_v23  ;;  %v5458_v15 = vpack.c.bf16 %v859_v12, %v858_v8  ;;  %v1363_v12 = vld [vmem:[#allocation2 + $0x99] sm:$0xff]  ;;  %v1366_v8 = vld [vmem:[#allocation2 + $0xb1] sm:$0xff] }
  0xf4   : > { %4172 = vmatprep.mubr.bf16.mxu1 %v5442_v20  ;;  %4241 = vmatpush3.bf16.msra.mxu1 %v4555_v0  ;;  %v4561_v0 = vld [vmem:[%s4666_s26 + $0xc0] sm:$0xff]   ;;  %v5472_v1 = vpack.c.bf16 %v1364_v6, %v1363_v12  ;;  %v5476_v52 = vpack.c.bf16 %v1366_v8, %v1365_v55  ;;  %v867_v6 = vld [vmem:[#allocation2 + $0xcf] sm:$0xff] }
  0xf5   : > { %4213 = vmatmul.mubr.bf16.gmra.mxu0 %v5440_v57  ;;  %4242 = vmatprep.subr.bf16.mxu1 %v4557_v60  ;;  %v866_v12 = vld [vmem:[#allocation2 + $0xc7] sm:$0xff] }
  0xf6   : > { %4216 = vmatprep.mubr.bf16.mxu0 %v5444_v21  ;;  %4285 = vmatpush3.bf16.msra.mxu0 %v4556_v23  ;;  %v4562_v23 = vld [vmem:[%s4666_s26 + $0x100] sm:$0xff]   ;;  %v5486_v55 = vpack.c.bf16 %v867_v6, %v866_v12  ;;  %v5494_v12 = vpack.c.bf16 %v869_v51, %v868_v44  ;;  %v4567_v51 = vld [vmem:[%s4666_s26 + $0x168] sm:$0xff]  }
  0xf7   : > { %4286 = vmatprep.subr.bf16.mxu0 %v4558_v63  ;;  %v4568_v44 = vld [vmem:[%s4666_s26 + $0x1a8] sm:$0xff]  }
  0xf8   : > { %4243 = vmatpush3.bf16.msra.mxu1 %v4557_v60  ;;  %v862_v60 = vld [vmem:[#allocation2 + $0xa7] sm:$0xff] }
  0xf9   : > { %4244 = vmatprep.subr.bf16.mxu1 %v4559_v59 }
  0xfa   : > { %4287 = vmatpush3.bf16.msra.mxu0 %v4558_v63  ;;  %v863_v63 = vld [vmem:[#allocation2 + $0xaf] sm:$0xff] }
  0xfb   : > { %4173 = vmatmul.mubr.bf16.gmra.mxu1 %v5453_v3  ;;  %4288 = vmatprep.subr.bf16.mxu0 %v4560_v42  ;;  %v5474_v45 = vpack.c.bf16 %v863_v63, %v862_v60  ;;  %v1369_v60 = vld [vmem:[#allocation2 + $0xc9] sm:$0xff]  ;;  %v1370_v63 = vld [vmem:[#allocation2 + $0xd1] sm:$0xff] }
  0xfc   : > { %4176 = vmatprep.mubr.bf16.mxu1 %v5458_v15  ;;  %4245 = vmatpush3.bf16.msra.mxu1 %v4559_v59  ;;  %v865_v59 = vld [vmem:[#allocation2 + $0xbf] sm:$0xff]  ;;  %v5488_v8 = vpack.c.bf16 %v1370_v63, %v1369_v60  ;;  %v4565_v63 = vld [vmem:[%s4666_s26 + $0x170] sm:$0xff]  }
  0xfd   : > { %4217 = vmatmul.mubr.bf16.gmra.mxu0 %v5456_v31  ;;  %4246 = vmatprep.subr.bf16.mxu1 %v4561_v0 }
  0xfe   : > { %4220 = vmatprep.mubr.bf16.mxu0 %v5460_v28  ;;  %4289 = vmatpush3.bf16.msra.mxu0 %v4560_v42  ;;  %v864_v42 = vld [vmem:[#allocation2 + $0xb7] sm:$0xff] }
  0xff   : > { %4290 = vmatprep.subr.bf16.mxu0 %v4562_v23 }
 0x100   : > { %4247 = vmatpush3.bf16.msra.mxu1 %v4561_v0  ;;  %v5482_v0 = vpack.c.bf16 %v865_v59, %v864_v42  ;;  %v1371_v42 = vld [vmem:[#allocation2 + $0xd9] sm:$0xff]  ;;  %v1372_v59 = vld [vmem:[#allocation2 + $0xe1] sm:$0xff] }
 0x101   : > { %4320 = vmatprep.subr.bf16.mxu1 %v4563_v35  ;;  %v5496_v6 = vpack.c.bf16 %v1372_v59, %v1371_v42  ;;  %v1921_v42 = vld [vmem:[#allocation2 + $0x98] sm:$0xff]  ;;  %v1922_v59 = vld [vmem:[#allocation2 + $0xa0] sm:$0xff] }
 0x102   : > { %4291 = vmatpush3.bf16.msra.mxu0 %v4562_v23  ;;  %v5484_v23 = vpack.c.bf16 %v1368_v37, %v1367_v46  ;;  %v1905_v46 = vld [vmem:[#allocation2 + $0x18] sm:$0xff]  ;;  %v1906_v37 = vld [vmem:[#allocation2 + $0x20] sm:$0xff] }
 0x103   : > { %4177 = vmatmul.mubr.bf16.gmra.mxu1 %v5469_v18  ;;  %4364 = vmatprep.subr.bf16.mxu0 %v4564_v11  ;;  %v1933_v60 = vpack.c.bf16 %v1906_v37, %v1905_v46  ;;  %v4575_v46 = vld [vmem:[%s4666_s26 + $0x148] sm:$0xff]  }
 0x104   : > { %4180 = vmatprep.mubr.bf16.mxu1 %v5474_v45  ;;  %v4576_v37 = vld [vmem:[%s4666_s26 + $0x188] sm:$0xff]  }
 0x105   : > { %4221 = vmatmul.mubr.bf16.gmra.mxu0 %v5472_v1 }
 0x106   : > { %4224 = vmatprep.mubr.bf16.mxu0 %v5476_v52 }
 0x10b   : > { %4181 = vmatmul.mubr.bf16.gmra.mxu1 %v5482_v0 }
 0x10c   : > { %4184 = vmatprep.mubr.bf16.mxu1 %v5486_v55 }
 0x10d   : > { %4225 = vmatmul.mubr.bf16.gmra.mxu0 %v5484_v23 }
 0x10e   : > { %4228 = vmatprep.mubr.bf16.mxu0 %v5488_v8 }
 0x113   : > { %4185 = vmatmul.mubr.bf16.gmra.mxu1 %v5494_v12 }
 0x114   : > { %4248 = vmatprep.mubr.bf16.mxu1 %v5392_v22  ;;  %v4569_v22 = vld [vmem:[%s4666_s26 + $0x160] sm:$0xff]  }
 0x115   : > { %4229 = vmatmul.mubr.bf16.gmra.mxu0 %v5496_v6 }
 0x116   : > { %4292 = vmatprep.mubr.bf16.mxu0 %v1933_v60 }
 0x11b   : > { %4249 = vmatmul.mubr.bf16.vlgmr.msra.gmra.mxu1 %v5398_v14 }
 0x11c   : > { %4321 = vmatpush3.bf16.msra.mxu1 %v4563_v35  ;;  %4252 = vmatprep.mubr.bf16.mxu1 %v5421_v54  ;;  %v1920_v35 = vld [vmem:[#allocation2 + $0x90] sm:$0xff] }
 0x11d   : > { %4293 = vmatmul.mubr.bf16.vlgmr.msra.gmra.mxu0 %v5232_v58  ;;  %4322 = vmatprep.subr.bf16.mxu1 %v4565_v63  ;;  %v4570_v58 = vld [vmem:[%s4666_s26 + $0x1a0] sm:$0xff]  }
 0x11e   : > { %4365 = vmatpush3.bf16.msra.mxu0 %v4564_v11  ;;  %4296 = vmatprep.mubr.bf16.mxu0 %v5274_v34  ;;  %v4571_v34 = vld [vmem:[%s4666_s26 + $0x158] sm:$0xff]   ;;  %v4573_v11 = vld [vmem:[%s4666_s26 + $0x150] sm:$0xff]  }
 0x11f   : > { %4366 = vmatprep.subr.bf16.mxu0 %v4566_v43 }
 0x120   : > { %4323 = vmatpush3.bf16.msra.mxu1 %v4565_v63  ;;  %v5527_v63 = vpack.c.bf16 %v1922_v59, %v1921_v42  ;;  %v1946_v59 = vpack.c.bf16 %v5417_v32, %v5401_v26  ;;  %v4586_v26 = vld [vmem:[%s4666_s26 + $0x220] sm:$0xff]  }
 0x121   : > { %4324 = vmatprep.subr.bf16.mxu1 %v4567_v51 }
 0x122   : > { %4367 = vmatpush3.bf16.msra.mxu0 %v4566_v43  ;;  %v4572_v43 = vld [vmem:[%s4666_s26 + $0x198] sm:$0xff]  }
 0x123   : > { %4368 = vmatprep.subr.bf16.mxu0 %v4568_v44  ;;  %4253 = vmatmul.mubr.bf16.gmra.mxu1 %v5426_v56 }
 0x124   : > { %4256 = vmatprep.mubr.bf16.mxu1 %v5437_v24  ;;  %4325 = vmatpush3.bf16.msra.mxu1 %v4567_v51  ;;  %v1923_v51 = vld [vmem:[#allocation2 + $0xa8] sm:$0xff] }
 0x125   : > { %4297 = vmatmul.mubr.bf16.gmra.mxu0 %v5309_v2  ;;  %4326 = vmatprep.subr.bf16.mxu1 %v4569_v22  ;;  %v4574_v2 = vld [vmem:[%s4666_s26 + $0x190] sm:$0xff]  }
 0x126   : > { %4300 = vmatprep.mubr.bf16.mxu0 %v5332_v13  ;;  %4369 = vmatpush3.bf16.msra.mxu0 %v4568_v44  ;;  %v1919_v13 = vld [vmem:[#allocation2 + $0x88] sm:$0xff]  ;;  %v1924_v44 = vld [vmem:[#allocation2 + $0xb0] sm:$0xff] }
 0x127   : > { %4370 = vmatprep.subr.bf16.mxu0 %v4570_v58  ;;  %v5525_v60 = vpack.c.bf16 %v1920_v35, %v1919_v13  ;;  %v1651_v13 = vld [vmem:[#allocation2 + $0xe7] sm:$0xff]  ;;  %v1652_v35 = vld [vmem:[#allocation2 + $0xef] sm:$0xff] }
 0x128   : > { %4327 = vmatpush3.bf16.msra.mxu1 %v4569_v22  ;;  %v1925_v22 = vld [vmem:[#allocation2 + $0xb8] sm:$0xff]  ;;  %v5549_v42 = vpack.c.bf16 %v1652_v35, %v1651_v13 }
 0x129   : > { %4328 = vmatprep.subr.bf16.mxu1 %v4571_v34  ;;  %v3030_v13 = vld [vmem:[#allocation2 + $0x51] sm:$0xff] }
 0x12a   : > { %4371 = vmatpush3.bf16.msra.mxu0 %v4570_v58  ;;  %v1926_v58 = vld [vmem:[#allocation2 + $0xc0] sm:$0xff] }
 0x12b   : > { %4257 = vmatmul.mubr.bf16.gmra.mxu1 %v5442_v20  ;;  %4372 = vmatprep.subr.bf16.mxu0 %v4572_v43 }
 0x12c   : > { %4260 = vmatprep.mubr.bf16.mxu1 %v5453_v3  ;;  %4329 = vmatpush3.bf16.msra.mxu1 %v4571_v34  ;;  %v4579_v34 = vld [vmem:[%s4666_s26 + $0x1f8] sm:$0xff]  }
 0x12d   : > { %4301 = vmatmul.mubr.bf16.gmra.mxu0 %v5367_v29  ;;  %4330 = vmatprep.subr.bf16.mxu1 %v4573_v11  ;;  %v4577_v29 = vld [vmem:[%s4666_s26 + $0x140] sm:$0xff]  }
 0x12e   : > { %4304 = vmatprep.mubr.bf16.mxu0 %v5374_v33  ;;  %4373 = vmatpush3.bf16.msra.mxu0 %v4572_v43  ;;  %v4578_v33 = vld [vmem:[%s4666_s26 + $0x180] sm:$0xff]   ;;  %v4580_v43 = vld [vmem:[%s4666_s26 + $0x238] sm:$0xff]  }
 0x12f   : > { %4374 = vmatprep.subr.bf16.mxu0 %v4574_v2 }
 0x130   : > { %4331 = vmatpush3.bf16.msra.mxu1 %v4573_v11  ;;  %v5537_v11 = vpack.c.bf16 %v1924_v44, %v1923_v51  ;;  %v3028_v44 = vld [vmem:[#allocation2 + $0x41] sm:$0xff] }
 0x131   : > { %4332 = vmatprep.subr.bf16.mxu1 %v4575_v46 }
 0x132   : > { %4375 = vmatpush3.bf16.msra.mxu0 %v4574_v2  ;;  %v5539_v2 = vpack.c.bf16 %v1926_v58, %v1925_v22  ;;  %v2749_v22 = vld [vmem:[#allocation2 + $0x48] sm:$0xff]  ;;  %v2750_v58 = vld [vmem:[#allocation2 + $0x50] sm:$0xff] }
 0x133   : > { %4261 = vmatmul.mubr.bf16.gmra.mxu1 %v5458_v15  ;;  %4376 = vmatprep.subr.bf16.mxu0 %v4576_v37 }
 0x134   : > { %4264 = vmatprep.mubr.bf16.mxu1 %v5469_v18  ;;  %4333 = vmatpush3.bf16.msra.mxu1 %v4575_v46  ;;  %v4582_v46 = vld [vmem:[%s4666_s26 + $0x230] sm:$0xff]  }
 0x135   : > { %4305 = vmatmul.mubr.bf16.gmra.mxu0 %v5525_v60  ;;  %4334 = vmatprep.subr.bf16.mxu1 %v4577_v29 }
 0x136   : > { %4308 = vmatprep.mubr.bf16.mxu0 %v5527_v63  ;;  %4377 = vmatpush3.bf16.msra.mxu0 %v4576_v37  ;;  %v2747_v37 = vld [vmem:[#allocation2 + $0x38] sm:$0xff] }
 0x137   : > { %4378 = vmatprep.subr.bf16.mxu0 %v4578_v33 }
 0x138   : > { %4335 = vmatpush3.bf16.msra.mxu1 %v4577_v29  ;;  %v2748_v29 = vld [vmem:[#allocation2 + $0x40] sm:$0xff] }
 0x139   : > { %4408 = vmatprep.subr.bf16.mxu1 %v4579_v34 }
 0x13a   : > { %4379 = vmatpush3.bf16.msra.mxu0 %v4578_v33  ;;  %v3027_v33 = vld [vmem:[#allocation2 + $0x39] sm:$0xff] }
 0x13b   : > { %4265 = vmatmul.mubr.bf16.gmra.mxu1 %v5474_v45  ;;  %4452 = vmatprep.subr.bf16.mxu0 %v4580_v43 }
 0x13c   : > { %4268 = vmatprep.mubr.bf16.mxu1 %v5482_v0 }
 0x13d   : > { %4309 = vmatmul.mubr.bf16.gmra.mxu0 %v5537_v11 }
 0x13e   : > { %4312 = vmatprep.mubr.bf16.mxu0 %v5539_v2 }
 0x143   : > { %4269 = vmatmul.mubr.bf16.gmra.mxu1 %v5486_v55 }
 0x144   : > { %4272 = vmatprep.mubr.bf16.mxu1 %v5494_v12 }
 0x145   : > { %4313 = vmatmul.mubr.bf16.gmra.mxu0 %v5338_v38  ;;  %v4581_v38 = vld [vmem:[%s4666_s26 + $0x1f0] sm:$0xff]  }
 0x146   : > { %4316 = vmatprep.mubr.bf16.mxu0 %v5356_v19  ;;  %v4583_v19 = vld [vmem:[%s4666_s26 + $0x1e8] sm:$0xff]  }
 0x14b   : > { %4273 = vmatmul.mubr.bf16.gmra.mxu1 %v5549_v42 }
 0x14c   : > { %4336 = vmatprep.mubr.bf16.mxu1 %v5396_v50  ;;  %v4584_v50 = vld [vmem:[%s4666_s26 + $0x228] sm:$0xff]  }
 0x14d   : > { %4317 = vmatmul.mubr.bf16.gmra.mxu0 %v1946_v59 }
 0x14e   : > { %4380 = vmatprep.mubr.bf16.mxu0 %v5398_v14  ;;  %v4585_v14 = vld [vmem:[%s4666_s26 + $0x1e0] sm:$0xff]  }
 0x153   : > { %4337 = vmatmul.mubr.bf16.vlgmr.msra.gmra.mxu1 %v5404_v4  ;;  %v4587_v4 = vld [vmem:[%s4666_s26 + $0x1d8] sm:$0xff]  }
 0x154   : > { %4409 = vmatpush3.bf16.msra.mxu1 %v4579_v34  ;;  %4340 = vmatprep.mubr.bf16.mxu1 %v5424_v61  ;;  %v4589_v61 = vld [vmem:[%s4666_s26 + $0x1d0] sm:$0xff]  }
 0x155   : > { %4381 = vmatmul.mubr.bf16.vlgmr.msra.gmra.mxu0 %v5421_v54  ;;  %4410 = vmatprep.subr.bf16.mxu1 %v4581_v38  ;;  %v4588_v54 = vld [vmem:[%s4666_s26 + $0x218] sm:$0xff]  }
 0x156   : > { %4453 = vmatpush3.bf16.msra.mxu0 %v4580_v43  ;;  %4384 = vmatprep.mubr.bf16.mxu0 %v5426_v56  ;;  %v4590_v56 = vld [vmem:[%s4666_s26 + $0x210] sm:$0xff]  }
 0x157   : > { %4454 = vmatprep.subr.bf16.mxu0 %v4582_v46  ;;  %v3029_v43 = vld [vmem:[#allocation2 + $0x49] sm:$0xff] }
 0x158   : > { %4411 = vmatpush3.bf16.msra.mxu1 %v4581_v38  ;;  %v3054_v38 = vpack.c.bf16 %v3028_v44, %v3027_v33  ;;  %v3035_v44 = vld [vmem:[#allocation2 + $0x79] sm:$0xff] }
 0x159   : > { %4412 = vmatprep.subr.bf16.mxu1 %v4583_v19 }
 0x15a   : > { %4455 = vmatpush3.bf16.msra.mxu0 %v4582_v46  ;;  %v2775_v46 = vpack.c.bf16 %v2750_v58, %v2749_v22  ;;  %v3036_v22 = vld [vmem:[#allocation2 + $0x81] sm:$0xff]  ;;  %v3037_v58 = vld [vmem:[#allocation2 + $0x89] sm:$0xff] }
 0x15b   : > { %4456 = vmatprep.subr.bf16.mxu0 %v4584_v50  ;;  %4341 = vmatmul.mubr.bf16.gmra.mxu1 %v5428_v5  ;;  %v4591_v5 = vld [vmem:[%s4666_s26 + $0x1c8] sm:$0xff]  }
 0x15c   : > { %4344 = vmatprep.mubr.bf16.mxu1 %v5440_v57  ;;  %4413 = vmatpush3.bf16.msra.mxu1 %v4583_v19  ;;  %v4593_v57 = vld [vmem:[%s4666_s26 + $0x1c0] sm:$0xff]  }
 0x15d   : > { %4385 = vmatmul.mubr.bf16.gmra.mxu0 %v5437_v24  ;;  %4414 = vmatprep.subr.bf16.mxu1 %v4585_v14  ;;  %v4592_v24 = vld [vmem:[%s4666_s26 + $0x208] sm:$0xff]  }
 0x15e   : > { %4388 = vmatprep.mubr.bf16.mxu0 %v5442_v20  ;;  %4457 = vmatpush3.bf16.msra.mxu0 %v4584_v50  ;;  %v4594_v20 = vld [vmem:[%s4666_s26 + $0x200] sm:$0xff]   ;;  %v3055_v50 = vpack.c.bf16 %v3030_v13, %v3029_v43  ;;  %v3038_v43 = vld [vmem:[#allocation2 + $0x91] sm:$0xff] }
 0x15f   : > { %4458 = vmatprep.subr.bf16.mxu0 %v4586_v26 }
 0x160   : > { %4415 = vmatpush3.bf16.msra.mxu1 %v4585_v14 }
 0x161   : > { %4416 = vmatprep.subr.bf16.mxu1 %v4587_v4 }
 0x162   : > { %4459 = vmatpush3.bf16.msra.mxu0 %v4586_v26 }
 0x163   : > { %4345 = vmatmul.mubr.bf16.gmra.mxu1 %v5444_v21  ;;  %4460 = vmatprep.subr.bf16.mxu0 %v4588_v54  ;;  %v3025_v21 = vld [vmem:[#allocation2 + $0x29] sm:$0xff] }
 0x164   : > { %4348 = vmatprep.mubr.bf16.mxu1 %v5456_v31  ;;  %4417 = vmatpush3.bf16.msra.mxu1 %v4587_v4  ;;  %v2745_v31 = vld [vmem:[#allocation2 + $0x28] sm:$0xff]  ;;  %v2751_v4 = vld [vmem:[#allocation2 + $0x58] sm:$0xff] }
 0x165   : > { %4389 = vmatmul.mubr.bf16.gmra.mxu0 %v5453_v3  ;;  %4418 = vmatprep.subr.bf16.mxu1 %v4589_v61  ;;  %v3026_v3 = vld [vmem:[#allocation2 + $0x31] sm:$0xff] }
 0x166   : > { %4392 = vmatprep.mubr.bf16.mxu0 %v5458_v15  ;;  %4461 = vmatpush3.bf16.msra.mxu0 %v4588_v54  ;;  %v2492_v15 = vld [vmem:[#allocation2 + $0xff] sm:$0xff] }
 0x167   : > { %4462 = vmatprep.subr.bf16.mxu0 %v4590_v56  ;;  %v2752_v54 = vld [vmem:[#allocation2 + $0x60] sm:$0xff] }
 0x168   : > { %4419 = vmatpush3.bf16.msra.mxu1 %v4589_v61  ;;  %v3031_v61 = vld [vmem:[#allocation2 + $0x59] sm:$0xff] }
 0x169   : > { %4420 = vmatprep.subr.bf16.mxu1 %v4591_v5 }
 0x16a   : > { %4463 = vmatpush3.bf16.msra.mxu0 %v4590_v56 }
 0x16b   : > { %4349 = vmatmul.mubr.bf16.gmra.mxu1 %v5460_v28  ;;  %4464 = vmatprep.subr.bf16.mxu0 %v4592_v24  ;;  %v2491_v28 = vld [vmem:[#allocation2 + $0xf7] sm:$0xff] }
 0x16c   : > { %4352 = vmatprep.mubr.bf16.mxu1 %v5472_v1  ;;  %4421 = vmatpush3.bf16.msra.mxu1 %v4591_v5  ;;  %v2212_v1 = vld [vmem:[#allocation2 + $0xf1] sm:$0xff]  ;;  %v3032_v5 = vld [vmem:[#allocation2 + $0x61] sm:$0xff] }
 0x16d   : > { %4393 = vmatmul.mubr.bf16.gmra.mxu0 %v5469_v18  ;;  %4422 = vmatprep.subr.bf16.mxu1 %v4593_v57 }
 0x16e   : > { %4396 = vmatprep.mubr.bf16.mxu0 %v5474_v45  ;;  %4465 = vmatpush3.bf16.msra.mxu0 %v4592_v24  ;;  %v2211_v45 = vld [vmem:[#allocation2 + $0xe9] sm:$0xff] }
 0x16f   : > { %4466 = vmatprep.subr.bf16.mxu0 %v4594_v20  ;;  %v5594_v18 = vpack.c.bf16 %v2212_v1, %v2211_v45  ;;  %v2753_v24 = vld [vmem:[#allocation2 + $0x68] sm:$0xff]  ;;  %v3034_v1 = vld [vmem:[#allocation2 + $0x71] sm:$0xff] }
 0x170   : > { %4423 = vmatpush3.bf16.msra.mxu1 %v4593_v57  ;;  %v2754_v57 = vld [vmem:[#allocation2 + $0x70] sm:$0xff] }
 0x171   : > { %v3033_v45 = vld [vmem:[#allocation2 + $0x69] sm:$0xff] }
 0x172   : > { %4467 = vmatpush3.bf16.msra.mxu0 %v4594_v20 }
 0x173   : > { %4353 = vmatmul.mubr.bf16.gmra.mxu1 %v5476_v52  ;;  %v2746_v52 = vld [vmem:[#allocation2 + $0x30] sm:$0xff] }
 0x174   : > { %4356 = vmatprep.mubr.bf16.mxu1 %v5484_v23  ;;  %v2773_v23 = vpack.c.bf16 %v2746_v52, %v2745_v31  ;;  %v3056_v52 = vpack.c.bf16 %v3032_v5, %v3031_v61 }
 0x175   : > { %4397 = vmatmul.mubr.bf16.gmra.mxu0 %v5482_v0  ;;  %v2506_v0 = vpack.c.bf16 %v2492_v15, %v2491_v28  ;;  %v2776_v15 = vpack.c.bf16 %v2752_v54, %v2751_v4  ;;  %v3059_v54 = vpack.c.bf16 %v3038_v43, %v3037_v58  ;;  %v3043_v58 = vld [vmem:[#allocation2 + $0xb9] sm:$0xff] }
 0x176   : > { %4400 = vmatprep.mubr.bf16.mxu0 %v5486_v55  ;;  %v3053_v55 = vpack.c.bf16 %v3026_v3, %v3025_v21  ;;  %v2777_v21 = vpack.c.bf16 %v2754_v57, %v2753_v24  ;;  %v3039_v24 = vld [vmem:[#allocation2 + $0x99] sm:$0xff]  ;;  %v3040_v57 = vld [vmem:[#allocation2 + $0xa1] sm:$0xff] }
 0x17b   : > { %4357 = vmatmul.mubr.bf16.gmra.mxu1 %v5488_v8 }
 0x17c   : > { %4360 = vmatprep.mubr.bf16.mxu1 %v5496_v6 }
 0x17d   : > { %4401 = vmatmul.mubr.bf16.gmra.mxu0 %v5494_v12 }
 0x17e   : > { %4404 = vmatprep.mubr.bf16.mxu0 %v5549_v42  ;;  %v2774_v42 = vpack.c.bf16 %v2748_v29, %v2747_v37  ;;  %v2755_v37 = vld [vmem:[#allocation2 + $0x78] sm:$0xff]  ;;  %v2756_v29 = vld [vmem:[#allocation2 + $0x80] sm:$0xff] }
 0x180   : > { %v5596_v8 = vpop.f32.mrf.mxu0 }
 0x181   : > { %v5599_v12 = vpop.f32.mrf.mxu1 }
 0x182   : > { %v5601_v6 = vpop.f32.mrf.mxu0 }
 0x183   : > { %4361 = vmatmul.mubr.bf16.gmra.mxu1 %v5594_v18  ;;  %v5603_v51 = vpop.f32.mrf.mxu1 }
 0x184   : > { %4424 = vmatprep.mubr.bf16.mxu1 %v2773_v23  ;;  %v5605_v34 = vpop.f32.mrf.mxu0 }
 0x185   : > { %4405 = vmatmul.mubr.bf16.gmra.mxu0 %v2506_v0  ;;  %v5607_v35 = vpop.f32.mrf.mxu1  ;;  %v3057_v0 = vpack.c.bf16 %v3034_v1, %v3033_v45  ;;  %v3041_v1 = vld [vmem:[#allocation2 + $0xa9] sm:$0xff] }
 0x186   : > { %4468 = vmatprep.mubr.bf16.mxu0 %v3053_v55  ;;  %v5609_v59 = vpop.f32.mrf.mxu0 }
 0x187   : > { %v5611_v19 = vpop.f32.mrf.mxu1 }
 0x189   : > { %v5613_v14 = vpop.f32.mrf.mxu0 }
 0x18b   : > { %4425 = vmatmul.mubr.bf16.vlgmr.msra.gmra.mxu1 %v2774_v42  ;;  %v5615_v26 = vpop.f32.mrf.mxu0 }
 0x18c   : > { %4428 = vmatprep.mubr.bf16.mxu1 %v2775_v46  ;;  %v3058_v46 = vpack.c.bf16 %v3036_v22, %v3035_v44 }
 0x18d   : > { %4469 = vmatmul.mubr.bf16.vlgmr.msra.gmra.mxu0 %v3054_v38  ;;  %v5617_v56 = vpop.f32.mrf.mxu1  ;;  %v5619_v20 = vpop.f32.mrf.mxu0  ;;  %v2778_v38 = vpack.c.bf16 %v2756_v29, %v2755_v37 }
 0x18e   : > { %4472 = vmatprep.mubr.bf16.mxu0 %v3055_v50 }
 0x18f   : > { %v5621_v28 = vpop.f32.mrf.mxu1  ;;  %v5623_v31 = vpop.f32.mrf.mxu0 }
 0x191   : > { %v5625_v3 = vpop.f32.mrf.mxu1 }
 0x193   : > { %v5627_v23 = vpop.f32.mrf.mxu0  ;;  %4429 = vmatmul.mubr.bf16.gmra.mxu1 %v2776_v15  ;;  %v5629_v55 = vpop.f32.mrf.mxu1  ;;  %v3042_v15 = vld [vmem:[#allocation2 + $0xb1] sm:$0xff] }
 0x194   : > { %4432 = vmatprep.mubr.bf16.mxu1 %v2777_v21  ;;  %v3060_v21 = vpack.c.bf16 %v3040_v57, %v3039_v24  ;;  %v3061_v37 = vpack.c.bf16 %v3042_v15, %v3041_v1  ;;  %v3045_v15 = vld [vmem:[#allocation2 + $0xc9] sm:$0xff] }
 0x195   : > { %4473 = vmatmul.mubr.bf16.gmra.mxu0 %v3056_v52  ;;  %v5631_v33 = vpop.f32.mrf.mxu0 }
 0x196   : > { %4476 = vmatprep.mubr.bf16.mxu0 %v3057_v0 }
 0x197   : > { %v5633_v13 = vpop.f32.mrf.mxu1  ;;  %v5635_v42 = vpop.f32.mrf.mxu0 }
 0x199   : > { %v5637_v50 = vpop.f32.mrf.mxu1  ;;  %v5639_v4 = vpop.f32.mrf.mxu0 }
 0x19b   : > { %4433 = vmatmul.mubr.bf16.gmra.mxu1 %v2778_v38  ;;  %v5644_v5 = vpop.f32.mrf.mxu1  ;;  %v3044_v38 = vld [vmem:[#allocation2 + $0xc1] sm:$0xff] }
 0x19c   : > { %4436 = vmatprep.mubr.bf16.mxu1 %v5525_v60 }
 0x19d   : > { %v5641_v61 = vpop.f32.mrf.mxu0  ;;  %4477 = vmatmul.mubr.bf16.gmra.mxu0 %v3058_v46  ;;  %v5650_v0 = vpop.f32.mrf.mxu1  ;;  %v2765_v46 = vld [vmem:[#allocation2 + $0xc8] sm:$0xff] }
 0x19e   : > { %4480 = vmatprep.mubr.bf16.mxu0 %v3059_v54  ;;  %v2766_v54 = vld [vmem:[#allocation2 + $0xd0] sm:$0xff] }
 0x19f   : > { %v5646_v45 = vpop.f32.mrf.mxu0 }
 0x1a1   : > { %v5648_v52 = vpop.f32.mrf.mxu0 }
 0x1a3   : > { %v5652_v29 = vpop.f32.mrf.mxu0  ;;  %v4162_v44 = vpop.f32.mrf.mxu1  ;;  %4437 = vmatmul.mubr.bf16.gmra.mxu1 %v5527_v63 }
 0x1a4   : > { %v1243_v60 = vadd.f32 %v4162_v44, %v5596_v8  ;;  %4440 = vmatprep.mubr.bf16.mxu1 %v5537_v11  ;;  %v3062_v11 = vpack.c.bf16 %v3044_v38, %v3043_v58  ;;  %v2783_v44 = vpack.c.bf16 %v2766_v54, %v2765_v46  ;;  %v2768_v58 = vld [vmem:[#allocation2 + $0xe0] sm:$0xff]  ;;  %v2769_v54 = vld [vmem:[#allocation2 + $0xe8] sm:$0xff] }
 0x1a5   : > { %v4206_v22 = vpop.f32.mrf.mxu0  ;;  %4481 = vmatmul.mubr.bf16.gmra.mxu0 %v3060_v21  ;;  %v1234_v43 = vpop.f32.mrf.mxu1  ;;  %v3048_v46 = vld [vmem:[#allocation2 + $0xe1] sm:$0xff] }
 0x1a6   : > { %4484 = vmatprep.mubr.bf16.mxu0 %v3061_v37  ;;  %v5657_v24 = vadd.f32 %v4206_v22, %v1243_v60  ;;  %v1235_v57 = vadd.f32 %v1234_v43, %v5601_v6  ;;  %v3063_v37 = vpack.c.bf16 %v3046_v7, %v3045_v15  ;;  %v3047_v7 = vld [vmem:[#allocation2 + $0xd9] sm:$0xff] }
 0x1a7   : > { %v1486_v1 = vpop.f32.mrf.mxu0  ;;  %v4163_v63 = vpop.f32.mrf.mxu1 }
 0x1a8   : > { %v5660_v41 = vadd.f32 %v1486_v1, %v1235_v57  ;;  %v1246_v8 = vadd.f32 %v4163_v63, %v5605_v34  ;;  %v2767_v34 = vld [vmem:[#allocation2 + $0xd8] sm:$0xff] }
 0x1a9   : > { %v4207_v21 = vpop.f32.mrf.mxu0  ;;  %v1237_v25 = vpop.f32.mrf.mxu1  ;;  %v2784_v15 = vpack.c.bf16 %v2768_v58, %v2767_v34  ;;  %v3051_v34 = vld [vmem:[#allocation2 + $0xf9] sm:$0xff] }
 0x1aa   : > { %v5663_v17 = vadd.f32 %v4207_v21, %v1246_v8  ;;  %v1238_v60 = vadd.f32 %v1237_v25, %v5609_v59  ;;  %v3064_v8 = vpack.c.bf16 %v3048_v46, %v3047_v7  ;;  %v2785_v21 = vpack.c.bf16 %v5417_v32, %v2769_v54  ;;  %v3052_v32 = vld [vmem:[#allocation2 + $0x101] sm:$0xff] }
 0x1ab   : > { %v1489_v22 = vpop.f32.mrf.mxu0  ;;  %v4166_v30 = vpop.f32.mrf.mxu1  ;;  %4441 = vmatmul.mubr.bf16.gmra.mxu1 %v5539_v2  ;;  %v4600_v46 = vld [vmem:[#allocation2 + $0x8] sm:$0xff] }
 0x1ac   : > { %v5667_v6 = vadd.f32 %v1489_v22, %v1238_v60  ;;  %v1259_v43 = vadd.f32 %v4166_v30, %v5613_v14  ;;  %4444 = vmatprep.mubr.bf16.mxu1 %v2783_v44  ;;  %v2786_v54 = vpack.c.bf16 %v4600_v46, %v4600_v46 }
 0x1ad   : > { %v4210_v57 = vpop.f32.mrf.mxu0  ;;  %4485 = vmatmul.mubr.bf16.gmra.mxu0 %v3062_v11  ;;  %v1250_v38 = vpop.f32.mrf.mxu1 }
 0x1ae   : > { %4488 = vmatprep.mubr.bf16.mxu0 %v3063_v37  ;;  %v5670_v1 = vadd.f32 %v4210_v57, %v1259_v43  ;;  %v1251_v25 = vadd.f32 %v1250_v38, %v5615_v26 }
 0x1af   : > { %v1502_v59 = vpop.f32.mrf.mxu0  ;;  %v4167_v2 = vpop.f32.mrf.mxu1 }
 0x1b0   : > { %v5673_v63 = vadd.f32 %v1502_v59, %v1251_v25  ;;  %v1262_v30 = vadd.f32 %v4167_v2, %v5619_v20  ;;  %v3066_v2 = vpack.c.bf16 %v3052_v32, %v3051_v34 }
 0x1b1   : > { %v4211_v14 = vpop.f32.mrf.mxu0  ;;  %v1253_v11 = vpop.f32.mrf.mxu1 }
 0x1b2   : > { %v5677_v44 = vadd.f32 %v4211_v14, %v1262_v30  ;;  %v1254_v37 = vadd.f32 %v1253_v11, %v5623_v31 }
 0x1b3   : > { %v1505_v60 = vpop.f32.mrf.mxu0  ;;  %v4170_v22 = vpop.f32.mrf.mxu1  ;;  %4445 = vmatmul.mubr.bf16.gmra.mxu1 %v2784_v15 }
 0x1b4   : > { %v5680_v26 = vadd.f32 %v1505_v60, %v1254_v37  ;;  %v1275_v43 = vadd.f32 %v4170_v22, %v5627_v23  ;;  %4448 = vmatprep.mubr.bf16.mxu1 %v2785_v21 }
 0x1b5   : > { %v4214_v57 = vpop.f32.mrf.mxu0  ;;  %4489 = vmatmul.mubr.bf16.gmra.mxu0 %v3064_v8  ;;  %v1266_v20 = vpop.f32.mrf.mxu1 }
 0x1b6   : > { %4492 = vmatprep.mubr.bf16.mxu0 %v5594_v18  ;;  %v5684_v58 = vadd.f32 %v4214_v57, %v1275_v43  ;;  %v1267_v38 = vadd.f32 %v1266_v20, %v5631_v33 }
 0x1b7   : > { %v1518_v31 = vpop.f32.mrf.mxu0  ;;  %v4171_v7 = vpop.f32.mrf.mxu1 }
 0x1b8   : > { %v5687_v25 = vadd.f32 %v1518_v31, %v1267_v38  ;;  %v1278_v23 = vadd.f32 %v4171_v7, %v5635_v42 }
 0x1b9   : > { %v4215_v59 = vpop.f32.mrf.mxu0  ;;  %v1269_v15 = vpop.f32.mrf.mxu1 }
 0x1ba   : > { %v5690_v30 = vadd.f32 %v4215_v59, %v1278_v23  ;;  %v1270_v18 = vadd.f32 %v1269_v15, %v5639_v4 }
 0x1bb   : > { %v1521_v14 = vpop.f32.mrf.mxu0  ;;  %v4174_v8 = vpop.f32.mrf.mxu1  ;;  %4449 = vmatmul.mubr.bf16.gmra.mxu1 %v2786_v54 }
 0x1bc   : > { %v5693_v21 = vadd.f32 %v1521_v14, %v1270_v18  ;;  %v1291_v33 = vadd.f32 %v4174_v8, %v5641_v61 }
 0x1bd   : > { %v4218_v11 = vpop.f32.mrf.mxu0  ;;  %4493 = vmatmul.mubr.bf16.gmra.mxu0 %v3066_v2  ;;  %v1282_v37 = vpop.f32.mrf.mxu1 }
 0x1be   : > { %v5696_v60 = vadd.f32 %v4218_v11, %v1291_v33  ;;  %v1283_v42 = vadd.f32 %v1282_v37, %v5646_v45 }
 0x1bf   : > { %v1534_v22 = vpop.f32.mrf.mxu0  ;;  %v4175_v43 = vpop.f32.mrf.mxu1 }
 0x1c0   : > { %v5699_v57 = vadd.f32 %v1534_v22, %v1283_v42  ;;  %v1294_v4 = vadd.f32 %v4175_v43, %v5648_v52 }
 0x1c1   : > { %v4219_v20 = vpop.f32.mrf.mxu0  ;;  %v1285_v34 = vpop.f32.mrf.mxu1 }
 0x1c2   : > { %v5702_v32 = vadd.f32 %v4219_v20, %v1294_v4  ;;  %v1286_v38 = vadd.f32 %v1285_v34, %v5652_v29 }
 0x1c3   : > { %v1537_v61 = vpop.f32.mrf.mxu0  ;;  %v4178_v31 = vpop.f32.mrf.mxu1 }
 0x1c4   : > { %v5705_v7 = vadd.f32 %v1537_v61, %v1286_v38  ;;  %v1307_v46 = vadd.f32 %v4178_v31, %v5599_v12 }
 0x1c5   : > { %v4222_v54 = vpop.f32.mrf.mxu0  ;;  %v1298_v45 = vpop.f32.mrf.mxu1 }
 0x1c6   : > { %v5708_v23 = vadd.f32 %v4222_v54, %v1307_v46  ;;  %v1299_v59 = vadd.f32 %v1298_v45, %v5603_v51 }
 0x1c7   : > { %v1550_v2 = vpop.f32.mrf.mxu0  ;;  %v4179_v52 = vpop.f32.mrf.mxu1 }
 0x1c8   : > { %v5711_v15 = vadd.f32 %v1550_v2, %v1299_v59  ;;  %v1310_v18 = vadd.f32 %v4179_v52, %v5607_v35 }
 0x1c9   : > { %v4223_v14 = vpop.f32.mrf.mxu0  ;;  %v1301_v29 = vpop.f32.mrf.mxu1 }
 0x1ca   : > { %v5714_v8 = vadd.f32 %v4223_v14, %v1310_v18  ;;  %v1302_v33 = vadd.f32 %v1301_v29, %v5611_v19 }
 0x1cb   : > { %v1553_v11 = vpop.f32.mrf.mxu0  ;;  %v4182_v12 = vpop.f32.mrf.mxu1 }
 0x1cc   : > { %v5717_v37 = vadd.f32 %v1553_v11, %v1302_v33  ;;  %v1323_v42 = vadd.f32 %v4182_v12, %v5617_v56 }
 0x1cd   : > { %v4226_v22 = vpop.f32.mrf.mxu0  ;;  %v1314_v51 = vpop.f32.mrf.mxu1 }
 0x1ce   : > { %v5720_v43 = vadd.f32 %v4226_v22, %v1323_v42  ;;  %v1315_v4 = vadd.f32 %v1314_v51, %v5621_v28 }
 0x1cf   : > { %v1566_v20 = vpop.f32.mrf.mxu0  ;;  %v4183_v35 = vpop.f32.mrf.mxu1 }
 0x1d0   : > { %v5723_v34 = vadd.f32 %v1566_v20, %v1315_v4  ;;  %v1326_v38 = vadd.f32 %v4183_v35, %v5625_v3 }
 0x1d1   : > { %v4227_v61 = vpop.f32.mrf.mxu0  ;;  %v1317_v19 = vpop.f32.mrf.mxu1 }
 0x1d2   : > { %v5726_v31 = vadd.f32 %v4227_v61, %v1326_v38  ;;  %v1318_v46 = vadd.f32 %v1317_v19, %v5629_v55 }
 0x1d3   : > { %v1569_v54 = vpop.f32.mrf.mxu0  ;;  %v4186_v56 = vpop.f32.mrf.mxu1 }
 0x1d4   : > { %v5729_v45 = vadd.f32 %v1569_v54, %v1318_v46  ;;  %v1339_v59 = vadd.f32 %v4186_v56, %v5633_v13 }
 0x1d5   : > { %v4230_v2 = vpop.f32.mrf.mxu0  ;;  %v1330_v28 = vpop.f32.mrf.mxu1 }
 0x1d6   : > { %v5732_v52 = vadd.f32 %v4230_v2, %v1339_v59  ;;  %v1331_v18 = vadd.f32 %v1330_v28, %v5637_v50 }
 0x1d7   : > { %v1582_v14 = vpop.f32.mrf.mxu0  ;;  %v4187_v3 = vpop.f32.mrf.mxu1 }
 0x1d8   : > { %v5735_v29 = vadd.f32 %v1582_v14, %v1331_v18  ;;  %v1342_v33 = vadd.f32 %v4187_v3, %v5644_v5 }
 0x1d9   : > { %v4231_v11 = vpop.f32.mrf.mxu0  ;;  %v1333_v55 = vpop.f32.mrf.mxu1 }
 0x1da   : > { %v5738_v12 = vadd.f32 %v4231_v11, %v1342_v33  ;;  %v1334_v42 = vadd.f32 %v1333_v55, %v5650_v0 }
 0x1db   : > { %v1585_v22 = vpop.f32.mrf.mxu0  ;;  %v4250_v13 = vpop.f32.mrf.mxu1 }
 0x1dc   : > { %v5741_v51 = vadd.f32 %v1585_v22, %v1334_v42  ;;  %v1879_v4 = vadd.f32 %v4250_v13, %v5657_v24 }
 0x1dd   : > { %v4294_v20 = vpop.f32.mrf.mxu0  ;;  %v1766_v50 = vpop.f32.mrf.mxu1 }
 0x1de   : > { %v5744_v35 = vadd.f32 %v4294_v20, %v1879_v4  ;;  %v1877_v38 = vadd.f32 %v1766_v50, %v5660_v41 }
 0x1df   : > { %v2046_v61 = vpop.f32.mrf.mxu0  ;;  %v4251_v5 = vpop.f32.mrf.mxu1 }
 0x1e0   : > { %v5747_v19 = vadd.f32 %v2046_v61, %v1877_v38  ;;  %v1880_v46 = vadd.f32 %v4251_v5, %v5663_v17 }
 0x1e1   : > { %v4295_v54 = vpop.f32.mrf.mxu0  ;;  %v1769_v0 = vpop.f32.mrf.mxu1 }
 0x1e2   : > { %v5750_v56 = vadd.f32 %v4295_v54, %v1880_v46  ;;  %v1878_v59 = vadd.f32 %v1769_v0, %v5667_v6 }
 0x1e3   : > { %v2049_v2 = vpop.f32.mrf.mxu0  ;;  %v4254_v24 = vpop.f32.mrf.mxu1 }
 0x1e4   : > { %v5753_v28 = vadd.f32 %v2049_v2, %v1878_v59  ;;  %v1883_v18 = vadd.f32 %v4254_v24, %v5670_v1 }
 0x1e5   : > { %v4298_v14 = vpop.f32.mrf.mxu0  ;;  %v1782_v41 = vpop.f32.mrf.mxu1 }
 0x1e6   : > { %v5756_v3 = vadd.f32 %v4298_v14, %v1883_v18  ;;  %v1881_v33 = vadd.f32 %v1782_v41, %v5673_v63 }
 0x1e7   : > { %v2062_v11 = vpop.f32.mrf.mxu0  ;;  %v4255_v17 = vpop.f32.mrf.mxu1 }
 0x1e8   : > { %v5759_v55 = vadd.f32 %v2062_v11, %v1881_v33  ;;  %v1884_v42 = vadd.f32 %v4255_v17, %v5677_v44 }
 0x1e9   : > { %v4299_v22 = vpop.f32.mrf.mxu0  ;;  %v1785_v6 = vpop.f32.mrf.mxu1 }
 0x1ea   : > { %v5762_v13 = vadd.f32 %v4299_v22, %v1884_v42  ;;  %v1882_v4 = vadd.f32 %v1785_v6, %v5680_v26 }
 0x1eb   : > { %v2065_v20 = vpop.f32.mrf.mxu0  ;;  %v4258_v1 = vpop.f32.mrf.mxu1 }
 0x1ec   : > { %v5765_v50 = vadd.f32 %v2065_v20, %v1882_v4  ;;  %v1887_v38 = vadd.f32 %v4258_v1, %v5684_v58 }
 0x1ed   : > { %v4302_v61 = vpop.f32.mrf.mxu0  ;;  %v1798_v63 = vpop.f32.mrf.mxu1 }
 0x1ee   : > { %v5768_v5 = vadd.f32 %v4302_v61, %v1887_v38  ;;  %v1885_v46 = vadd.f32 %v1798_v63, %v5687_v25 }
 0x1ef   : > { %v2078_v54 = vpop.f32.mrf.mxu0  ;;  %v4259_v44 = vpop.f32.mrf.mxu1 }
 0x1f0   : > { %v5771_v0 = vadd.f32 %v2078_v54, %v1885_v46  ;;  %v1888_v59 = vadd.f32 %v4259_v44, %v5690_v30 }
 0x1f1   : > { %v4303_v2 = vpop.f32.mrf.mxu0  ;;  %v1801_v26 = vpop.f32.mrf.mxu1 }
 0x1f2   : > { %v5774_v24 = vadd.f32 %v4303_v2, %v1888_v59  ;;  %v1886_v18 = vadd.f32 %v1801_v26, %v5693_v21 }
 0x1f3   : > { %v2081_v14 = vpop.f32.mrf.mxu0  ;;  %v4262_v58 = vpop.f32.mrf.mxu1 }
 0x1f4   : > { %v5777_v41 = vadd.f32 %v2081_v14, %v1886_v18  ;;  %v1891_v33 = vadd.f32 %v4262_v58, %v5696_v60 }
 0x1f5   : > { %v4306_v11 = vpop.f32.mrf.mxu0  ;;  %v1814_v25 = vpop.f32.mrf.mxu1 }
 0x1f6   : > { %v5780_v17 = vadd.f32 %v4306_v11, %v1891_v33  ;;  %v1889_v42 = vadd.f32 %v1814_v25, %v5699_v57 }
 0x1f7   : > { %v2094_v22 = vpop.f32.mrf.mxu0  ;;  %v4263_v30 = vpop.f32.mrf.mxu1 }
 0x1f8   : > { %v5783_v6 = vadd.f32 %v2094_v22, %v1889_v42  ;;  %v1892_v4 = vadd.f32 %v4263_v30, %v5702_v32 }
 0x1f9   : > { %v4307_v20 = vpop.f32.mrf.mxu0  ;;  %v1817_v21 = vpop.f32.mrf.mxu1 }
 0x1fa   : > { %v5786_v1 = vadd.f32 %v4307_v20, %v1892_v4  ;;  %v1890_v38 = vadd.f32 %v1817_v21, %v5705_v7 }
 0x1fb   : > { %v2097_v61 = vpop.f32.mrf.mxu0  ;;  %v4266_v60 = vpop.f32.mrf.mxu1 }
 0x1fc   : > { %v5789_v63 = vadd.f32 %v2097_v61, %v1890_v38  ;;  %v1895_v46 = vadd.f32 %v4266_v60, %v5708_v23 }
 0x1fd   : > { %v4310_v54 = vpop.f32.mrf.mxu0  ;;  %v1830_v57 = vpop.f32.mrf.mxu1 }
 0x1fe   : > { %6447 = vst [vmem:[#allocation24_spill] sm:$0xff] %v5789_v63  ;;  %v5792_v44 = vadd.f32 %v4310_v54, %v1895_v46  ;;  %v1893_v59 = vadd.f32 %v1830_v57, %v5711_v15 }
 0x1ff   : > { %v2110_v2 = vpop.f32.mrf.mxu0  ;;  %v4267_v32 = vpop.f32.mrf.mxu1 }
 0x200   : > { %6448 = vst [vmem:[#allocation25_spill] sm:$0xff] %v5792_v44  ;;  %v5795_v26 = vadd.f32 %v2110_v2, %v1893_v59  ;;  %v1896_v18 = vadd.f32 %v4267_v32, %v5714_v8 }
 0x201   : > { %v4311_v14 = vpop.f32.mrf.mxu0  ;;  %v1833_v7 = vpop.f32.mrf.mxu1 }
 0x202   : > { %6449 = vst [vmem:[#allocation26_spill] sm:$0xff] %v5795_v26  ;;  %v5798_v58 = vadd.f32 %v4311_v14, %v1896_v18  ;;  %v1894_v33 = vadd.f32 %v1833_v7, %v5717_v37 }
 0x203   : > { %v2113_v11 = vpop.f32.mrf.mxu0  ;;  %v4270_v23 = vpop.f32.mrf.mxu1 }
 0x204   : > { %6450 = vst [vmem:[#allocation27_spill] sm:$0xff] %v5798_v58  ;;  %v5801_v25 = vadd.f32 %v2113_v11, %v1894_v33  ;;  %v1899_v42 = vadd.f32 %v4270_v23, %v5720_v43 }
 0x205   : > { %v4314_v22 = vpop.f32.mrf.mxu0  ;;  %v1846_v15 = vpop.f32.mrf.mxu1 }
 0x206   : > { %6451 = vst [vmem:[#allocation28_spill] sm:$0xff] %v5801_v25  ;;  %v5804_v30 = vadd.f32 %v4314_v22, %v1899_v42  ;;  %v1897_v4 = vadd.f32 %v1846_v15, %v5723_v34 }
 0x207   : > { %v2126_v20 = vpop.f32.mrf.mxu0  ;;  %v4271_v8 = vpop.f32.mrf.mxu1 }
 0x208   : > { %6452 = vst [vmem:[#allocation29_spill] sm:$0xff] %v5804_v30  ;;  %v5807_v21 = vadd.f32 %v2126_v20, %v1897_v4  ;;  %v1900_v38 = vadd.f32 %v4271_v8, %v5726_v31 }
 0x209   : > { %v4315_v61 = vpop.f32.mrf.mxu0  ;;  %v1849_v37 = vpop.f32.mrf.mxu1 }
 0x20a   : > { %6453 = vst [vmem:[#allocation30_spill] sm:$0xff] %v5807_v21  ;;  %v5810_v60 = vadd.f32 %v4315_v61, %v1900_v38  ;;  %v1898_v46 = vadd.f32 %v1849_v37, %v5729_v45 }
 0x20b   : > { %v2129_v54 = vpop.f32.mrf.mxu0  ;;  %v4274_v43 = vpop.f32.mrf.mxu1 }
 0x20c   : > { %6454 = vst [vmem:[#allocation31_spill] sm:$0xff] %v5810_v60  ;;  %v5813_v57 = vadd.f32 %v2129_v54, %v1898_v46  ;;  %v1903_v59 = vadd.f32 %v4274_v43, %v5732_v52 }
 0x20d   : > { %v4318_v2 = vpop.f32.mrf.mxu0  ;;  %v1862_v34 = vpop.f32.mrf.mxu1 }
 0x20e   : > { %6455 = vst [vmem:[#allocation32_spill] sm:$0xff] %v5813_v57  ;;  %v5816_v32 = vadd.f32 %v4318_v2, %v1903_v59  ;;  %v1901_v18 = vadd.f32 %v1862_v34, %v5735_v29 }
 0x20f   : > { %v2142_v14 = vpop.f32.mrf.mxu0  ;;  %v4275_v31 = vpop.f32.mrf.mxu1 }
 0x210   : > { %6456 = vst [vmem:[#allocation33_spill] sm:$0xff] %v5816_v32  ;;  %v5819_v7 = vadd.f32 %v2142_v14, %v1901_v18  ;;  %v1904_v33 = vadd.f32 %v4275_v31, %v5738_v12 }
 0x211   : > { %v4319_v11 = vpop.f32.mrf.mxu0  ;;  %v1865_v45 = vpop.f32.mrf.mxu1 }
 0x212   : > { %6457 = vst [vmem:[#allocation34_spill] sm:$0xff] %v5819_v7  ;;  %v5822_v23 = vadd.f32 %v4319_v11, %v1904_v33  ;;  %v1902_v42 = vadd.f32 %v1865_v45, %v5741_v51 }
 0x213   : > { %v2145_v22 = vpop.f32.mrf.mxu0  ;;  %v4338_v52 = vpop.f32.mrf.mxu1 }
 0x214   : > { %6458 = vst [vmem:[#allocation35_spill] sm:$0xff] %v5822_v23  ;;  %v5825_v15 = vadd.f32 %v2145_v22, %v1902_v42 }
 0x215   : > { %v5827_v4 = vpop.f32.mrf.mxu0  ;;  %v2326_v20 = vpop.f32.mrf.mxu1 }
 0x216   : > { %6459 = vst [vmem:[#allocation36_spill] sm:$0xff] %v5825_v15 }
 0x217   : > { %v2606_v29 = vpop.f32.mrf.mxu0  ;;  %v4339_v8 = vpop.f32.mrf.mxu1 }
 0x219   : > { %v5829_v38 = vpop.f32.mrf.mxu0  ;;  %v2329_v61 = vpop.f32.mrf.mxu1 }
 0x21b   : > { %v2609_v37 = vpop.f32.mrf.mxu0  ;;  %v5831_v12 = vpop.f32.mrf.mxu1 }
 0x21d   : > { %v5833_v46 = vpop.f32.mrf.mxu0  ;;  %v2342_v54 = vpop.f32.mrf.mxu1 }
 0x21f   : > { %v5835_v43 = vpop.f32.mrf.mxu0  ;;  %v5837_v51 = vpop.f32.mrf.mxu1 }
 0x221   : > { %v5839_v59 = vpop.f32.mrf.mxu0  ;;  %v5841_v2 = vpop.f32.mrf.mxu1 }
 0x223   : > { %v5843_v34 = vpop.f32.mrf.mxu0  ;;  %v5845_v18 = vpop.f32.mrf.mxu1 }
 0x225   : > { %v5847_v14 = vpop.f32.mrf.mxu0  ;;  %v5849_v31 = vpop.f32.mrf.mxu1 }
 0x227   : > { %v5851_v33 = vpop.f32.mrf.mxu0  ;;  %v5853_v11 = vpop.f32.mrf.mxu1 }
 0x229   : > { %v5855_v45 = vpop.f32.mrf.mxu0  ;;  %v5857_v42 = vpop.f32.mrf.mxu1 }
 0x22b   : > { %v5859_v22 = vpop.f32.mrf.mxu0  ;;  %v5861_v15 = vpop.f32.mrf.mxu1 }
 0x22d   : > { %v5863_v23 = vpop.f32.mrf.mxu0  ;;  %v5865_v32 = vpop.f32.mrf.mxu1 }
 0x22e   : > { %6460 = vst [vmem:[#allocation37_spill] sm:$0xff] %v5863_v23 }
 0x22f   : > { %v5867_v7 = vpop.f32.mrf.mxu0  ;;  %v5869_v57 = vpop.f32.mrf.mxu1 }
 0x231   : > { %v5871_v60 = vpop.f32.mrf.mxu0  ;;  %v5873_v30 = vpop.f32.mrf.mxu1 }
 0x232   : > { %6461 = vst [vmem:[#allocation38_spill] sm:$0xff] %v5871_v60  ;;  %6462 = vst [vmem:[#allocation39_spill] sm:$0xff] %v5873_v30 }
 0x233   : > { %v5875_v21 = vpop.f32.mrf.mxu0  ;;  %v5877_v25 = vpop.f32.mrf.mxu1 }
 0x234   : > { %6463 = vst [vmem:[#allocation40_spill] sm:$0xff] %v5875_v21  ;;  %6464 = vst [vmem:[#allocation41_spill] sm:$0xff] %v5877_v25 }
 0x235   : > { %v5879_v58 = vpop.f32.mrf.mxu0  ;;  %v5881_v48 = vpop.f32.mrf.mxu1 }
 0x236   : > { %6465 = vst [vmem:[#allocation42_spill] sm:$0xff] %v5879_v58  ;;  %6466 = vst [vmem:[#allocation43_spill] sm:$0xff] %v5881_v48 }
 0x237   : > { %v5883_v44 = vpop.f32.mrf.mxu0  ;;  %v5885_v10 = vpop.f32.mrf.mxu1 }
 0x238   : > { %6467 = vst [vmem:[#allocation44_spill] sm:$0xff] %v5883_v44  ;;  %6468 = vst [vmem:[#allocation45_spill] sm:$0xff] %v5885_v10 }
 0x239   : > { %v5887_v26 = vpop.f32.mrf.mxu0  ;;  %v5889_v53 = vpop.f32.mrf.mxu1 }
 0x23a   : > { %6469 = vst [vmem:[#allocation46_spill] sm:$0xff] %v5887_v26  ;;  %6470 = vst [vmem:[#allocation47_spill] sm:$0xff] %v5889_v53 }
 0x23b   : > { %v5891_v23 = vpop.f32.mrf.mxu0  ;;  %v5893_v60 = vpop.f32.mrf.mxu1 }
 0x23c   : > { %6471 = vst [vmem:[#allocation48_spill] sm:$0xff] %v5891_v23  ;;  %6472 = vst [vmem:[#allocation49_spill] sm:$0xff] %v5893_v60 }
 0x23d   : > { %v5895_v27 = vpop.f32.mrf.mxu0  ;;  %v5897_v21 = vpop.f32.mrf.mxu1 }
 0x23e   : > { %6473 = vst [vmem:[#allocation50_spill] sm:$0xff] %v5895_v27  ;;  %6474 = vst [vmem:[#allocation51_spill] sm:$0xff] %v5897_v21 }
 0x23f   : > { %v5899_v25 = vpop.f32.mrf.mxu0  ;;  %v5901_v58 = vpop.f32.mrf.mxu1 }
 0x240   : > { %6475 = vst [vmem:[#allocation52_spill] sm:$0xff] %v5899_v25  ;;  %6476 = vst [vmem:[#allocation53_spill] sm:$0xff] %v5901_v58  ;;  %v2437_v25 = vadd.f32 %v2326_v20, %v5747_v19 }
 0x241   : > { %v5903_v48 = vpop.f32.mrf.mxu0  ;;  %v5905_v44 = vpop.f32.mrf.mxu1 }
 0x242   : > { %6477 = vst [vmem:[#allocation54_spill] sm:$0xff] %v5903_v48  ;;  %6478 = vst [vmem:[#allocation55_spill] sm:$0xff] %v5905_v44  ;;  %v2439_v48 = vadd.f32 %v4338_v52, %v5744_v35  ;;  %v2441_v35 = vadd.f32 %v2342_v54, %v5759_v55  ;;  %v2447_v54 = vadd.f32 %v5845_v18, %v5768_v5 }
 0x243   : > { %v5907_v10 = vpop.f32.mrf.mxu0  ;;  %v5909_v26 = vpop.f32.mrf.mxu1 }
 0x244   : > { %6479 = vst [vmem:[#allocation56_spill] sm:$0xff] %v5907_v10  ;;  %6480 = vst [vmem:[#allocation57_spill] sm:$0xff] %v5909_v26  ;;  %v2717_v26 = vadd.f32 %v2606_v29, %v2437_v25  ;;  %v2443_v25 = vadd.f32 %v5831_v12, %v5756_v3 }
 0x245   : > { %v5911_v53 = vpop.f32.mrf.mxu0  ;;  %v5913_v23 = vpop.f32.mrf.mxu1 }
 0x246   : > { %6481 = vst [vmem:[#allocation58_spill] sm:$0xff] %v5911_v53  ;;  %6482 = vst [vmem:[#allocation59_spill] sm:$0xff] %v5913_v23  ;;  %v2440_v53 = vadd.f32 %v4339_v8, %v5750_v56  ;;  %v2438_v23 = vadd.f32 %v2329_v61, %v5753_v28 }
 0x247   : > { %v5915_v60 = vpop.f32.mrf.mxu0  ;;  %v5917_v27 = vpop.f32.mrf.mxu1 }
 0x248   : > { %6483 = vst [vmem:[#allocation60_spill] sm:$0xff] %v5915_v60  ;;  %6484 = vst [vmem:[#allocation61_spill] sm:$0xff] %v5917_v27  ;;  %v2719_v27 = vadd.f32 %v5827_v4, %v2439_v48  ;;  %v2444_v48 = vadd.f32 %v5837_v51, %v5762_v13 }
 0x249   : > { %v5920_v21 = vpop.f32.mrf.mxu0  ;;  %v5922_v58 = vpop.f32.mrf.mxu1 }
 0x24a   : > { %6485 = vst [vmem:[#allocation62_spill] sm:$0xff] %v5920_v21  ;;  %6486 = vst [vmem:[#allocation63_spill] sm:$0xff] %v5922_v58  ;;  %v2720_v21 = vadd.f32 %v5829_v38, %v2440_v53  ;;  %v2718_v58 = vadd.f32 %v2609_v37, %v2438_v23  ;;  %v2723_v23 = vadd.f32 %v5833_v46, %v2443_v25 }
 0x24b   : > { %v5925_v44 = vpop.f32.mrf.mxu0  ;;  %v4426_v10 = vpop.f32.mrf.mxu1  ;;  %v2727_v25 = vadd.f32 %v5847_v14, %v2447_v54 }
 0x24c   : > { %6487 = vst [vmem:[#allocation64_spill] sm:$0xff] %v5925_v44  ;;  %v2999_v52 = vadd.f32 %v4426_v10, %v2719_v27 }
 0x24d   : > { %v4470_v30 = vpop.f32.mrf.mxu0  ;;  %v2886_v60 = vpop.f32.mrf.mxu1 }
 0x24e   : > { %v2997_v63 = vadd.f32 %v2886_v60, %v2717_v26  ;;  %v2442_v26 = vadd.f32 %v5841_v2, %v5765_v50  ;;  %v2721_v60 = vadd.f32 %v5835_v43, %v2441_v35  ;;  %v3279_v55 = vadd.f32 %v4470_v30, %v2999_v52 }
 0x24f   : > { %v3166_v19 = vpop.f32.mrf.mxu0  ;;  %v4427_v20 = vpop.f32.mrf.mxu1  ;;  %v2724_v50 = vadd.f32 %v5839_v59, %v2444_v48  ;;  %v2445_v30 = vadd.f32 %v5849_v31, %v5771_v0  ;;  %v2448_v31 = vadd.f32 %v5853_v11, %v5774_v24 }
 0x250   : > { %v3277_v29 = vadd.f32 %v3166_v19, %v2997_v63  ;;  %v3000_v28 = vadd.f32 %v4427_v20, %v2720_v21  ;;  %v2722_v38 = vadd.f32 %v5843_v34, %v2442_v26  ;;  %v5951_v12 = vmul.f32 %v5046_v16, %v3279_v55 }
 0x251   : > { %v4471_v44 = vpop.f32.mrf.mxu0  ;;  %v2889_v56 = vpop.f32.mrf.mxu1  ;;  %v2725_v16 = vadd.f32 %v5851_v33, %v2445_v30  ;;  %v2446_v19 = vadd.f32 %v5857_v42, %v5777_v41  ;;  %v2728_v42 = vadd.f32 %v5855_v45, %v2448_v31  ;;  %v6497_v31 = vld [vmem:[#allocation22_spill] sm:$0xff] }
 0x252   : > { %v2998_v8 = vadd.f32 %v2889_v56, %v2718_v58  ;;  %v5941_v63 = vmul.f32 %v5007_v9, %v3277_v29  ;;  %v3280_v58 = vadd.f32 %v4471_v44, %v3000_v28  ;;  %v2449_v28 = vadd.f32 %v5865_v32, %v5783_v6 }
 0x253   : > { %v3169_v61 = vpop.f32.mrf.mxu0  ;;  %v4430_v53 = vpop.f32.mrf.mxu1 }
 0x254   : > { %v3278_v27 = vadd.f32 %v3169_v61, %v2998_v8  ;;  %v3003_v44 = vadd.f32 %v4430_v53, %v2723_v23  ;;  %v5958_v51 = vmul.f32 %v5073_v47, %v3280_v58  ;;  %v6489_v23 = vld [vmem:[#allocation39_spill] sm:$0xff] }
 0x255   : > { %v4474_v10 = vpop.f32.mrf.mxu0  ;;  %v2902_v3 = vpop.f32.mrf.mxu1 }
 0x256   : > { %v5944_v21 = vmul.f32 %v5010_v62, %v3278_v27  ;;  %v3001_v13 = vadd.f32 %v2902_v3, %v2721_v60  ;;  %v3283_v35 = vadd.f32 %v4474_v10, %v3003_v44  ;;  %v2452_v27 = vadd.f32 %v5869_v57, %v5786_v1  ;;  %v6488_v10 = vld [vmem:[#allocation24_spill] sm:$0xff]  ;;  %v6492_v44 = vld [vmem:[#allocation17_spill] sm:$0xff] }
 0x257   : > { %v3182_v4 = vpop.f32.mrf.mxu0  ;;  %v4431_v37 = vpop.f32.mrf.mxu1  ;;  %v2450_v3 = vadd.f32 %v6489_v23, %v6488_v10 }
 0x258   : > { %v3333_v9 = vadd.f32 %v5944_v21, %v5941_v63  ;;  %v3281_v46 = vadd.f32 %v3182_v4, %v3001_v13  ;;  %v3004_v0 = vadd.f32 %v4431_v37, %v2724_v50  ;;  %v5980_v61 = vmul.f32 %v5146_v40, %v3283_v35 }
 0x259   : > { %v4475_v62 = vpop.f32.mrf.mxu0  ;;  %v2905_v43 = vpop.f32.mrf.mxu1  ;;  %v2729_v40 = vadd.f32 %v5867_v7, %v2449_v28 }
 0x25a   : > { %v3334_v59 = vadd.f32 %v3333_v9, %v5951_v12  ;;  %v3002_v2 = vadd.f32 %v2905_v43, %v2722_v38  ;;  %v5967_v5 = vmul.f32 %v5078_v36, %v3281_v46  ;;  %v3284_v29 = vadd.f32 %v4475_v62, %v3004_v0  ;;  %v6491_v38 = vld [vmem:[#allocation37_spill] sm:$0xff]  ;;  %v6493_v62 = vld [vmem:[#allocation38_spill] sm:$0xff]  ;;  %v6494_v43 = vld [vmem:[#allocation40_spill] sm:$0xff] }
 0x25b   : > { %v3185_v34 = vpop.f32.mrf.mxu0  ;;  %v4434_v20 = vpop.f32.mrf.mxu1  ;;  %v2726_v36 = vadd.f32 %v5859_v22, %v2446_v19  ;;  %v2732_v54 = vadd.f32 %v6493_v62, %v2452_v27  ;;  %v6495_v0 = vld [vmem:[#allocation26_spill] sm:$0xff] }
 0x25c   : > { %v3335_v47 = vadd.f32 %v3334_v59, %v5958_v51  ;;  %v3282_v18 = vadd.f32 %v3185_v34, %v3002_v2  ;;  %v3007_v48 = vadd.f32 %v4434_v20, %v2727_v25  ;;  %v5986_v45 = vmul.f32 %v5151_v39, %v3284_v29  ;;  %v6496_v2 = vld [vmem:[#allocation43_spill] sm:$0xff]  ;;  %v6499_v25 = vld [vmem:[#allocation41_spill] sm:$0xff] }
 0x25d   : > { %v4478_v52 = vpop.f32.mrf.mxu0  ;;  %v2918_v56 = vpop.f32.mrf.mxu1  ;;  %v2730_v59 = vadd.f32 %v6494_v43, %v2450_v3  ;;  %v2453_v34 = vadd.f32 %v6496_v2, %v6495_v0  ;;  %v6500_v29 = vld [vmem:[#allocation23_spill] sm:$0xff]  ;;  %v6507_v3 = vld [vmem:[#allocation42_spill] sm:$0xff]  ;;  %v6513_v43 = vld [vmem:[#allocation8_spill] sm:$0xff] }
 0x25e   : > { %v3336_v33 = vadd.f32 %v3335_v47, %v5967_v5  ;;  %v5973_v24 = vmul.f32 %v5081_v49, %v3282_v18  ;;  %v3005_v11 = vadd.f32 %v2918_v56, %v2725_v16  ;;  %v2451_v49 = vadd.f32 %v5861_v15, %v5780_v17  ;;  %v6490_v17 = vld [vmem:[#allocation16_spill] sm:$0xff] }
 0x25f   : > { %v3198_v41 = vpop.f32.mrf.mxu0  ;;  %v4435_v8 = vpop.f32.mrf.mxu1  ;;  %v3287_v13 = vadd.f32 %v4478_v52, %v3007_v48  ;;  %v6498_v52 = vld [vmem:[#allocation25_spill] sm:$0xff]  ;;  %v6502_v48 = vld [vmem:[#allocation27_spill] sm:$0xff] }
 0x260   : > { %v3337_v14 = vadd.f32 %v3336_v33, %v5973_v24  ;;  %v3285_v26 = vadd.f32 %v3198_v41, %v3005_v11  ;;  %v3008_v55 = vadd.f32 %v4435_v8, %v2728_v42  ;;  %v2731_v30 = vadd.f32 %v6491_v38, %v2451_v49  ;;  %v6501_v8 = vld [vmem:[#allocation44_spill] sm:$0xff] }
 0x261   : > { %v4479_v53 = vpop.f32.mrf.mxu0  ;;  %v2921_v60 = vpop.f32.mrf.mxu1  ;;  %v6008_v19 = vmul.f32 %v6497_v31, %v3287_v13  ;;  %v2455_v56 = vadd.f32 %v6499_v25, %v6498_v52  ;;  %v6504_v49 = vld [vmem:[#allocation28_spill] sm:$0xff]  ;;  %v6514_v31 = vld [vmem:[#allocation29_spill] sm:$0xff] }
 0x262   : > { %v3338_v22 = vadd.f32 %v3337_v14, %v5980_v61  ;;  %v3006_v6 = vadd.f32 %v2921_v60, %v2726_v36  ;;  %v5995_v15 = vmul.f32 %v6490_v17, %v3285_v26  ;;  %v3288_v9 = vadd.f32 %v4479_v53, %v3008_v55  ;;  %v6503_v26 = vld [vmem:[#allocation45_spill] sm:$0xff]  ;;  %v6505_v60 = vld [vmem:[#allocation47_spill] sm:$0xff] }
 0x263   : > { %v3201_v32 = vpop.f32.mrf.mxu0  ;;  %v4438_v58 = vpop.f32.mrf.mxu1  ;;  %v2733_v14 = vadd.f32 %v6501_v8, %v2453_v34  ;;  %v2456_v53 = vadd.f32 %v6503_v26, %v6502_v48  ;;  %v6521_v48 = vld [vmem:[#allocation55_spill] sm:$0xff] }
 0x264   : > { %v3339_v39 = vadd.f32 %v3338_v22, %v5986_v45  ;;  %v3286_v4 = vadd.f32 %v3201_v32, %v3006_v6  ;;  %v3011_v35 = vadd.f32 %v4438_v58, %v2731_v30  ;;  %v6014_v11 = vmul.f32 %v6500_v29, %v3288_v9  ;;  %v6506_v32 = vld [vmem:[#allocation3_spill] sm:$0xff]  ;;  %v6510_v9 = vld [vmem:[#allocation48_spill] sm:$0xff] }
 0x265   : > { %v4482_v50 = vpop.f32.mrf.mxu0  ;;  %v2934_v37 = vpop.f32.mrf.mxu1  ;;  %v2454_v22 = vadd.f32 %v6505_v60, %v6504_v49  ;;  %v2735_v58 = vadd.f32 %v6507_v3, %v2455_v56  ;;  %v6522_v60 = vld [vmem:[#allocation10_spill] sm:$0xff] }
 0x266   : > { %v3340_v7 = vadd.f32 %v3339_v39, %v5995_v15  ;;  %v6001_v1 = vmul.f32 %v6492_v44, %v3286_v4  ;;  %v3009_v57 = vadd.f32 %v2934_v37, %v2729_v40  ;;  %v3291_v6 = vadd.f32 %v4482_v50, %v3011_v35  ;;  %v6508_v4 = vld [vmem:[#allocation4_spill] sm:$0xff] }
 0x267   : > { %v3214_v46 = vpop.f32.mrf.mxu0  ;;  %v4439_v16 = vpop.f32.mrf.mxu1  ;;  %v2734_v44 = vadd.f32 %v6510_v9, %v2454_v22  ;;  %v6527_v9 = vld [vmem:[#allocation34_spill] sm:$0xff] }
 0x268   : > { %v3341_v20 = vadd.f32 %v3340_v7, %v6001_v1  ;;  %v3289_v47 = vadd.f32 %v3214_v46, %v3009_v57  ;;  %v3012_v42 = vadd.f32 %v4439_v16, %v2732_v54  ;;  %v6509_v7 = vld [vmem:[#allocation46_spill] sm:$0xff]  ;;  %v6512_v46 = vld [vmem:[#allocation51_spill] sm:$0xff] }
 0x269   : > { %v4483_v18 = vpop.f32.mrf.mxu0  ;;  %v2937_v33 = vpop.f32.mrf.mxu1  ;;  %v2736_v50 = vadd.f32 %v6509_v7, %v2456_v53  ;;  %v6511_v57 = vld [vmem:[#allocation30_spill] sm:$0xff]  ;;  %v6526_v7 = vld [vmem:[#allocation56_spill] sm:$0xff] }
 0x26a   : > { %v3342_v41 = vadd.f32 %v3341_v20, %v6008_v19  ;;  %v3010_v36 = vadd.f32 %v2937_v33, %v2730_v59  ;;  %v6023_v40 = vmul.f32 %v6506_v32, %v3289_v47  ;;  %v3292_v39 = vadd.f32 %v4483_v18, %v3012_v42  ;;  %v6515_v20 = vld [vmem:[#allocation49_spill] sm:$0xff] }
 0x26b   : > { %v3217_v28 = vpop.f32.mrf.mxu0  ;;  %v4442_v55 = vpop.f32.mrf.mxu1  ;;  %v2457_v62 = vadd.f32 %v6512_v46, %v6511_v57  ;;  %v6036_v59 = vmul.f32 %v6513_v43, %v3291_v6  ;;  %v2459_v35 = vadd.f32 %v6515_v20, %v6514_v31  ;;  %v6516_v18 = vld [vmem:[#allocation9_spill] sm:$0xff] }
 0x26c   : > { %v3343_v27 = vadd.f32 %v3342_v41, %v6014_v11  ;;  %v3290_v10 = vadd.f32 %v3217_v28, %v3010_v36  ;;  %v3015_v2 = vadd.f32 %v4442_v55, %v2735_v58  ;;  %v6042_v52 = vmul.f32 %v6516_v18, %v3292_v39  ;;  %v6517_v41 = vld [vmem:[#allocation52_spill] sm:$0xff]  ;;  %v6518_v36 = vld [vmem:[#allocation31_spill] sm:$0xff]  ;;  %v6519_v28 = vld [vmem:[#allocation53_spill] sm:$0xff] }
 0x26d   : > { %v4486_v23 = vpop.f32.mrf.mxu0  ;;  %v2950_v13 = vpop.f32.mrf.mxu1  ;;  %v2737_v42 = vadd.f32 %v6517_v41, %v2457_v62  ;;  %v2460_v8 = vadd.f32 %v6519_v28, %v6518_v36  ;;  %v6529_v62 = vld [vmem:[#allocation12_spill] sm:$0xff]  ;;  %v6531_v31 = vld [vmem:[#allocation57_spill] sm:$0xff]  ;;  %v6534_v36 = vld [vmem:[#allocation35_spill] sm:$0xff] }
 0x26e   : > { %v3344_v17 = vadd.f32 %v3343_v27, %v6023_v40  ;;  %v6029_v38 = vmul.f32 %v6508_v4, %v3290_v10  ;;  %v3013_v30 = vadd.f32 %v2950_v13, %v2733_v14  ;;  %v6520_v14 = vld [vmem:[#allocation32_spill] sm:$0xff]  ;;  %v3295_v49 = vadd.f32 %v4486_v23, %v3015_v2  ;;  %v6523_v27 = vld [vmem:[#allocation50_spill] sm:$0xff]  ;;  %v6535_v28 = vld [vmem:[#allocation61_spill] sm:$0xff] }
 0x26f   : > { %v3230_v37 = vpop.f32.mrf.mxu0  ;;  %v4443_v54 = vpop.f32.mrf.mxu1  ;;  %v2458_v26 = vadd.f32 %v6521_v48, %v6520_v14  ;;  %v2739_v10 = vadd.f32 %v6523_v27, %v2459_v35  ;;  %v6533_v41 = vld [vmem:[#allocation60_spill] sm:$0xff]  ;;  %v6537_v48 = vld [vmem:[#allocation63_spill] sm:$0xff] }
 0x270   : > { %v3345_v0 = vadd.f32 %v3344_v17, %v6029_v38  ;;  %v3293_v34 = vadd.f32 %v3230_v37, %v3013_v30  ;;  %v3016_v56 = vadd.f32 %v4443_v54, %v2736_v50  ;;  %v6524_v17 = vld [vmem:[#allocation11_spill] sm:$0xff]  ;;  %v6525_v37 = vld [vmem:[#allocation54_spill] sm:$0xff]  ;;  %v6064_v54 = vmul.f32 %v6529_v62, %v3295_v49  ;;  %v6536_v14 = vld [vmem:[#allocation36_spill] sm:$0xff] }
 0x271   : > { %v4487_v16 = vpop.f32.mrf.mxu0  ;;  %v2953_v47 = vpop.f32.mrf.mxu1  ;;  %v2740_v23 = vadd.f32 %v6525_v37, %v2460_v8  ;;  %v2738_v50 = vadd.f32 %v6526_v7, %v2458_v26  ;;  %v2464_v8 = vadd.f32 %v6535_v28, %v6534_v36  ;;  %v2462_v26 = vadd.f32 %v6537_v48, %v6536_v14  ;;  %v6546_v14 = vld [vmem:[#allocation21_spill] sm:$0xff] }
 0x272   : > { %v3346_v25 = vadd.f32 %v3345_v0, %v6036_v59  ;;  %v3014_v33 = vadd.f32 %v2953_v47, %v2734_v44  ;;  %v6051_v22 = vmul.f32 %v6522_v60, %v3293_v34  ;;  %v3296_v13 = vadd.f32 %v4487_v16, %v3016_v56  ;;  %v6528_v44 = vld [vmem:[#allocation59_spill] sm:$0xff]  ;;  %v6530_v16 = vld [vmem:[#allocation33_spill] sm:$0xff]  ;;  %v6538_v60 = vld [vmem:[#allocation14_spill] sm:$0xff] }
 0x273   : > { %v3233_v29 = vpop.f32.mrf.mxu0  ;;  %v4446_v53 = vpop.f32.mrf.mxu1  ;;  %v2461_v57 = vadd.f32 %v6528_v44, %v6527_v9  ;;  %v2463_v20 = vadd.f32 %v6531_v31, %v6530_v16  ;;  %v6532_v47 = vld [vmem:[#allocation13_spill] sm:$0xff] }
 0x274   : > { %v3347_v55 = vadd.f32 %v3346_v25, %v6042_v52  ;;  %v3294_v6 = vadd.f32 %v3233_v29, %v3014_v33  ;;  %v3019_v0 = vadd.f32 %v4446_v53, %v2739_v10  ;;  %v6070_v18 = vmul.f32 %v6532_v47, %v3296_v13 }
 0x275   : > { %v4490_v32 = vpop.f32.mrf.mxu0  ;;  %v2966_v3 = vpop.f32.mrf.mxu1 }
 0x276   : > { %v3348_v58 = vadd.f32 %v3347_v55, %v6051_v22  ;;  %v6057_v39 = vmul.f32 %v6524_v17, %v3294_v6  ;;  %v3017_v4 = vadd.f32 %v2966_v3, %v2737_v42  ;;  %v2741_v42 = vadd.f32 %v6533_v41, %v2461_v57  ;;  %v6539_v3 = vld [vmem:[#allocation58_spill] sm:$0xff] }
 0x277   : > { %v3246_v30 = vpop.f32.mrf.mxu0  ;;  %v4447_v46 = vpop.f32.mrf.mxu1  ;;  %v3299_v49 = vadd.f32 %v4490_v32, %v3019_v0  ;;  %v6542_v32 = vld [vmem:[#allocation64_spill] sm:$0xff] }
 0x278   : > { %v3349_v43 = vadd.f32 %v3348_v58, %v6057_v39  ;;  %v3297_v2 = vadd.f32 %v3246_v30, %v3017_v4  ;;  %v3020_v56 = vadd.f32 %v4447_v46, %v2740_v23  ;;  %v2743_v58 = vadd.f32 %v6539_v3, %v2463_v20  ;;  %v6540_v30 = vld [vmem:[#allocation15_spill] sm:$0xff]  ;;  %v6543_v46 = vld [vmem:[#allocation18_spill] sm:$0xff] }
 0x279   : > { %v4491_v34 = vpop.f32.mrf.mxu0  ;;  %v2969_v35 = vpop.f32.mrf.mxu1  ;;  %v2742_v44 = vadd.f32 %v6542_v32, %v2462_v26  ;;  %v3327_v62 = vmul.f32 %v6543_v46, %v3299_v49  ;;  %v6544_v20 = vld [vmem:[#allocation19_spill] sm:$0xff]  ;;  %v6547_v26 = vld [vmem:[#allocation5_spill] sm:$0xff] }
 0x27a   : > { %v3350_v25 = vadd.f32 %v3349_v43, %v6064_v54  ;;  %v3018_v33 = vadd.f32 %v2969_v35, %v2738_v50  ;;  %v6079_v55 = vmul.f32 %v6538_v60, %v3297_v2  ;;  %v3300_v4 = vadd.f32 %v4491_v34, %v3020_v56  ;;  %v6541_v50 = vld [vmem:[#allocation62_spill] sm:$0xff] }
 0x27b   : > { %v3249_v29 = vpop.f32.mrf.mxu0  ;;  %v4450_v53 = vpop.f32.mrf.mxu1  ;;  %v2744_v9 = vadd.f32 %v6541_v50, %v2464_v8  ;;  %v6548_v60 = vld [vmem:[#allocation6_spill] sm:$0xff] }
 0x27c   : > { %v3351_v6 = vadd.f32 %v3350_v25, %v6070_v18  ;;  %v3298_v27 = vadd.f32 %v3249_v29, %v3018_v33  ;;  %v3023_v0 = vadd.f32 %v4450_v53, %v2743_v58  ;;  %v3328_v35 = vmul.f32 %v6544_v20, %v3300_v4  ;;  %v6545_v29 = vld [vmem:[#allocation20_spill] sm:$0xff] }
 0x27d   : > { %v4494_v10 = vpop.f32.mrf.mxu0  ;;  %v2982_v13 = vpop.f32.mrf.mxu1 }
 0x27e   : > { %v3352_v17 = vadd.f32 %v3351_v6, %v6079_v55  ;;  %v3326_v37 = vmul.f32 %v6540_v30, %v3298_v27  ;;  %v3021_v23 = vadd.f32 %v2982_v13, %v2741_v42  ;;  %v3303_v33 = vadd.f32 %v4494_v10, %v3023_v0 }
 0x27f   : > { %v3262_v7 = vpop.f32.mrf.mxu0  ;;  %v4451_v57 = vpop.f32.mrf.mxu1 }
 0x280   : > { %v3353_v43 = vadd.f32 %v3352_v17, %v3326_v37  ;;  %v3301_v2 = vadd.f32 %v3262_v7, %v3021_v23  ;;  %v3024_v34 = vadd.f32 %v4451_v57, %v2744_v9  ;;  %v3331_v53 = vmul.f32 %v6547_v26, %v3303_v33 }
 0x281   : > { %v4495_v16 = vpop.f32.mrf.mxu0  ;;  %v2985_v31 = vpop.f32.mrf.mxu1 }
 0x282   : > { %v3354_v47 = vadd.f32 %v3353_v43, %v3327_v62  ;;  %v3022_v25 = vadd.f32 %v2985_v31, %v2742_v44  ;;  %v3329_v41 = vmul.f32 %v6545_v29, %v3301_v2  ;;  %v3304_v8 = vadd.f32 %v4495_v16, %v3024_v34 }
 0x283   : > { %v3265_v56 = vpop.f32.mrf.mxu0 }
 0x284   : > { %v3355_v42 = vadd.f32 %v3354_v47, %v3328_v35  ;;  %v3302_v36 = vadd.f32 %v3265_v56, %v3022_v25  ;;  %v3332_v6 = vmul.f32 %v6548_v60, %v3304_v8 }
 0x286   : > { %v3356_v28 = vadd.f32 %v3355_v42, %v3329_v41  ;;  %v3330_v48 = vmul.f32 %v6546_v14, %v3302_v36 }
 0x288   : > { %v3357_v49 = vadd.f32 %v3356_v28, %v3330_v48 }
 0x28a   : > { %v3358_v27 = vadd.f32 %v3357_v49, %v3331_v53 }
 0x28c   : > { %v3359_v3 = vadd.f32 %v3358_v27, %v3332_v6 }
 0x28e   : > { %v3360_v58 = vrot.slane %v3359_v3, 4 }
 0x290   : > { %v3361_v13 = vadd.f32 %v3360_v58, %v3359_v3 }
 0x292   : > { %v3362_v17 = vrot.slane %v3361_v13, 2 }
 0x294   : > { %v3363_v4 = vadd.f32 %v3362_v17, %v3361_v13 }
 0x296   : > { %v3364_v10 = vrot.slane %v3363_v4, 1 }
 0x298   : > { %v3365_v30 = vadd.f32 %v3364_v10, %v3363_v4 }
 0x29a   : > { %v6093_v23 = vmul.f32 0.0051020407, %v3365_v30 }
 0x29c   : > { %v6097_v7 = vsub.f32 %v5941_v63, %v6093_v23  ;;  %v6101_v50 = vsub.f32 %v5944_v21, %v6093_v23  ;;  %v6105_v9 = vsub.f32 %v5958_v51, %v6093_v23  ;;  %v6109_v32 = vsub.f32 %v5967_v5, %v6093_v23 }
 0x29d   : > { %v6113_v44 = vsub.f32 %v5973_v24, %v6093_v23  ;;  %v6117_v63 = vsub.f32 %v5980_v61, %v6093_v23  ;;  %v6121_v21 = vsub.f32 %v5986_v45, %v6093_v23  ;;  %v6125_v51 = vsub.f32 %v5995_v15, %v6093_v23 }
 0x29e   : > { %v6129_v5 = vsub.f32 %v6001_v1, %v6093_v23  ;;  %v6133_v24 = vsub.f32 %v6008_v19, %v6093_v23  ;;  %v6137_v61 = vsub.f32 %v6014_v11, %v6093_v23  ;;  %v6141_v45 = vsub.f32 %v6023_v40, %v6093_v23 }
 0x29f   : > { %v6145_v15 = vsub.f32 %v6029_v38, %v6093_v23  ;;  %v6149_v1 = vsub.f32 %v6036_v59, %v6093_v23  ;;  %v6153_v19 = vsub.f32 %v6042_v52, %v6093_v23  ;;  %v6157_v11 = vsub.f32 %v6051_v22, %v6093_v23 }
 0x2a0   : > { %v6161_v40 = vsub.f32 %v6057_v39, %v6093_v23  ;;  %v6165_v38 = vsub.f32 %v6064_v54, %v6093_v23  ;;  %v6169_v59 = vsub.f32 %v6070_v18, %v6093_v23  ;;  %v6173_v52 = vsub.f32 %v6079_v55, %v6093_v23 }
 0x2a1   : > { %v6176_v57 = vsub.f32 %v3326_v37, %v6093_v23  ;;  %v6179_v22 = vsub.f32 %v3327_v62, %v6093_v23  ;;  %v6182_v39 = vsub.f32 %v3328_v35, %v6093_v23  ;;  %v6185_v54 = vsub.f32 %v3329_v41, %v6093_v23 }
 0x2a2   : > { %v6188_v46 = vsub.f32 %v3330_v48, %v6093_v23  ;;  %v6191_v18 = vsub.f32 %v3331_v53, %v6093_v23  ;;  %v6194_v55 = vsub.f32 %v3332_v6, %v6093_v23  ;;  %v6198_v37 = vsub.f32 %v5951_v12, %v6093_v23 }
 0x2a3   : > { %v3395_v62 = vmul.f32 %v6097_v7, %v6097_v7  ;;  %v3396_v43 = vmul.f32 %v6101_v50, %v6101_v50  ;;  %v3398_v16 = vmul.f32 %v6105_v9, %v6105_v9  ;;  %v3399_v20 = vmul.f32 %v6109_v32, %v6109_v32 }
 0x2a4   : > { %v3397_v0 = vmul.f32 %v6198_v37, %v6198_v37  ;;  %v3400_v12 = vmul.f32 %v6113_v44, %v6113_v44  ;;  %v3401_v34 = vmul.f32 %v6117_v63, %v6117_v63  ;;  %v3402_v56 = vmul.f32 %v6121_v21, %v6121_v21 }
 0x2a5   : > { %v3423_v2 = vadd.f32 %v3396_v43, %v3395_v62  ;;  %v3403_v29 = vmul.f32 %v6125_v51, %v6125_v51  ;;  %v3404_v42 = vmul.f32 %v6129_v5, %v6129_v5  ;;  %v3405_v28 = vmul.f32 %v6133_v24, %v6133_v24 }
 0x2a6   : > { %v3406_v14 = vmul.f32 %v6137_v61, %v6137_v61  ;;  %v3407_v26 = vmul.f32 %v6141_v45, %v6141_v45  ;;  %v3408_v49 = vmul.f32 %v6145_v15, %v6145_v15  ;;  %v3409_v6 = vmul.f32 %v6149_v1, %v6149_v1 }
 0x2a7   : > { %v3424_v31 = vadd.f32 %v3423_v2, %v3397_v0  ;;  %v3410_v3 = vmul.f32 %v6153_v19, %v6153_v19  ;;  %v3411_v13 = vmul.f32 %v6157_v11, %v6157_v11  ;;  %v3412_v4 = vmul.f32 %v6161_v40, %v6161_v40 }
 0x2a8   : > { %v3413_v30 = vmul.f32 %v6165_v38, %v6165_v38  ;;  %v3414_v43 = vmul.f32 %v6169_v59, %v6169_v59  ;;  %v3415_v2 = vmul.f32 %v6173_v52, %v6173_v52 }
 0x2a9   : > { %v3425_v35 = vadd.f32 %v3424_v31, %v3398_v16  ;;  %v3416_v31 = vmul.f32 %v6176_v57, %v6176_v57 }
 0x2ab   : > { %v3426_v47 = vadd.f32 %v3425_v35, %v3399_v20  ;;  %v3417_v35 = vmul.f32 %v6179_v22, %v6179_v22 }
 0x2ad   : > { %v3427_v25 = vadd.f32 %v3426_v47, %v3400_v12  ;;  %v3418_v47 = vmul.f32 %v6182_v39, %v6182_v39 }
 0x2af   : > { %v3428_v33 = vadd.f32 %v3427_v25, %v3401_v34  ;;  %v3419_v25 = vmul.f32 %v6185_v54, %v6185_v54 }
 0x2b1   : > { %v3429_v41 = vadd.f32 %v3428_v33, %v3402_v56  ;;  %v3420_v33 = vmul.f32 %v6188_v46, %v6188_v46 }
 0x2b3   : > { %v3430_v36 = vadd.f32 %v3429_v41, %v3403_v29  ;;  %v3421_v41 = vmul.f32 %v6191_v18, %v6191_v18 }
 0x2b5   : > { %v3431_v8 = vadd.f32 %v3430_v36, %v3404_v42  ;;  %v3422_v36 = vmul.f32 %v6194_v55, %v6194_v55 }
 0x2b7   : > { %v3432_v48 = vadd.f32 %v3431_v8, %v3405_v28 }
 0x2b9   : > { %v3433_v53 = vadd.f32 %v3432_v48, %v3406_v14 }
 0x2bb   : > { %v3434_v60 = vadd.f32 %v3433_v53, %v3407_v26 }
 0x2bd   : > { %v3435_v27 = vadd.f32 %v3434_v60, %v3408_v49  ;;  %v3456_v49 = vmul.f32 28.0, %v6093_v23 }
 0x2bf   : > { %v3436_v58 = vadd.f32 %v3435_v27, %v3409_v6  ;;  %v3457_v27 = vmul.f32 %v3456_v49, %v6093_v23 }
 0x2c1   : > { %v3437_v17 = vadd.f32 %v3436_v58, %v3410_v3 }
 0x2c3   : > { %v3438_v10 = vadd.f32 %v3437_v17, %v3411_v13  ;;  %v3462_v17 = vld [vmem:[%s319_s15] sm:$0x1] }
 0x2c5   : > { %v3439_v62 = vadd.f32 %v3438_v10, %v3412_v4 }
 0x2c7   : > { %v3440_v0 = vadd.f32 %v3439_v62, %v3413_v30  ;;  %v6549_v30 = vld [vmem:[#allocation7_spill] sm:$0xff] }
 0x2c8   : > { %v6550_v62 = vsub.s32 0, %v6549_v30 }
 0x2c9   : > { %v3441_v16 = vadd.f32 %v3440_v0, %v3414_v43 }
 0x2cb   : > { %v3442_v20 = vadd.f32 %v3441_v16, %v3415_v2 }
 0x2cd   : > { %v3443_v12 = vadd.f32 %v3442_v20, %v3416_v31 }
 0x2cf   : > { %v3444_v34 = vadd.f32 %v3443_v12, %v3417_v35 }
 0x2d1   : > { %v3445_v56 = vadd.f32 %v3444_v34, %v3418_v47 }
 0x2d3   : > { %v3446_v29 = vadd.f32 %v3445_v56, %v3419_v25  ;;  %v3899_v25 = vld [vmem:[%s322_s18] ss:$0 sm:$0xff] }
 0x2d5   : > { %v3447_v42 = vadd.f32 %v3446_v29, %v3420_v33 }
 0x2d7   : > { %v3448_v28 = vadd.f32 %v3447_v42, %v3421_v41 }
 0x2d9   : > { %v3449_v8 = vadd.f32 %v3448_v28, %v3422_v36 }
 0x2db   : > { %v3450_v14 = vrot.slane %v3449_v8, 4 }
 0x2dd   : > { %v3451_v48 = vadd.f32 %v3450_v14, %v3449_v8 }
 0x2df   : > { %v3452_v26 = vrot.slane %v3451_v48, 2 }
 0x2e1   : > { %v3453_v53 = vadd.f32 %v3452_v26, %v3451_v48 }
 0x2e3   : > { %v3454_v60 = vrot.slane %v3453_v53, 1 }
 0x2e5   : > { %v3455_v6 = vadd.f32 %v3454_v60, %v3453_v53 }
 0x2e7   : > { %v3458_v3 = vsub.f32 %v3455_v6, %v3457_v27 }
 0x2e9   : > { %v3459_v58 = vmul.f32 0.0051020407, %v3458_v3 }
 0x2eb   : > { %v3460_v13 = vadd.f32 1e-05, %v3459_v58 }
 0x2ed   : > { %4597 = vrsqrt.f32 %v3460_v13 }
 0x2fa   : > { %v4598_v4 = vpop.eup %4597 }
 0x2fb   : > { %v3463_v10 = vmul.f32 %v4598_v4, %v3462_v17 }
 0x2fd   : > { %v3467_v43 = vrot.slane %v3463_v10, %v6550_v62 }
 0x2ff   : > { %v3468_v0 = vmul.f32 %v3467_v43, %v6097_v7  ;;  %v3469_v2 = vmul.f32 %v3467_v43, %v6101_v50  ;;  %v3470_v23 = vmul.f32 %v3467_v43, %v6198_v37  ;;  %v3471_v16 = vmul.f32 %v3467_v43, %v6105_v9 }
 0x300   : > { %v3472_v31 = vmul.f32 %v3467_v43, %v6109_v32  ;;  %v3473_v20 = vmul.f32 %v3467_v43, %v6113_v44  ;;  %v3474_v35 = vmul.f32 %v3467_v43, %v6117_v63  ;;  %v3475_v12 = vmul.f32 %v3467_v43, %v6121_v21 }
 0x301   : > { %v3476_v7 = vmul.f32 %v3467_v43, %v6125_v51  ;;  %v3477_v50 = vmul.f32 %v3467_v43, %v6129_v5  ;;  %v3478_v37 = vmul.f32 %v3467_v43, %v6133_v24  ;;  %v3479_v9 = vmul.f32 %v3467_v43, %v6137_v61 }
 0x302   : > { %v3480_v47 = vmul.f32 %v3467_v43, %v6141_v45  ;;  %v3481_v34 = vmul.f32 %v3467_v43, %v6145_v15  ;;  %v3482_v32 = vmul.f32 %v3467_v43, %v6149_v1  ;;  %v3483_v44 = vmul.f32 %v3467_v43, %v6153_v19 }
 0x303   : > { %v3484_v63 = vmul.f32 %v3467_v43, %v6157_v11  ;;  %v3485_v21 = vmul.f32 %v3467_v43, %v6161_v40  ;;  %v3486_v51 = vmul.f32 %v3467_v43, %v6165_v38  ;;  %v3487_v5 = vmul.f32 %v3467_v43, %v6169_v59 }
 0x304   : > { %v3488_v24 = vmul.f32 %v3467_v43, %v6173_v52  ;;  %v3489_v61 = vmul.f32 %v3467_v43, %v6176_v57  ;;  %v3490_v45 = vmul.f32 %v3467_v43, %v6179_v22  ;;  %v3491_v15 = vmul.f32 %v3467_v43, %v6182_v39 }
 0x305   : > { %v3492_v1 = vmul.f32 %v3467_v43, %v6185_v54  ;;  %v3493_v19 = vmul.f32 %v3467_v43, %v6188_v46  ;;  %v3494_v11 = vmul.f32 %v3467_v43, %v6191_v18  ;;  %v3495_v40 = vmul.f32 %v3467_v43, %v6194_v55 }
 0x306   : > { %v3503_v38 = vadd.f32 %v3899_v25, %v3468_v0  ;;  %v3504_v59 = vadd.f32 %v3899_v25, %v3469_v2  ;;  %v3505_v52 = vadd.f32 %v3899_v25, %v3470_v23  ;;  %v3506_v57 = vadd.f32 %v3899_v25, %v3471_v16 }
 0x307   : > { %v3507_v22 = vadd.f32 %v3899_v25, %v3472_v31  ;;  %v3508_v39 = vadd.f32 %v3899_v25, %v3473_v20  ;;  %v3509_v56 = vadd.f32 %v3899_v25, %v3474_v35  ;;  %v3510_v54 = vadd.f32 %v3899_v25, %v3475_v12 }
 0x308   : > { %v3511_v46 = vadd.f32 %v3899_v25, %v3476_v7  ;;  %v3512_v33 = vadd.f32 %v3899_v25, %v3477_v50  ;;  %v3513_v29 = vadd.f32 %v3899_v25, %v3478_v37  ;;  %v3514_v18 = vadd.f32 %v3899_v25, %v3479_v9  ;;  %3531 = vst [vmem:[%s6297_s23] sm:$0xff] %v3503_v38 }
 0x309   : > { %3532 = vst [vmem:[%s6297_s23 + $0x8] sm:$0xff] %v3504_v59  ;;  %3533 = vst [vmem:[%s6297_s23 + $0x10] sm:$0xff] %v3505_v52  ;;  %v3515_v55 = vadd.f32 %v3899_v25, %v3480_v47  ;;  %v3516_v41 = vadd.f32 %v3899_v25, %v3481_v34  ;;  %v3517_v42 = vadd.f32 %v3899_v25, %v3482_v32 }
 0x30a   : > { %3534 = vst [vmem:[%s6297_s23 + $0x18] sm:$0xff] %v3506_v57  ;;  %v3518_v36 = vadd.f32 %v3899_v25, %v3483_v44  ;;  %3535 = vst [vmem:[%s6297_s23 + $0x20] sm:$0xff] %v3507_v22  ;;  %v3519_v28 = vadd.f32 %v3899_v25, %v3484_v63  ;;  %v3520_v8 = vadd.f32 %v3899_v25, %v3485_v21 }
 0x30b   : > { %3536 = vst [vmem:[%s6297_s23 + $0x28] sm:$0xff] %v3508_v39  ;;  %3537 = vst [vmem:[%s6297_s23 + $0x30] sm:$0xff] %v3509_v56  ;;  %v3521_v14 = vadd.f32 %v3899_v25, %v3486_v51  ;;  %v3522_v48 = vadd.f32 %v3899_v25, %v3487_v5  ;;  %v3523_v26 = vadd.f32 %v3899_v25, %v3488_v24 }
 0x30c   : > { %3538 = vst [vmem:[%s6297_s23 + $0x38] sm:$0xff] %v3510_v54  ;;  %3539 = vst [vmem:[%s6297_s23 + $0x40] sm:$0xff] %v3511_v46  ;;  %v3524_v53 = vadd.f32 %v3899_v25, %v3489_v61  ;;  %v3525_v49 = vadd.f32 %v3899_v25, %v3490_v45  ;;  %v3526_v60 = vadd.f32 %v3899_v25, %v3491_v15 }
 0x30d   : > { %3540 = vst [vmem:[%s6297_s23 + $0x48] sm:$0xff] %v3512_v33  ;;  %3541 = vst [vmem:[%s6297_s23 + $0x50] sm:$0xff] %v3513_v29  ;;  %v3527_v6 = vadd.f32 %v3899_v25, %v3492_v1  ;;  %v3528_v27 = vadd.f32 %v3899_v25, %v3493_v19  ;;  %v3529_v3 = vadd.f32 %v3899_v25, %v3494_v11 }
 0x30e   : > { %3542 = vst [vmem:[%s6297_s23 + $0x58] sm:$0xff] %v3514_v18  ;;  %3543 = vst [vmem:[%s6297_s23 + $0x60] sm:$0xff] %v3515_v55  ;;  %v3530_v58 = vadd.f32 %v3899_v25, %v3495_v40 }
 0x30f   : > { %3544 = vst [vmem:[%s6297_s23 + $0x68] sm:$0xff] %v3516_v41  ;;  %3545 = vst [vmem:[%s6297_s23 + $0x70] sm:$0xff] %v3517_v42 }
 0x310   : > { %3546 = vst [vmem:[%s6297_s23 + $0x78] sm:$0xff] %v3518_v36  ;;  %3547 = vst [vmem:[%s6297_s23 + $0x80] sm:$0xff] %v3519_v28 }
 0x311   : > { %3548 = vst [vmem:[%s6297_s23 + $0x88] sm:$0xff] %v3520_v8  ;;  %3549 = vst [vmem:[%s6297_s23 + $0x90] sm:$0xff] %v3521_v14 }
 0x312   : > { %3550 = vst [vmem:[%s6297_s23 + $0x98] sm:$0xff] %v3522_v48  ;;  %3551 = vst [vmem:[%s6297_s23 + $0xa0] sm:$0xff] %v3523_v26 }
 0x313   : > { %3552 = vst [vmem:[%s6297_s23 + $0xa8] sm:$0xff] %v3524_v53  ;;  %3553 = vst [vmem:[%s6297_s23 + $0xb0] sm:$0xff] %v3525_v49 }
 0x314   : > { %3554 = vst [vmem:[%s6297_s23 + $0xb8] sm:$0xff] %v3526_v60  ;;  %3555 = vst [vmem:[%s6297_s23 + $0xc0] sm:$0xff] %v3527_v6 }
 0x315   : > { %3556 = vst [vmem:[%s6297_s23 + $0xc8] sm:$0xff] %v3528_v27  ;;  %3557 = vst [vmem:[%s6297_s23 + $0xd0] sm:$0xff] %v3529_v3 }
 0x316   : > { %3558 = vst [vmem:[%s6297_s23 + $0xd8] sm:$0xff] %v3530_v58 }
 0x317 PF: > { %s16_s21 = sadd.s32 1, %s4607_s21  }
 0x318   : > { %p13_p4 = scmp.ge.s32.totalorder %s16_s21, 8  }
 0x31a   :  { %15 = sbr.rel (!%p13_p4) target bundleno = 1 (0x1), region = 97 }

</bundles_post_ra>
